<compile_context>
chip_gen: v7x
topology: tpu7x:2x2x1
jax: 0.10.0
libtpu: 0.0.40
codegen_flags: <defaults>
</compile_context>

<pallas_src>
import functools

import numpy as np
import jax
import jax.numpy as jnp
from jax import lax
from jax.experimental import pallas as pl
from jax.experimental.pallas import tpu as pltpu


COMPUTE_DTYPE = jnp.bfloat16          # MXU operand dtype; epilogue stays float32
TAPS = tuple((dh, dw) for dh in (-1, 0, 1) for dw in (-1, 0, 1))   # t = (dh+1)*3+(dw+1)


def _round_up(v, m):
    return -(-v // m) * m


# ----------------------------------------------------------------------------
# Host-side helpers: border masks + weight packing for the segment-major bank.
# ----------------------------------------------------------------------------
def _build_border_masks(h, w):
    """(9, H*W) f32 0/1 masks: mask[t, h*W+w] = 1 iff the tap-t source pixel
    (h+dh, w+dw) lies inside the image (i.e. is not a SAME-conv zero pad)."""
    m = np.zeros((9, h * w), np.float32)
    for t, (dh, dw) in enumerate(TAPS):
        for hh in range(h):
            if not 0 <= hh + dh < h:
                continue
            for ww in range(w):
                if 0 <= ww + dw < w:
                    m[t, hh * w + ww] = 1.0
    return m


def _pack_weight(w_hwio, stage, c_in, gc, seg_pads, dtype):
    """(3,3,Cin_s,Cout) HWIO -> (Cout, K_s) matching the segment-major bank layout:
    bank row = seg_start[j] + tap*seg_pads[j] + local_channel (zeros for pad rows)."""
    cout = w_hwio.shape[-1]
    segs = []
    for j in range(stage + 1):
        cnt = c_in if j == 0 else gc
        in0 = 0 if j == 0 else c_in + (j - 1) * gc
        pad = seg_pads[j]
        wj = w_hwio[:, :, in0:in0 + cnt, :]                          # (3,3,cnt,Cout)
        wj = jnp.pad(wj, ((0, 0), (0, 0), (0, pad - cnt), (0, 0)))   # channel pad
        segs.append(wj.reshape(9 * pad, cout))                       # tap-major, chan-inner
    return jnp.concatenate(segs, axis=0).T.astype(dtype)             # (Cout, K_s)


# ----------------------------------------------------------------------------
# Fused Pallas kernel: whole DenseBlock for b_tile images per grid step.
# ----------------------------------------------------------------------------
def _dense_block_kernel(x_ref, mask_ref,
                        w1_ref, b1_ref, w2_ref, b2_ref, w3_ref, b3_ref,
                        w4_ref, b4_ref, w5_ref, b5_ref,
                        o_ref, bank_ref, *,
                        w, hw, b_tile, gc, seg_pads, seg_starts, k_prefix):
    # Only zero bank rows that a scatter will NOT write this grid step
    # (pad rows inside stage segments when gc is not a multiple of 16).
    for j in range(1, 5):
        pad = seg_pads[j]
        if gc < pad:                                  # static; dead code when gc%16==0
            base = seg_starts[j]
            for t in range(9):
                bank_ref[base + t * pad + gc: base + (t + 1) * pad, :] = jnp.zeros(
                    (pad - gc, bank_ref.shape[1]), bank_ref.dtype)

    def scatter(vals_f32, seg, b):
        """Write the 9 shifted + border-masked (im2col) copies of one image's
        feature rows into the bank.  Shifts go to the XLU (pltpu.roll), border
        masks to the VPU in f32; the bf16 cast happens once at the store."""
        pad = seg_pads[seg]
        base = seg_starts[seg]
        cnt = vals_f32.shape[0]
        lane0 = b * hw
        for t, (dh, dw) in enumerate(TAPS):
            delta = dh * w + dw                       # flattened-HW lane offset of tap
            if delta == 0:                            # centre tap: no shift, mask all-1
                shifted = vals_f32
            else:
                rolled = pltpu.roll(vals_f32, (-delta) % hw, 1)   # out[p] = in[p+delta]
                shifted = rolled * mask_ref[t:t + 1, :]           # zero SAME-pad taps
            r0 = base + t * pad
            bank_ref[r0:r0 + cnt, lane0:lane0 + hw] = shifted.astype(bank_ref.dtype)

    def conv(w_r, b_r, k_s, act):
        """One MXU matmul over the K-prefix of segments produced so far:
        (Cout, K_s) @ (K_s, b_tile*HW); bias + LeakyReLU epilogue in f32."""
        acc = jnp.dot(w_r[...], bank_ref[0:k_s, :],
                      preferred_element_type=jnp.float32)
        acc = acc + b_r[...]                           # (Cout,1) broadcast over lanes
        if act:
            acc = jnp.where(acc > 0, acc, 0.2 * acc)   # LeakyReLU(0.2), f32 VPU
        return acc

    # stage 0: scatter the (channel-padded) input image(s)
    for b in range(b_tile):
        scatter(x_ref[b].astype(jnp.float32), 0, b)

    # stages 1..4: conv over K-prefix, LeakyReLU, scatter result back into bank
    stage_params = ((w1_ref, b1_ref), (w2_ref, b2_ref),
                    (w3_ref, b3_ref), (w4_ref, b4_ref))
    for s, (w_r, b_r) in enumerate(stage_params):
        acc = conv(w_r, b_r, k_prefix[s], act=True)            # (gc, b_tile*hw) f32
        for b in range(b_tile):
            scatter(acc[:, b * hw:(b + 1) * hw], s + 1, b)

    # stage 5: conv5 (no activation) -> output
    acc = conv(w5_ref, b5_ref, k_prefix[4], act=False)          # (c_out, b_tile*hw)
    for b in range(b_tile):
        o_ref[b] = acc[:, b * hw:(b + 1) * hw].astype(o_ref.dtype)


@functools.partial(jax.jit, static_argnames=("b_tile",))
def dense_block_forward(x_nchw, params, b_tile=1):
    """Matches DenseBlock.forward; x is NCHW (PyTorch convention), weights HWIO.
    b_tile packs several images onto the lane axis per grid step; keep
    n // b_tile >= 2 so v7x megacore still gets both TensorCores busy."""
    n, c_in, h, w_dim = x_nchw.shape
    gc = params[0][0].shape[-1]
    c_out = params[-1][0].shape[-1]
    hw = h * w_dim
    assert n % b_tile == 0

    # Segment-major, 16-aligned bank geometry (bf16 sublane packing).
    seg_pads = tuple([_round_up(c_in, 16)] + [_round_up(gc, 16)] * 4)
    seg_starts = tuple(9 * sum(seg_pads[:j]) for j in range(5))
    k_prefix = tuple(9 * sum(seg_pads[:j + 1]) for j in range(5))
    k_total = k_prefix[-1]

    masks = jnp.asarray(_build_border_masks(h, w_dim), jnp.float32)   # (9, HW), 9 KiB

    wb = []
    for s, (wgt, b) in enumerate(params):
        wb.append(_pack_weight(wgt, s, c_in, gc, seg_pads, COMPUTE_DTYPE))
        wb.append(b.reshape(-1, 1).astype(jnp.float32))

    # NCHW -> (N, C, HW) is a free reshape; channel-pad x so its entire bank
    # segment is written by the scatter (no per-step bank memset needed).
    x_flat = x_nchw.reshape(n, c_in, hw)
    x_flat = jnp.pad(x_flat, ((0, 0), (0, seg_pads[0] - c_in), (0, 0)))

    in_specs = [pl.BlockSpec((b_tile, seg_pads[0], hw), lambda i: (i, 0, 0)),
                pl.BlockSpec((9, hw), lambda i: (0, 0))]
    in_specs += [pl.BlockSpec(a.shape, lambda i: (0, 0)) for a in wb]

    kern = functools.partial(
        _dense_block_kernel, w=w_dim, hw=hw, b_tile=b_tile, gc=gc,
        seg_pads=seg_pads, seg_starts=seg_starts, k_prefix=k_prefix)

    out_flat = pl.pallas_call(
        kern,
        out_shape=jax.ShapeDtypeStruct((n, c_out, hw), x_nchw.dtype),
        grid=(n // b_tile,),
        in_specs=in_specs,
        out_specs=pl.BlockSpec((b_tile, c_out, hw), lambda i: (i, 0, 0)),
        scratch_shapes=[pltpu.VMEM((k_total, b_tile * hw), COMPUTE_DTYPE)],
        compiler_params=pltpu.CompilerParams(
            dimension_semantics=("parallel",),           # batch across cores (v7x 2 TCs)
            vmem_limit_bytes=32 * 1024 * 1024),
    )(x_flat, masks, *wb)
    return out_flat.reshape(n, c_out, h, w_dim)           # free NCHW reshape


# ----------------------------------------------------------------------------
# Parameters (deterministic synthetic weights, HWIO: (3, 3, Cin, Cout))
# ----------------------------------------------------------------------------
def init_dense_block_params(key, channel_in, channel_out, gc=16):
    cins = [channel_in, channel_in + gc, channel_in + 2 * gc,
            channel_in + 3 * gc, channel_in + 4 * gc]
    couts = [gc, gc, gc, gc, channel_out]
    params = []
    for i, (ci, co) in enumerate(zip(cins, couts)):
        kw_, kb = jax.random.split(jax.random.fold_in(key, i))
        wgt = 0.05 * jax.random.normal(kw_, (3, 3, ci, co), jnp.float32)
        b = 0.05 * jax.random.normal(kb, (co,), jnp.float32)
        params.append((wgt, b))
    return params


# ----------------------------------------------------------------------------
# Pure-JAX reference (f32 lax.conv) for correctness check
# ----------------------------------------------------------------------------
def _ref_conv(x, w, b, act):
    y = lax.conv_general_dilated(
        x, w, window_strides=(1, 1), padding="SAME",
        dimension_numbers=("NHWC", "HWIO", "NHWC")) + b
    return jnp.where(y > 0, y, 0.2 * y) if act else y


def dense_block_ref(x_nchw, params):
    x = jnp.transpose(x_nchw, (0, 2, 3, 1))
    x1 = _ref_conv(x, *params[0], act=True)
    x2 = _ref_conv(jnp.concatenate([x, x1], -1), *params[1], act=True)
    x3 = _ref_conv(jnp.concatenate([x, x1, x2], -1), *params[2], act=True)
    x4 = _ref_conv(jnp.concatenate([x, x1, x2, x3], -1), *params[3], act=True)
    x5 = _ref_conv(jnp.concatenate([x, x1, x2, x3, x4], -1), *params[4], act=False)
    return jnp.transpose(x5, (0, 3, 1, 2))


if __name__ == "__main__":
    key = jax.random.PRNGKey(0)
    k_x, k_p = jax.random.split(key)

    N, C_in, H, W = 2, 4, 16, 16
    C_out, GC = 8, 16

    x = jax.random.normal(k_x, (N, C_in, H, W), jnp.float32)     # NCHW like PyTorch
    params = init_dense_block_params(k_p, C_in, C_out, gc=GC)

    # b_tile=1 keeps the parallel grid at 2 steps (one per v7x TensorCore and >=2
    # pipelined steps on v5e/v6e); raise b_tile for larger batches to widen lanes.
    out = jax.block_until_ready(dense_block_forward(x, params, b_tile=1))
    ref = jax.block_until_ready(dense_block_ref(x, params))

    assert out.shape == (N, C_out, H, W), out.shape
    # bf16 matmul operands vs f32 reference -> loose (but bug-catching) tolerance.
    tol = 3e-2 if COMPUTE_DTYPE == jnp.bfloat16 else 2e-3
    err = float(jnp.max(jnp.abs(out - ref)))
    assert jnp.allclose(out, ref, atol=tol, rtol=tol), \
        f"mismatch vs reference, max abs err={err:.3e}"
    print("KERNEL_OK")
</pallas_src>

<mosaic_0001>
module attributes {stable_mosaic.version = 11 : i64} {
  func.func @_dense_block_kernel(%arg0: i32, %arg1: memref<1x16x256xf32, #tpu.memory_space<vmem>>, %arg2: memref<9x256xf32, #tpu.memory_space<vmem>>, %arg3: memref<16x144xbf16, #tpu.memory_space<vmem>>, %arg4: memref<16x1xf32, #tpu.memory_space<vmem>>, %arg5: memref<16x288xbf16, #tpu.memory_space<vmem>>, %arg6: memref<16x1xf32, #tpu.memory_space<vmem>>, %arg7: memref<16x432xbf16, #tpu.memory_space<vmem>>, %arg8: memref<16x1xf32, #tpu.memory_space<vmem>>, %arg9: memref<16x576xbf16, #tpu.memory_space<vmem>>, %arg10: memref<16x1xf32, #tpu.memory_space<vmem>>, %arg11: memref<8x720xbf16, #tpu.memory_space<vmem>>, %arg12: memref<8x1xf32, #tpu.memory_space<vmem>>, %arg13: memref<1x8x256xf32, #tpu.memory_space<vmem>>, %arg14: memref<720x256xbf16, #tpu.memory_space<vmem>>) attributes {dimension_semantics = [#tpu.dimension_semantics<parallel>], iteration_bounds = array<i64: 2>, scalar_prefetch = 0 : i64, scratch_operands = 1 : i64, tpu.core_type = #tpu.core_type<tc>, window_params = [{transform_indices = @transform_0, window_bounds = array<i64: 1, 16, 256>}, {pipeline_mode = #tpu.pipeline_mode<synchronous>, transform_indices = @transform_1, window_bounds = array<i64: 9, 256>}, {pipeline_mode = #tpu.pipeline_mode<synchronous>, transform_indices = @transform_2, window_bounds = array<i64: 16, 144>}, {pipeline_mode = #tpu.pipeline_mode<synchronous>, transform_indices = @transform_3, window_bounds = array<i64: 16, 1>}, {pipeline_mode = #tpu.pipeline_mode<synchronous>, transform_indices = @transform_4, window_bounds = array<i64: 16, 288>}, {pipeline_mode = #tpu.pipeline_mode<synchronous>, transform_indices = @transform_5, window_bounds = array<i64: 16, 1>}, {pipeline_mode = #tpu.pipeline_mode<synchronous>, transform_indices = @transform_6, window_bounds = array<i64: 16, 432>}, {pipeline_mode = #tpu.pipeline_mode<synchronous>, transform_indices = @transform_7, window_bounds = array<i64: 16, 1>}, {pipeline_mode = #tpu.pipeline_mode<synchronous>, transform_indices = @transform_8, window_bounds = array<i64: 16, 576>}, {pipeline_mode = #tpu.pipeline_mode<synchronous>, transform_indices = @transform_9, window_bounds = array<i64: 16, 1>}, {pipeline_mode = #tpu.pipeline_mode<synchronous>, transform_indices = @transform_10, window_bounds = array<i64: 8, 720>}, {pipeline_mode = #tpu.pipeline_mode<synchronous>, transform_indices = @transform_11, window_bounds = array<i64: 8, 1>}, {transform_indices = @transform_12, window_bounds = array<i64: 1, 8, 256>}]} {
    %c0 = arith.constant 0 : index
    %c0_0 = arith.constant 0 : index
    %c0_1 = arith.constant 0 : index
    %0 = vector.load %arg1[%c0, %c0_0, %c0_1] : memref<1x16x256xf32, #tpu.memory_space<vmem>>, vector<1x16x256xf32>
    %1 = vector.shape_cast %0 : vector<1x16x256xf32> to vector<16x256xf32>
    %c17_i32 = arith.constant 17 : i32
    %2 = tpu.dynamic_rotate %1 by %c17_i32 dim 1 : vector<16x256xf32>, i32 -> vector<16x256xf32>
    %c0_2 = arith.constant 0 : index
    %c0_3 = arith.constant 0 : index
    %3 = vector.load %arg2[%c0_2, %c0_3] : memref<9x256xf32, #tpu.memory_space<vmem>>, vector<1x256xf32>
    %4 = vector.broadcast %3 : vector<1x256xf32> to vector<16x256xf32>
    %5 = arith.mulf %2, %4 : vector<16x256xf32>
    %6 = arith.truncf %5 : vector<16x256xf32> to vector<16x256xbf16>
    %c0_4 = arith.constant 0 : index
    %c0_5 = arith.constant 0 : index
    %7 = vector.load %arg14[%c0_4, %c0_5] : memref<720x256xbf16, #tpu.memory_space<vmem>>, vector<16x256xbf16>
    tpu.vector_store %arg14[%c0_4, %c0_5], %6 {strides = array<i32>} : memref<720x256xbf16, #tpu.memory_space<vmem>>, vector<16x256xbf16>,
    %c16_i32 = arith.constant 16 : i32
    %8 = tpu.dynamic_rotate %1 by %c16_i32 dim 1 : vector<16x256xf32>, i32 -> vector<16x256xf32>
    %c1 = arith.constant 1 : index
    %c0_6 = arith.constant 0 : index
    %9 = vector.load %arg2[%c1, %c0_6] : memref<9x256xf32, #tpu.memory_space<vmem>>, vector<1x256xf32>
    %10 = vector.broadcast %9 : vector<1x256xf32> to vector<16x256xf32>
    %11 = arith.mulf %8, %10 : vector<16x256xf32>
    %12 = arith.truncf %11 : vector<16x256xf32> to vector<16x256xbf16>
    %c16 = arith.constant 16 : index
    %c0_7 = arith.constant 0 : index
    %13 = vector.load %arg14[%c16, %c0_7] : memref<720x256xbf16, #tpu.memory_space<vmem>>, vector<16x256xbf16>
    tpu.vector_store %arg14[%c16, %c0_7], %12 {strides = array<i32>} : memref<720x256xbf16, #tpu.memory_space<vmem>>, vector<16x256xbf16>,
    %c15_i32 = arith.constant 15 : i32
    %14 = tpu.dynamic_rotate %1 by %c15_i32 dim 1 : vector<16x256xf32>, i32 -> vector<16x256xf32>
    %c2 = arith.constant 2 : index
    %c0_8 = arith.constant 0 : index
    %15 = vector.load %arg2[%c2, %c0_8] : memref<9x256xf32, #tpu.memory_space<vmem>>, vector<1x256xf32>
    %16 = vector.broadcast %15 : vector<1x256xf32> to vector<16x256xf32>
    %17 = arith.mulf %14, %16 : vector<16x256xf32>
    %18 = arith.truncf %17 : vector<16x256xf32> to vector<16x256xbf16>
    %c32 = arith.constant 32 : index
    %c0_9 = arith.constant 0 : index
    %19 = vector.load %arg14[%c32, %c0_9] : memref<720x256xbf16, #tpu.memory_space<vmem>>, vector<16x256xbf16>
    tpu.vector_store %arg14[%c32, %c0_9], %18 {strides = array<i32>} : memref<720x256xbf16, #tpu.memory_space<vmem>>, vector<16x256xbf16>,
    %c1_i32 = arith.constant 1 : i32
    %20 = tpu.dynamic_rotate %1 by %c1_i32 dim 1 : vector<16x256xf32>, i32 -> vector<16x256xf32>
    %c3 = arith.constant 3 : index
    %c0_10 = arith.constant 0 : index
    %21 = vector.load %arg2[%c3, %c0_10] : memref<9x256xf32, #tpu.memory_space<vmem>>, vector<1x256xf32>
    %22 = vector.broadcast %21 : vector<1x256xf32> to vector<16x256xf32>
    %23 = arith.mulf %20, %22 : vector<16x256xf32>
    %24 = arith.truncf %23 : vector<16x256xf32> to vector<16x256xbf16>
    %c48 = arith.constant 48 : index
    %c0_11 = arith.constant 0 : index
    %25 = vector.load %arg14[%c48, %c0_11] : memref<720x256xbf16, #tpu.memory_space<vmem>>, vector<16x256xbf16>
    tpu.vector_store %arg14[%c48, %c0_11], %24 {strides = array<i32>} : memref<720x256xbf16, #tpu.memory_space<vmem>>, vector<16x256xbf16>,
    %26 = arith.truncf %1 : vector<16x256xf32> to vector<16x256xbf16>
    %c64 = arith.constant 64 : index
    %c0_12 = arith.constant 0 : index
    %27 = vector.load %arg14[%c64, %c0_12] : memref<720x256xbf16, #tpu.memory_space<vmem>>, vector<16x256xbf16>
    tpu.vector_store %arg14[%c64, %c0_12], %26 {strides = array<i32>} : memref<720x256xbf16, #tpu.memory_space<vmem>>, vector<16x256xbf16>,
    %c255_i32 = arith.constant 255 : i32
    %28 = tpu.dynamic_rotate %1 by %c255_i32 dim 1 : vector<16x256xf32>, i32 -> vector<16x256xf32>
    %c5 = arith.constant 5 : index
    %c0_13 = arith.constant 0 : index
    %29 = vector.load %arg2[%c5, %c0_13] : memref<9x256xf32, #tpu.memory_space<vmem>>, vector<1x256xf32>
    %30 = vector.broadcast %29 : vector<1x256xf32> to vector<16x256xf32>
    %31 = arith.mulf %28, %30 : vector<16x256xf32>
    %32 = arith.truncf %31 : vector<16x256xf32> to vector<16x256xbf16>
    %c80 = arith.constant 80 : index
    %c0_14 = arith.constant 0 : index
    %33 = vector.load %arg14[%c80, %c0_14] : memref<720x256xbf16, #tpu.memory_space<vmem>>, vector<16x256xbf16>
    tpu.vector_store %arg14[%c80, %c0_14], %32 {strides = array<i32>} : memref<720x256xbf16, #tpu.memory_space<vmem>>, vector<16x256xbf16>,
    %c241_i32 = arith.constant 241 : i32
    %34 = tpu.dynamic_rotate %1 by %c241_i32 dim 1 : vector<16x256xf32>, i32 -> vector<16x256xf32>
    %c6 = arith.constant 6 : index
    %c0_15 = arith.constant 0 : index
    %35 = vector.load %arg2[%c6, %c0_15] : memref<9x256xf32, #tpu.memory_space<vmem>>, vector<1x256xf32>
    %36 = vector.broadcast %35 : vector<1x256xf32> to vector<16x256xf32>
    %37 = arith.mulf %34, %36 : vector<16x256xf32>
    %38 = arith.truncf %37 : vector<16x256xf32> to vector<16x256xbf16>
    %c96 = arith.constant 96 : index
    %c0_16 = arith.constant 0 : index
    %39 = vector.load %arg14[%c96, %c0_16] : memref<720x256xbf16, #tpu.memory_space<vmem>>, vector<16x256xbf16>
    tpu.vector_store %arg14[%c96, %c0_16], %38 {strides = array<i32>} : memref<720x256xbf16, #tpu.memory_space<vmem>>, vector<16x256xbf16>,
    %c240_i32 = arith.constant 240 : i32
    %40 = tpu.dynamic_rotate %1 by %c240_i32 dim 1 : vector<16x256xf32>, i32 -> vector<16x256xf32>
    %c7 = arith.constant 7 : index
    %c0_17 = arith.constant 0 : index
    %41 = vector.load %arg2[%c7, %c0_17] : memref<9x256xf32, #tpu.memory_space<vmem>>, vector<1x256xf32>
    %42 = vector.broadcast %41 : vector<1x256xf32> to vector<16x256xf32>
    %43 = arith.mulf %40, %42 : vector<16x256xf32>
    %44 = arith.truncf %43 : vector<16x256xf32> to vector<16x256xbf16>
    %c112 = arith.constant 112 : index
    %c0_18 = arith.constant 0 : index
    %45 = vector.load %arg14[%c112, %c0_18] : memref<720x256xbf16, #tpu.memory_space<vmem>>, vector<16x256xbf16>
    tpu.vector_store %arg14[%c112, %c0_18], %44 {strides = array<i32>} : memref<720x256xbf16, #tpu.memory_space<vmem>>, vector<16x256xbf16>,
    %c239_i32 = arith.constant 239 : i32
    %46 = tpu.dynamic_rotate %1 by %c239_i32 dim 1 : vector<16x256xf32>, i32 -> vector<16x256xf32>
    %c8 = arith.constant 8 : index
    %c0_19 = arith.constant 0 : index
    %47 = vector.load %arg2[%c8, %c0_19] : memref<9x256xf32, #tpu.memory_space<vmem>>, vector<1x256xf32>
    %48 = vector.broadcast %47 : vector<1x256xf32> to vector<16x256xf32>
    %49 = arith.mulf %46, %48 : vector<16x256xf32>
    %50 = arith.truncf %49 : vector<16x256xf32> to vector<16x256xbf16>
    %c128 = arith.constant 128 : index
    %c0_20 = arith.constant 0 : index
    %51 = vector.load %arg14[%c128, %c0_20] : memref<720x256xbf16, #tpu.memory_space<vmem>>, vector<16x256xbf16>
    tpu.vector_store %arg14[%c128, %c0_20], %50 {strides = array<i32>} : memref<720x256xbf16, #tpu.memory_space<vmem>>, vector<16x256xbf16>,
    %c0_21 = arith.constant 0 : index
    %c0_22 = arith.constant 0 : index
    %52 = vector.load %arg3[%c0_21, %c0_22] : memref<16x144xbf16, #tpu.memory_space<vmem>>, vector<16x144xbf16>
    %c0_23 = arith.constant 0 : index
    %c0_24 = arith.constant 0 : index
    %53 = vector.load %arg14[%c0_23, %c0_24] : memref<720x256xbf16, #tpu.memory_space<vmem>>, vector<144x256xbf16>
    %cst = arith.constant dense<0.000000e+00> : vector<16x256xf32>
    %54 = tpu.matmul %52, %53, %cst {dimension_numbers = #tpu.dot_dimension_numbers<[1], [0], [0], [1], [0, 0, 1, 1], [], []>} : vector<16x144xbf16>, vector<144x256xbf16>, vector<16x256xf32> -> vector<16x256xf32>
    %c0_25 = arith.constant 0 : index
    %c0_26 = arith.constant 0 : index
    %55 = vector.load %arg4[%c0_25, %c0_26] : memref<16x1xf32, #tpu.memory_space<vmem>>, vector<16x1xf32>
    %56 = vector.broadcast %55 : vector<16x1xf32> to vector<16x256xf32>
    %57 = arith.addf %54, %56 : vector<16x256xf32>
    %cst_27 = arith.constant 0.000000e+00 : f32
    %58 = vector.broadcast %cst_27 : f32 to vector<16x256xf32>
    %59 = arith.cmpf ogt, %57, %58 : vector<16x256xf32>
    %cst_28 = arith.constant 2.000000e-01 : f32
    %60 = vector.broadcast %cst_28 : f32 to vector<16x256xf32>
    %61 = arith.mulf %60, %57 : vector<16x256xf32>
    %62 = arith.select %59, %57, %61 : vector<16x256xi1>, vector<16x256xf32>
    %c17_i32_29 = arith.constant 17 : i32
    %63 = tpu.dynamic_rotate %62 by %c17_i32_29 dim 1 : vector<16x256xf32>, i32 -> vector<16x256xf32>
    %c0_30 = arith.constant 0 : index
    %c0_31 = arith.constant 0 : index
    %64 = vector.load %arg2[%c0_30, %c0_31] : memref<9x256xf32, #tpu.memory_space<vmem>>, vector<1x256xf32>
    %65 = vector.broadcast %64 : vector<1x256xf32> to vector<16x256xf32>
    %66 = arith.mulf %63, %65 : vector<16x256xf32>
    %67 = arith.truncf %66 : vector<16x256xf32> to vector<16x256xbf16>
    %c144 = arith.constant 144 : index
    %c0_32 = arith.constant 0 : index
    %68 = vector.load %arg14[%c144, %c0_32] : memref<720x256xbf16, #tpu.memory_space<vmem>>, vector<16x256xbf16>
    tpu.vector_store %arg14[%c144, %c0_32], %67 {strides = array<i32>} : memref<720x256xbf16, #tpu.memory_space<vmem>>, vector<16x256xbf16>,
    %c16_i32_33 = arith.constant 16 : i32
    %69 = tpu.dynamic_rotate %62 by %c16_i32_33 dim 1 : vector<16x256xf32>, i32 -> vector<16x256xf32>
    %c1_34 = arith.constant 1 : index
    %c0_35 = arith.constant 0 : index
    %70 = vector.load %arg2[%c1_34, %c0_35] : memref<9x256xf32, #tpu.memory_space<vmem>>, vector<1x256xf32>
    %71 = vector.broadcast %70 : vector<1x256xf32> to vector<16x256xf32>
    %72 = arith.mulf %69, %71 : vector<16x256xf32>
    %73 = arith.truncf %72 : vector<16x256xf32> to vector<16x256xbf16>
    %c160 = arith.constant 160 : index
    %c0_36 = arith.constant 0 : index
    %74 = vector.load %arg14[%c160, %c0_36] : memref<720x256xbf16, #tpu.memory_space<vmem>>, vector<16x256xbf16>
    tpu.vector_store %arg14[%c160, %c0_36], %73 {strides = array<i32>} : memref<720x256xbf16, #tpu.memory_space<vmem>>, vector<16x256xbf16>,
    %c15_i32_37 = arith.constant 15 : i32
    %75 = tpu.dynamic_rotate %62 by %c15_i32_37 dim 1 : vector<16x256xf32>, i32 -> vector<16x256xf32>
    %c2_38 = arith.constant 2 : index
    %c0_39 = arith.constant 0 : index
    %76 = vector.load %arg2[%c2_38, %c0_39] : memref<9x256xf32, #tpu.memory_space<vmem>>, vector<1x256xf32>
    %77 = vector.broadcast %76 : vector<1x256xf32> to vector<16x256xf32>
    %78 = arith.mulf %75, %77 : vector<16x256xf32>
    %79 = arith.truncf %78 : vector<16x256xf32> to vector<16x256xbf16>
    %c176 = arith.constant 176 : index
    %c0_40 = arith.constant 0 : index
    %80 = vector.load %arg14[%c176, %c0_40] : memref<720x256xbf16, #tpu.memory_space<vmem>>, vector<16x256xbf16>
    tpu.vector_store %arg14[%c176, %c0_40], %79 {strides = array<i32>} : memref<720x256xbf16, #tpu.memory_space<vmem>>, vector<16x256xbf16>,
    %c1_i32_41 = arith.constant 1 : i32
    %81 = tpu.dynamic_rotate %62 by %c1_i32_41 dim 1 : vector<16x256xf32>, i32 -> vector<16x256xf32>
    %c3_42 = arith.constant 3 : index
    %c0_43 = arith.constant 0 : index
    %82 = vector.load %arg2[%c3_42, %c0_43] : memref<9x256xf32, #tpu.memory_space<vmem>>, vector<1x256xf32>
    %83 = vector.broadcast %82 : vector<1x256xf32> to vector<16x256xf32>
    %84 = arith.mulf %81, %83 : vector<16x256xf32>
    %85 = arith.truncf %84 : vector<16x256xf32> to vector<16x256xbf16>
    %c192 = arith.constant 192 : index
    %c0_44 = arith.constant 0 : index
    %86 = vector.load %arg14[%c192, %c0_44] : memref<720x256xbf16, #tpu.memory_space<vmem>>, vector<16x256xbf16>
    tpu.vector_store %arg14[%c192, %c0_44], %85 {strides = array<i32>} : memref<720x256xbf16, #tpu.memory_space<vmem>>, vector<16x256xbf16>,
    %87 = arith.truncf %62 : vector<16x256xf32> to vector<16x256xbf16>
    %c208 = arith.constant 208 : index
    %c0_45 = arith.constant 0 : index
    %88 = vector.load %arg14[%c208, %c0_45] : memref<720x256xbf16, #tpu.memory_space<vmem>>, vector<16x256xbf16>
    tpu.vector_store %arg14[%c208, %c0_45], %87 {strides = array<i32>} : memref<720x256xbf16, #tpu.memory_space<vmem>>, vector<16x256xbf16>,
    %c255_i32_46 = arith.constant 255 : i32
    %89 = tpu.dynamic_rotate %62 by %c255_i32_46 dim 1 : vector<16x256xf32>, i32 -> vector<16x256xf32>
    %c5_47 = arith.constant 5 : index
    %c0_48 = arith.constant 0 : index
    %90 = vector.load %arg2[%c5_47, %c0_48] : memref<9x256xf32, #tpu.memory_space<vmem>>, vector<1x256xf32>
    %91 = vector.broadcast %90 : vector<1x256xf32> to vector<16x256xf32>
    %92 = arith.mulf %89, %91 : vector<16x256xf32>
    %93 = arith.truncf %92 : vector<16x256xf32> to vector<16x256xbf16>
    %c224 = arith.constant 224 : index
    %c0_49 = arith.constant 0 : index
    %94 = vector.load %arg14[%c224, %c0_49] : memref<720x256xbf16, #tpu.memory_space<vmem>>, vector<16x256xbf16>
    tpu.vector_store %arg14[%c224, %c0_49], %93 {strides = array<i32>} : memref<720x256xbf16, #tpu.memory_space<vmem>>, vector<16x256xbf16>,
    %c241_i32_50 = arith.constant 241 : i32
    %95 = tpu.dynamic_rotate %62 by %c241_i32_50 dim 1 : vector<16x256xf32>, i32 -> vector<16x256xf32>
    %c6_51 = arith.constant 6 : index
    %c0_52 = arith.constant 0 : index
    %96 = vector.load %arg2[%c6_51, %c0_52] : memref<9x256xf32, #tpu.memory_space<vmem>>, vector<1x256xf32>
    %97 = vector.broadcast %96 : vector<1x256xf32> to vector<16x256xf32>
    %98 = arith.mulf %95, %97 : vector<16x256xf32>
    %99 = arith.truncf %98 : vector<16x256xf32> to vector<16x256xbf16>
    %c240 = arith.constant 240 : index
    %c0_53 = arith.constant 0 : index
    %100 = vector.load %arg14[%c240, %c0_53] : memref<720x256xbf16, #tpu.memory_space<vmem>>, vector<16x256xbf16>
    tpu.vector_store %arg14[%c240, %c0_53], %99 {strides = array<i32>} : memref<720x256xbf16, #tpu.memory_space<vmem>>, vector<16x256xbf16>,
    %c240_i32_54 = arith.constant 240 : i32
    %101 = tpu.dynamic_rotate %62 by %c240_i32_54 dim 1 : vector<16x256xf32>, i32 -> vector<16x256xf32>
    %c7_55 = arith.constant 7 : index
    %c0_56 = arith.constant 0 : index
    %102 = vector.load %arg2[%c7_55, %c0_56] : memref<9x256xf32, #tpu.memory_space<vmem>>, vector<1x256xf32>
    %103 = vector.broadcast %102 : vector<1x256xf32> to vector<16x256xf32>
    %104 = arith.mulf %101, %103 : vector<16x256xf32>
    %105 = arith.truncf %104 : vector<16x256xf32> to vector<16x256xbf16>
    %c256 = arith.constant 256 : index
    %c0_57 = arith.constant 0 : index
    %106 = vector.load %arg14[%c256, %c0_57] : memref<720x256xbf16, #tpu.memory_space<vmem>>, vector<16x256xbf16>
    tpu.vector_store %arg14[%c256, %c0_57], %105 {strides = array<i32>} : memref<720x256xbf16, #tpu.memory_space<vmem>>, vector<16x256xbf16>,
    %c239_i32_58 = arith.constant 239 : i32
    %107 = tpu.dynamic_rotate %62 by %c239_i32_58 dim 1 : vector<16x256xf32>, i32 -> vector<16x256xf32>
    %c8_59 = arith.constant 8 : index
    %c0_60 = arith.constant 0 : index
    %108 = vector.load %arg2[%c8_59, %c0_60] : memref<9x256xf32, #tpu.memory_space<vmem>>, vector<1x256xf32>
    %109 = vector.broadcast %108 : vector<1x256xf32> to vector<16x256xf32>
    %110 = arith.mulf %107, %109 : vector<16x256xf32>
    %111 = arith.truncf %110 : vector<16x256xf32> to vector<16x256xbf16>
    %c272 = arith.constant 272 : index
    %c0_61 = arith.constant 0 : index
    %112 = vector.load %arg14[%c272, %c0_61] : memref<720x256xbf16, #tpu.memory_space<vmem>>, vector<16x256xbf16>
    tpu.vector_store %arg14[%c272, %c0_61], %111 {strides = array<i32>} : memref<720x256xbf16, #tpu.memory_space<vmem>>, vector<16x256xbf16>,
    %c0_62 = arith.constant 0 : index
    %c0_63 = arith.constant 0 : index
    %113 = vector.load %arg5[%c0_62, %c0_63] : memref<16x288xbf16, #tpu.memory_space<vmem>>, vector<16x288xbf16>
    %c0_64 = arith.constant 0 : index
    %c0_65 = arith.constant 0 : index
    %114 = vector.load %arg14[%c0_64, %c0_65] : memref<720x256xbf16, #tpu.memory_space<vmem>>, vector<288x256xbf16>
    %cst_66 = arith.constant dense<0.000000e+00> : vector<16x256xf32>
    %115 = tpu.matmul %113, %114, %cst_66 {dimension_numbers = #tpu.dot_dimension_numbers<[1], [0], [0], [1], [0, 0, 1, 1], [], []>} : vector<16x288xbf16>, vector<288x256xbf16>, vector<16x256xf32> -> vector<16x256xf32>
    %c0_67 = arith.constant 0 : index
    %c0_68 = arith.constant 0 : index
    %116 = vector.load %arg6[%c0_67, %c0_68] : memref<16x1xf32, #tpu.memory_space<vmem>>, vector<16x1xf32>
    %117 = vector.broadcast %116 : vector<16x1xf32> to vector<16x256xf32>
    %118 = arith.addf %115, %117 : vector<16x256xf32>
    %cst_69 = arith.constant 0.000000e+00 : f32
    %119 = vector.broadcast %cst_69 : f32 to vector<16x256xf32>
    %120 = arith.cmpf ogt, %118, %119 : vector<16x256xf32>
    %cst_70 = arith.constant 2.000000e-01 : f32
    %121 = vector.broadcast %cst_70 : f32 to vector<16x256xf32>
    %122 = arith.mulf %121, %118 : vector<16x256xf32>
    %123 = arith.select %120, %118, %122 : vector<16x256xi1>, vector<16x256xf32>
    %c17_i32_71 = arith.constant 17 : i32
    %124 = tpu.dynamic_rotate %123 by %c17_i32_71 dim 1 : vector<16x256xf32>, i32 -> vector<16x256xf32>
    %c0_72 = arith.constant 0 : index
    %c0_73 = arith.constant 0 : index
    %125 = vector.load %arg2[%c0_72, %c0_73] : memref<9x256xf32, #tpu.memory_space<vmem>>, vector<1x256xf32>
    %126 = vector.broadcast %125 : vector<1x256xf32> to vector<16x256xf32>
    %127 = arith.mulf %124, %126 : vector<16x256xf32>
    %128 = arith.truncf %127 : vector<16x256xf32> to vector<16x256xbf16>
    %c288 = arith.constant 288 : index
    %c0_74 = arith.constant 0 : index
    %129 = vector.load %arg14[%c288, %c0_74] : memref<720x256xbf16, #tpu.memory_space<vmem>>, vector<16x256xbf16>
    tpu.vector_store %arg14[%c288, %c0_74], %128 {strides = array<i32>} : memref<720x256xbf16, #tpu.memory_space<vmem>>, vector<16x256xbf16>,
    %c16_i32_75 = arith.constant 16 : i32
    %130 = tpu.dynamic_rotate %123 by %c16_i32_75 dim 1 : vector<16x256xf32>, i32 -> vector<16x256xf32>
    %c1_76 = arith.constant 1 : index
    %c0_77 = arith.constant 0 : index
    %131 = vector.load %arg2[%c1_76, %c0_77] : memref<9x256xf32, #tpu.memory_space<vmem>>, vector<1x256xf32>
    %132 = vector.broadcast %131 : vector<1x256xf32> to vector<16x256xf32>
    %133 = arith.mulf %130, %132 : vector<16x256xf32>
    %134 = arith.truncf %133 : vector<16x256xf32> to vector<16x256xbf16>
    %c304 = arith.constant 304 : index
    %c0_78 = arith.constant 0 : index
    %135 = vector.load %arg14[%c304, %c0_78] : memref<720x256xbf16, #tpu.memory_space<vmem>>, vector<16x256xbf16>
    tpu.vector_store %arg14[%c304, %c0_78], %134 {strides = array<i32>} : memref<720x256xbf16, #tpu.memory_space<vmem>>, vector<16x256xbf16>,
    %c15_i32_79 = arith.constant 15 : i32
    %136 = tpu.dynamic_rotate %123 by %c15_i32_79 dim 1 : vector<16x256xf32>, i32 -> vector<16x256xf32>
    %c2_80 = arith.constant 2 : index
    %c0_81 = arith.constant 0 : index
    %137 = vector.load %arg2[%c2_80, %c0_81] : memref<9x256xf32, #tpu.memory_space<vmem>>, vector<1x256xf32>
    %138 = vector.broadcast %137 : vector<1x256xf32> to vector<16x256xf32>
    %139 = arith.mulf %136, %138 : vector<16x256xf32>
    %140 = arith.truncf %139 : vector<16x256xf32> to vector<16x256xbf16>
    %c320 = arith.constant 320 : index
    %c0_82 = arith.constant 0 : index
    %141 = vector.load %arg14[%c320, %c0_82] : memref<720x256xbf16, #tpu.memory_space<vmem>>, vector<16x256xbf16>
    tpu.vector_store %arg14[%c320, %c0_82], %140 {strides = array<i32>} : memref<720x256xbf16, #tpu.memory_space<vmem>>, vector<16x256xbf16>,
    %c1_i32_83 = arith.constant 1 : i32
    %142 = tpu.dynamic_rotate %123 by %c1_i32_83 dim 1 : vector<16x256xf32>, i32 -> vector<16x256xf32>
    %c3_84 = arith.constant 3 : index
    %c0_85 = arith.constant 0 : index
    %143 = vector.load %arg2[%c3_84, %c0_85] : memref<9x256xf32, #tpu.memory_space<vmem>>, vector<1x256xf32>
    %144 = vector.broadcast %143 : vector<1x256xf32> to vector<16x256xf32>
    %145 = arith.mulf %142, %144 : vector<16x256xf32>
    %146 = arith.truncf %145 : vector<16x256xf32> to vector<16x256xbf16>
    %c336 = arith.constant 336 : index
    %c0_86 = arith.constant 0 : index
    %147 = vector.load %arg14[%c336, %c0_86] : memref<720x256xbf16, #tpu.memory_space<vmem>>, vector<16x256xbf16>
    tpu.vector_store %arg14[%c336, %c0_86], %146 {strides = array<i32>} : memref<720x256xbf16, #tpu.memory_space<vmem>>, vector<16x256xbf16>,
    %148 = arith.truncf %123 : vector<16x256xf32> to vector<16x256xbf16>
    %c352 = arith.constant 352 : index
    %c0_87 = arith.constant 0 : index
    %149 = vector.load %arg14[%c352, %c0_87] : memref<720x256xbf16, #tpu.memory_space<vmem>>, vector<16x256xbf16>
    tpu.vector_store %arg14[%c352, %c0_87], %148 {strides = array<i32>} : memref<720x256xbf16, #tpu.memory_space<vmem>>, vector<16x256xbf16>,
    %c255_i32_88 = arith.constant 255 : i32
    %150 = tpu.dynamic_rotate %123 by %c255_i32_88 dim 1 : vector<16x256xf32>, i32 -> vector<16x256xf32>
    %c5_89 = arith.constant 5 : index
    %c0_90 = arith.constant 0 : index
    %151 = vector.load %arg2[%c5_89, %c0_90] : memref<9x256xf32, #tpu.memory_space<vmem>>, vector<1x256xf32>
    %152 = vector.broadcast %151 : vector<1x256xf32> to vector<16x256xf32>
    %153 = arith.mulf %150, %152 : vector<16x256xf32>
    %154 = arith.truncf %153 : vector<16x256xf32> to vector<16x256xbf16>
    %c368 = arith.constant 368 : index
    %c0_91 = arith.constant 0 : index
    %155 = vector.load %arg14[%c368, %c0_91] : memref<720x256xbf16, #tpu.memory_space<vmem>>, vector<16x256xbf16>
    tpu.vector_store %arg14[%c368, %c0_91], %154 {strides = array<i32>} : memref<720x256xbf16, #tpu.memory_space<vmem>>, vector<16x256xbf16>,
    %c241_i32_92 = arith.constant 241 : i32
    %156 = tpu.dynamic_rotate %123 by %c241_i32_92 dim 1 : vector<16x256xf32>, i32 -> vector<16x256xf32>
    %c6_93 = arith.constant 6 : index
    %c0_94 = arith.constant 0 : index
    %157 = vector.load %arg2[%c6_93, %c0_94] : memref<9x256xf32, #tpu.memory_space<vmem>>, vector<1x256xf32>
    %158 = vector.broadcast %157 : vector<1x256xf32> to vector<16x256xf32>
    %159 = arith.mulf %156, %158 : vector<16x256xf32>
    %160 = arith.truncf %159 : vector<16x256xf32> to vector<16x256xbf16>
    %c384 = arith.constant 384 : index
    %c0_95 = arith.constant 0 : index
    %161 = vector.load %arg14[%c384, %c0_95] : memref<720x256xbf16, #tpu.memory_space<vmem>>, vector<16x256xbf16>
    tpu.vector_store %arg14[%c384, %c0_95], %160 {strides = array<i32>} : memref<720x256xbf16, #tpu.memory_space<vmem>>, vector<16x256xbf16>,
    %c240_i32_96 = arith.constant 240 : i32
    %162 = tpu.dynamic_rotate %123 by %c240_i32_96 dim 1 : vector<16x256xf32>, i32 -> vector<16x256xf32>
    %c7_97 = arith.constant 7 : index
    %c0_98 = arith.constant 0 : index
    %163 = vector.load %arg2[%c7_97, %c0_98] : memref<9x256xf32, #tpu.memory_space<vmem>>, vector<1x256xf32>
    %164 = vector.broadcast %163 : vector<1x256xf32> to vector<16x256xf32>
    %165 = arith.mulf %162, %164 : vector<16x256xf32>
    %166 = arith.truncf %165 : vector<16x256xf32> to vector<16x256xbf16>
    %c400 = arith.constant 400 : index
    %c0_99 = arith.constant 0 : index
    %167 = vector.load %arg14[%c400, %c0_99] : memref<720x256xbf16, #tpu.memory_space<vmem>>, vector<16x256xbf16>
    tpu.vector_store %arg14[%c400, %c0_99], %166 {strides = array<i32>} : memref<720x256xbf16, #tpu.memory_space<vmem>>, vector<16x256xbf16>,
    %c239_i32_100 = arith.constant 239 : i32
    %168 = tpu.dynamic_rotate %123 by %c239_i32_100 dim 1 : vector<16x256xf32>, i32 -> vector<16x256xf32>
    %c8_101 = arith.constant 8 : index
    %c0_102 = arith.constant 0 : index
    %169 = vector.load %arg2[%c8_101, %c0_102] : memref<9x256xf32, #tpu.memory_space<vmem>>, vector<1x256xf32>
    %170 = vector.broadcast %169 : vector<1x256xf32> to vector<16x256xf32>
    %171 = arith.mulf %168, %170 : vector<16x256xf32>
    %172 = arith.truncf %171 : vector<16x256xf32> to vector<16x256xbf16>
    %c416 = arith.constant 416 : index
    %c0_103 = arith.constant 0 : index
    %173 = vector.load %arg14[%c416, %c0_103] : memref<720x256xbf16, #tpu.memory_space<vmem>>, vector<16x256xbf16>
    tpu.vector_store %arg14[%c416, %c0_103], %172 {strides = array<i32>} : memref<720x256xbf16, #tpu.memory_space<vmem>>, vector<16x256xbf16>,
    %c0_104 = arith.constant 0 : index
    %c0_105 = arith.constant 0 : index
    %174 = vector.load %arg7[%c0_104, %c0_105] : memref<16x432xbf16, #tpu.memory_space<vmem>>, vector<16x432xbf16>
    %c0_106 = arith.constant 0 : index
    %c0_107 = arith.constant 0 : index
    %175 = vector.load %arg14[%c0_106, %c0_107] : memref<720x256xbf16, #tpu.memory_space<vmem>>, vector<432x256xbf16>
    %cst_108 = arith.constant dense<0.000000e+00> : vector<16x256xf32>
    %176 = tpu.matmul %174, %175, %cst_108 {dimension_numbers = #tpu.dot_dimension_numbers<[1], [0], [0], [1], [0, 0, 1, 1], [], []>} : vector<16x432xbf16>, vector<432x256xbf16>, vector<16x256xf32> -> vector<16x256xf32>
    %c0_109 = arith.constant 0 : index
    %c0_110 = arith.constant 0 : index
    %177 = vector.load %arg8[%c0_109, %c0_110] : memref<16x1xf32, #tpu.memory_space<vmem>>, vector<16x1xf32>
    %178 = vector.broadcast %177 : vector<16x1xf32> to vector<16x256xf32>
    %179 = arith.addf %176, %178 : vector<16x256xf32>
    %cst_111 = arith.constant 0.000000e+00 : f32
    %180 = vector.broadcast %cst_111 : f32 to vector<16x256xf32>
    %181 = arith.cmpf ogt, %179, %180 : vector<16x256xf32>
    %cst_112 = arith.constant 2.000000e-01 : f32
    %182 = vector.broadcast %cst_112 : f32 to vector<16x256xf32>
    %183 = arith.mulf %182, %179 : vector<16x256xf32>
    %184 = arith.select %181, %179, %183 : vector<16x256xi1>, vector<16x256xf32>
    %c17_i32_113 = arith.constant 17 : i32
    %185 = tpu.dynamic_rotate %184 by %c17_i32_113 dim 1 : vector<16x256xf32>, i32 -> vector<16x256xf32>
    %c0_114 = arith.constant 0 : index
    %c0_115 = arith.constant 0 : index
    %186 = vector.load %arg2[%c0_114, %c0_115] : memref<9x256xf32, #tpu.memory_space<vmem>>, vector<1x256xf32>
    %187 = vector.broadcast %186 : vector<1x256xf32> to vector<16x256xf32>
    %188 = arith.mulf %185, %187 : vector<16x256xf32>
    %189 = arith.truncf %188 : vector<16x256xf32> to vector<16x256xbf16>
    %c432 = arith.constant 432 : index
    %c0_116 = arith.constant 0 : index
    %190 = vector.load %arg14[%c432, %c0_116] : memref<720x256xbf16, #tpu.memory_space<vmem>>, vector<16x256xbf16>
    tpu.vector_store %arg14[%c432, %c0_116], %189 {strides = array<i32>} : memref<720x256xbf16, #tpu.memory_space<vmem>>, vector<16x256xbf16>,
    %c16_i32_117 = arith.constant 16 : i32
    %191 = tpu.dynamic_rotate %184 by %c16_i32_117 dim 1 : vector<16x256xf32>, i32 -> vector<16x256xf32>
    %c1_118 = arith.constant 1 : index
    %c0_119 = arith.constant 0 : index
    %192 = vector.load %arg2[%c1_118, %c0_119] : memref<9x256xf32, #tpu.memory_space<vmem>>, vector<1x256xf32>
    %193 = vector.broadcast %192 : vector<1x256xf32> to vector<16x256xf32>
    %194 = arith.mulf %191, %193 : vector<16x256xf32>
    %195 = arith.truncf %194 : vector<16x256xf32> to vector<16x256xbf16>
    %c448 = arith.constant 448 : index
    %c0_120 = arith.constant 0 : index
    %196 = vector.load %arg14[%c448, %c0_120] : memref<720x256xbf16, #tpu.memory_space<vmem>>, vector<16x256xbf16>
    tpu.vector_store %arg14[%c448, %c0_120], %195 {strides = array<i32>} : memref<720x256xbf16, #tpu.memory_space<vmem>>, vector<16x256xbf16>,
    %c15_i32_121 = arith.constant 15 : i32
    %197 = tpu.dynamic_rotate %184 by %c15_i32_121 dim 1 : vector<16x256xf32>, i32 -> vector<16x256xf32>
    %c2_122 = arith.constant 2 : index
    %c0_123 = arith.constant 0 : index
    %198 = vector.load %arg2[%c2_122, %c0_123] : memref<9x256xf32, #tpu.memory_space<vmem>>, vector<1x256xf32>
    %199 = vector.broadcast %198 : vector<1x256xf32> to vector<16x256xf32>
    %200 = arith.mulf %197, %199 : vector<16x256xf32>
    %201 = arith.truncf %200 : vector<16x256xf32> to vector<16x256xbf16>
    %c464 = arith.constant 464 : index
    %c0_124 = arith.constant 0 : index
    %202 = vector.load %arg14[%c464, %c0_124] : memref<720x256xbf16, #tpu.memory_space<vmem>>, vector<16x256xbf16>
    tpu.vector_store %arg14[%c464, %c0_124], %201 {strides = array<i32>} : memref<720x256xbf16, #tpu.memory_space<vmem>>, vector<16x256xbf16>,
    %c1_i32_125 = arith.constant 1 : i32
    %203 = tpu.dynamic_rotate %184 by %c1_i32_125 dim 1 : vector<16x256xf32>, i32 -> vector<16x256xf32>
    %c3_126 = arith.constant 3 : index
    %c0_127 = arith.constant 0 : index
    %204 = vector.load %arg2[%c3_126, %c0_127] : memref<9x256xf32, #tpu.memory_space<vmem>>, vector<1x256xf32>
    %205 = vector.broadcast %204 : vector<1x256xf32> to vector<16x256xf32>
    %206 = arith.mulf %203, %205 : vector<16x256xf32>
    %207 = arith.truncf %206 : vector<16x256xf32> to vector<16x256xbf16>
    %c480 = arith.constant 480 : index
    %c0_128 = arith.constant 0 : index
    %208 = vector.load %arg14[%c480, %c0_128] : memref<720x256xbf16, #tpu.memory_space<vmem>>, vector<16x256xbf16>
    tpu.vector_store %arg14[%c480, %c0_128], %207 {strides = array<i32>} : memref<720x256xbf16, #tpu.memory_space<vmem>>, vector<16x256xbf16>,
    %209 = arith.truncf %184 : vector<16x256xf32> to vector<16x256xbf16>
    %c496 = arith.constant 496 : index
    %c0_129 = arith.constant 0 : index
    %210 = vector.load %arg14[%c496, %c0_129] : memref<720x256xbf16, #tpu.memory_space<vmem>>, vector<16x256xbf16>
    tpu.vector_store %arg14[%c496, %c0_129], %209 {strides = array<i32>} : memref<720x256xbf16, #tpu.memory_space<vmem>>, vector<16x256xbf16>,
    %c255_i32_130 = arith.constant 255 : i32
    %211 = tpu.dynamic_rotate %184 by %c255_i32_130 dim 1 : vector<16x256xf32>, i32 -> vector<16x256xf32>
    %c5_131 = arith.constant 5 : index
    %c0_132 = arith.constant 0 : index
    %212 = vector.load %arg2[%c5_131, %c0_132] : memref<9x256xf32, #tpu.memory_space<vmem>>, vector<1x256xf32>
    %213 = vector.broadcast %212 : vector<1x256xf32> to vector<16x256xf32>
    %214 = arith.mulf %211, %213 : vector<16x256xf32>
    %215 = arith.truncf %214 : vector<16x256xf32> to vector<16x256xbf16>
    %c512 = arith.constant 512 : index
    %c0_133 = arith.constant 0 : index
    %216 = vector.load %arg14[%c512, %c0_133] : memref<720x256xbf16, #tpu.memory_space<vmem>>, vector<16x256xbf16>
    tpu.vector_store %arg14[%c512, %c0_133], %215 {strides = array<i32>} : memref<720x256xbf16, #tpu.memory_space<vmem>>, vector<16x256xbf16>,
    %c241_i32_134 = arith.constant 241 : i32
    %217 = tpu.dynamic_rotate %184 by %c241_i32_134 dim 1 : vector<16x256xf32>, i32 -> vector<16x256xf32>
    %c6_135 = arith.constant 6 : index
    %c0_136 = arith.constant 0 : index
    %218 = vector.load %arg2[%c6_135, %c0_136] : memref<9x256xf32, #tpu.memory_space<vmem>>, vector<1x256xf32>
    %219 = vector.broadcast %218 : vector<1x256xf32> to vector<16x256xf32>
    %220 = arith.mulf %217, %219 : vector<16x256xf32>
    %221 = arith.truncf %220 : vector<16x256xf32> to vector<16x256xbf16>
    %c528 = arith.constant 528 : index
    %c0_137 = arith.constant 0 : index
    %222 = vector.load %arg14[%c528, %c0_137] : memref<720x256xbf16, #tpu.memory_space<vmem>>, vector<16x256xbf16>
    tpu.vector_store %arg14[%c528, %c0_137], %221 {strides = array<i32>} : memref<720x256xbf16, #tpu.memory_space<vmem>>, vector<16x256xbf16>,
    %c240_i32_138 = arith.constant 240 : i32
    %223 = tpu.dynamic_rotate %184 by %c240_i32_138 dim 1 : vector<16x256xf32>, i32 -> vector<16x256xf32>
    %c7_139 = arith.constant 7 : index
    %c0_140 = arith.constant 0 : index
    %224 = vector.load %arg2[%c7_139, %c0_140] : memref<9x256xf32, #tpu.memory_space<vmem>>, vector<1x256xf32>
    %225 = vector.broadcast %224 : vector<1x256xf32> to vector<16x256xf32>
    %226 = arith.mulf %223, %225 : vector<16x256xf32>
    %227 = arith.truncf %226 : vector<16x256xf32> to vector<16x256xbf16>
    %c544 = arith.constant 544 : index
    %c0_141 = arith.constant 0 : index
    %228 = vector.load %arg14[%c544, %c0_141] : memref<720x256xbf16, #tpu.memory_space<vmem>>, vector<16x256xbf16>
    tpu.vector_store %arg14[%c544, %c0_141], %227 {strides = array<i32>} : memref<720x256xbf16, #tpu.memory_space<vmem>>, vector<16x256xbf16>,
    %c239_i32_142 = arith.constant 239 : i32
    %229 = tpu.dynamic_rotate %184 by %c239_i32_142 dim 1 : vector<16x256xf32>, i32 -> vector<16x256xf32>
    %c8_143 = arith.constant 8 : index
    %c0_144 = arith.constant 0 : index
    %230 = vector.load %arg2[%c8_143, %c0_144] : memref<9x256xf32, #tpu.memory_space<vmem>>, vector<1x256xf32>
    %231 = vector.broadcast %230 : vector<1x256xf32> to vector<16x256xf32>
    %232 = arith.mulf %229, %231 : vector<16x256xf32>
    %233 = arith.truncf %232 : vector<16x256xf32> to vector<16x256xbf16>
    %c560 = arith.constant 560 : index
    %c0_145 = arith.constant 0 : index
    %234 = vector.load %arg14[%c560, %c0_145] : memref<720x256xbf16, #tpu.memory_space<vmem>>, vector<16x256xbf16>
    tpu.vector_store %arg14[%c560, %c0_145], %233 {strides = array<i32>} : memref<720x256xbf16, #tpu.memory_space<vmem>>, vector<16x256xbf16>,
    %c0_146 = arith.constant 0 : index
    %c0_147 = arith.constant 0 : index
    %235 = vector.load %arg9[%c0_146, %c0_147] : memref<16x576xbf16, #tpu.memory_space<vmem>>, vector<16x576xbf16>
    %c0_148 = arith.constant 0 : index
    %c0_149 = arith.constant 0 : index
    %236 = vector.load %arg14[%c0_148, %c0_149] : memref<720x256xbf16, #tpu.memory_space<vmem>>, vector<576x256xbf16>
    %cst_150 = arith.constant dense<0.000000e+00> : vector<16x256xf32>
    %237 = tpu.matmul %235, %236, %cst_150 {dimension_numbers = #tpu.dot_dimension_numbers<[1], [0], [0], [1], [0, 0, 1, 1], [], []>} : vector<16x576xbf16>, vector<576x256xbf16>, vector<16x256xf32> -> vector<16x256xf32>
    %c0_151 = arith.constant 0 : index
    %c0_152 = arith.constant 0 : index
    %238 = vector.load %arg10[%c0_151, %c0_152] : memref<16x1xf32, #tpu.memory_space<vmem>>, vector<16x1xf32>
    %239 = vector.broadcast %238 : vector<16x1xf32> to vector<16x256xf32>
    %240 = arith.addf %237, %239 : vector<16x256xf32>
    %cst_153 = arith.constant 0.000000e+00 : f32
    %241 = vector.broadcast %cst_153 : f32 to vector<16x256xf32>
    %242 = arith.cmpf ogt, %240, %241 : vector<16x256xf32>
    %cst_154 = arith.constant 2.000000e-01 : f32
    %243 = vector.broadcast %cst_154 : f32 to vector<16x256xf32>
    %244 = arith.mulf %243, %240 : vector<16x256xf32>
    %245 = arith.select %242, %240, %244 : vector<16x256xi1>, vector<16x256xf32>
    %c17_i32_155 = arith.constant 17 : i32
    %246 = tpu.dynamic_rotate %245 by %c17_i32_155 dim 1 : vector<16x256xf32>, i32 -> vector<16x256xf32>
    %c0_156 = arith.constant 0 : index
    %c0_157 = arith.constant 0 : index
    %247 = vector.load %arg2[%c0_156, %c0_157] : memref<9x256xf32, #tpu.memory_space<vmem>>, vector<1x256xf32>
    %248 = vector.broadcast %247 : vector<1x256xf32> to vector<16x256xf32>
    %249 = arith.mulf %246, %248 : vector<16x256xf32>
    %250 = arith.truncf %249 : vector<16x256xf32> to vector<16x256xbf16>
    %c576 = arith.constant 576 : index
    %c0_158 = arith.constant 0 : index
    %251 = vector.load %arg14[%c576, %c0_158] : memref<720x256xbf16, #tpu.memory_space<vmem>>, vector<16x256xbf16>
    tpu.vector_store %arg14[%c576, %c0_158], %250 {strides = array<i32>} : memref<720x256xbf16, #tpu.memory_space<vmem>>, vector<16x256xbf16>,
    %c16_i32_159 = arith.constant 16 : i32
    %252 = tpu.dynamic_rotate %245 by %c16_i32_159 dim 1 : vector<16x256xf32>, i32 -> vector<16x256xf32>
    %c1_160 = arith.constant 1 : index
    %c0_161 = arith.constant 0 : index
    %253 = vector.load %arg2[%c1_160, %c0_161] : memref<9x256xf32, #tpu.memory_space<vmem>>, vector<1x256xf32>
    %254 = vector.broadcast %253 : vector<1x256xf32> to vector<16x256xf32>
    %255 = arith.mulf %252, %254 : vector<16x256xf32>
    %256 = arith.truncf %255 : vector<16x256xf32> to vector<16x256xbf16>
    %c592 = arith.constant 592 : index
    %c0_162 = arith.constant 0 : index
    %257 = vector.load %arg14[%c592, %c0_162] : memref<720x256xbf16, #tpu.memory_space<vmem>>, vector<16x256xbf16>
    tpu.vector_store %arg14[%c592, %c0_162], %256 {strides = array<i32>} : memref<720x256xbf16, #tpu.memory_space<vmem>>, vector<16x256xbf16>,
    %c15_i32_163 = arith.constant 15 : i32
    %258 = tpu.dynamic_rotate %245 by %c15_i32_163 dim 1 : vector<16x256xf32>, i32 -> vector<16x256xf32>
    %c2_164 = arith.constant 2 : index
    %c0_165 = arith.constant 0 : index
    %259 = vector.load %arg2[%c2_164, %c0_165] : memref<9x256xf32, #tpu.memory_space<vmem>>, vector<1x256xf32>
    %260 = vector.broadcast %259 : vector<1x256xf32> to vector<16x256xf32>
    %261 = arith.mulf %258, %260 : vector<16x256xf32>
    %262 = arith.truncf %261 : vector<16x256xf32> to vector<16x256xbf16>
    %c608 = arith.constant 608 : index
    %c0_166 = arith.constant 0 : index
    %263 = vector.load %arg14[%c608, %c0_166] : memref<720x256xbf16, #tpu.memory_space<vmem>>, vector<16x256xbf16>
    tpu.vector_store %arg14[%c608, %c0_166], %262 {strides = array<i32>} : memref<720x256xbf16, #tpu.memory_space<vmem>>, vector<16x256xbf16>,
    %c1_i32_167 = arith.constant 1 : i32
    %264 = tpu.dynamic_rotate %245 by %c1_i32_167 dim 1 : vector<16x256xf32>, i32 -> vector<16x256xf32>
    %c3_168 = arith.constant 3 : index
    %c0_169 = arith.constant 0 : index
    %265 = vector.load %arg2[%c3_168, %c0_169] : memref<9x256xf32, #tpu.memory_space<vmem>>, vector<1x256xf32>
    %266 = vector.broadcast %265 : vector<1x256xf32> to vector<16x256xf32>
    %267 = arith.mulf %264, %266 : vector<16x256xf32>
    %268 = arith.truncf %267 : vector<16x256xf32> to vector<16x256xbf16>
    %c624 = arith.constant 624 : index
    %c0_170 = arith.constant 0 : index
    %269 = vector.load %arg14[%c624, %c0_170] : memref<720x256xbf16, #tpu.memory_space<vmem>>, vector<16x256xbf16>
    tpu.vector_store %arg14[%c624, %c0_170], %268 {strides = array<i32>} : memref<720x256xbf16, #tpu.memory_space<vmem>>, vector<16x256xbf16>,
    %270 = arith.truncf %245 : vector<16x256xf32> to vector<16x256xbf16>
    %c640 = arith.constant 640 : index
    %c0_171 = arith.constant 0 : index
    %271 = vector.load %arg14[%c640, %c0_171] : memref<720x256xbf16, #tpu.memory_space<vmem>>, vector<16x256xbf16>
    tpu.vector_store %arg14[%c640, %c0_171], %270 {strides = array<i32>} : memref<720x256xbf16, #tpu.memory_space<vmem>>, vector<16x256xbf16>,
    %c255_i32_172 = arith.constant 255 : i32
    %272 = tpu.dynamic_rotate %245 by %c255_i32_172 dim 1 : vector<16x256xf32>, i32 -> vector<16x256xf32>
    %c5_173 = arith.constant 5 : index
    %c0_174 = arith.constant 0 : index
    %273 = vector.load %arg2[%c5_173, %c0_174] : memref<9x256xf32, #tpu.memory_space<vmem>>, vector<1x256xf32>
    %274 = vector.broadcast %273 : vector<1x256xf32> to vector<16x256xf32>
    %275 = arith.mulf %272, %274 : vector<16x256xf32>
    %276 = arith.truncf %275 : vector<16x256xf32> to vector<16x256xbf16>
    %c656 = arith.constant 656 : index
    %c0_175 = arith.constant 0 : index
    %277 = vector.load %arg14[%c656, %c0_175] : memref<720x256xbf16, #tpu.memory_space<vmem>>, vector<16x256xbf16>
    tpu.vector_store %arg14[%c656, %c0_175], %276 {strides = array<i32>} : memref<720x256xbf16, #tpu.memory_space<vmem>>, vector<16x256xbf16>,
    %c241_i32_176 = arith.constant 241 : i32
    %278 = tpu.dynamic_rotate %245 by %c241_i32_176 dim 1 : vector<16x256xf32>, i32 -> vector<16x256xf32>
    %c6_177 = arith.constant 6 : index
    %c0_178 = arith.constant 0 : index
    %279 = vector.load %arg2[%c6_177, %c0_178] : memref<9x256xf32, #tpu.memory_space<vmem>>, vector<1x256xf32>
    %280 = vector.broadcast %279 : vector<1x256xf32> to vector<16x256xf32>
    %281 = arith.mulf %278, %280 : vector<16x256xf32>
    %282 = arith.truncf %281 : vector<16x256xf32> to vector<16x256xbf16>
    %c672 = arith.constant 672 : index
    %c0_179 = arith.constant 0 : index
    %283 = vector.load %arg14[%c672, %c0_179] : memref<720x256xbf16, #tpu.memory_space<vmem>>, vector<16x256xbf16>
    tpu.vector_store %arg14[%c672, %c0_179], %282 {strides = array<i32>} : memref<720x256xbf16, #tpu.memory_space<vmem>>, vector<16x256xbf16>,
    %c240_i32_180 = arith.constant 240 : i32
    %284 = tpu.dynamic_rotate %245 by %c240_i32_180 dim 1 : vector<16x256xf32>, i32 -> vector<16x256xf32>
    %c7_181 = arith.constant 7 : index
    %c0_182 = arith.constant 0 : index
    %285 = vector.load %arg2[%c7_181, %c0_182] : memref<9x256xf32, #tpu.memory_space<vmem>>, vector<1x256xf32>
    %286 = vector.broadcast %285 : vector<1x256xf32> to vector<16x256xf32>
    %287 = arith.mulf %284, %286 : vector<16x256xf32>
    %288 = arith.truncf %287 : vector<16x256xf32> to vector<16x256xbf16>
    %c688 = arith.constant 688 : index
    %c0_183 = arith.constant 0 : index
    %289 = vector.load %arg14[%c688, %c0_183] : memref<720x256xbf16, #tpu.memory_space<vmem>>, vector<16x256xbf16>
    tpu.vector_store %arg14[%c688, %c0_183], %288 {strides = array<i32>} : memref<720x256xbf16, #tpu.memory_space<vmem>>, vector<16x256xbf16>,
    %c239_i32_184 = arith.constant 239 : i32
    %290 = tpu.dynamic_rotate %245 by %c239_i32_184 dim 1 : vector<16x256xf32>, i32 -> vector<16x256xf32>
    %c8_185 = arith.constant 8 : index
    %c0_186 = arith.constant 0 : index
    %291 = vector.load %arg2[%c8_185, %c0_186] : memref<9x256xf32, #tpu.memory_space<vmem>>, vector<1x256xf32>
    %292 = vector.broadcast %291 : vector<1x256xf32> to vector<16x256xf32>
    %293 = arith.mulf %290, %292 : vector<16x256xf32>
    %294 = arith.truncf %293 : vector<16x256xf32> to vector<16x256xbf16>
    %c704 = arith.constant 704 : index
    %c0_187 = arith.constant 0 : index
    %295 = vector.load %arg14[%c704, %c0_187] : memref<720x256xbf16, #tpu.memory_space<vmem>>, vector<16x256xbf16>
    tpu.vector_store %arg14[%c704, %c0_187], %294 {strides = array<i32>} : memref<720x256xbf16, #tpu.memory_space<vmem>>, vector<16x256xbf16>,
    %c0_188 = arith.constant 0 : index
    %c0_189 = arith.constant 0 : index
    %296 = vector.load %arg11[%c0_188, %c0_189] : memref<8x720xbf16, #tpu.memory_space<vmem>>, vector<8x720xbf16>
    %c0_190 = arith.constant 0 : index
    %c0_191 = arith.constant 0 : index
    %297 = vector.load %arg14[%c0_190, %c0_191] : memref<720x256xbf16, #tpu.memory_space<vmem>>, vector<720x256xbf16>
    %cst_192 = arith.constant dense<0.000000e+00> : vector<8x256xf32>
    %298 = tpu.matmul %296, %297, %cst_192 {dimension_numbers = #tpu.dot_dimension_numbers<[1], [0], [0], [1], [0, 0, 1, 1], [], []>} : vector<8x720xbf16>, vector<720x256xbf16>, vector<8x256xf32> -> vector<8x256xf32>
    %c0_193 = arith.constant 0 : index
    %c0_194 = arith.constant 0 : index
    %299 = vector.load %arg12[%c0_193, %c0_194] : memref<8x1xf32, #tpu.memory_space<vmem>>, vector<8x1xf32>
    %300 = vector.broadcast %299 : vector<8x1xf32> to vector<8x256xf32>
    %301 = arith.addf %298, %300 : vector<8x256xf32>
    %c0_195 = arith.constant 0 : index
    %c0_196 = arith.constant 0 : index
    %c0_197 = arith.constant 0 : index
    %302 = vector.load %arg13[%c0_195, %c0_196, %c0_197] : memref<1x8x256xf32, #tpu.memory_space<vmem>>, vector<1x8x256xf32>
    %303 = vector.shape_cast %302 : vector<1x8x256xf32> to vector<8x256xf32>
    %304 = vector.shape_cast %301 : vector<8x256xf32> to vector<1x8x256xf32>
    tpu.vector_store %arg13[%c0_195, %c0_196, %c0_197], %304 {strides = array<i32>} : memref<1x8x256xf32, #tpu.memory_space<vmem>>, vector<1x8x256xf32>,
    return
  }
  func.func @transform_0(%arg0: i32) -> (i32, i32, i32) {
    %c0_i32 = arith.constant 0 : i32
    %c0_i32_0 = arith.constant 0 : i32
    %c0_i32_1 = arith.constant 0 : i32
    return %arg0, %c0_i32, %c0_i32_0 : i32, i32, i32
  }
  func.func @transform_1(%arg0: i32) -> (i32, i32) {
    %c0_i32 = arith.constant 0 : i32
    %c0_i32_0 = arith.constant 0 : i32
    %c0_i32_1 = arith.constant 0 : i32
    return %c0_i32, %c0_i32_0 : i32, i32
  }
  func.func @transform_2(%arg0: i32) -> (i32, i32) {
    %c0_i32 = arith.constant 0 : i32
    %c0_i32_0 = arith.constant 0 : i32
    %c0_i32_1 = arith.constant 0 : i32
    return %c0_i32, %c0_i32_0 : i32, i32
  }
  func.func @transform_3(%arg0: i32) -> (i32, i32) {
    %c0_i32 = arith.constant 0 : i32
    %c0_i32_0 = arith.constant 0 : i32
    %c0_i32_1 = arith.constant 0 : i32
    return %c0_i32, %c0_i32_0 : i32, i32
  }
  func.func @transform_4(%arg0: i32) -> (i32, i32) {
    %c0_i32 = arith.constant 0 : i32
    %c0_i32_0 = arith.constant 0 : i32
    %c0_i32_1 = arith.constant 0 : i32
    return %c0_i32, %c0_i32_0 : i32, i32
  }
  func.func @transform_5(%arg0: i32) -> (i32, i32) {
    %c0_i32 = arith.constant 0 : i32
    %c0_i32_0 = arith.constant 0 : i32
    %c0_i32_1 = arith.constant 0 : i32
    return %c0_i32, %c0_i32_0 : i32, i32
  }
  func.func @transform_6(%arg0: i32) -> (i32, i32) {
    %c0_i32 = arith.constant 0 : i32
    %c0_i32_0 = arith.constant 0 : i32
    %c0_i32_1 = arith.constant 0 : i32
    return %c0_i32, %c0_i32_0 : i32, i32
  }
  func.func @transform_7(%arg0: i32) -> (i32, i32) {
    %c0_i32 = arith.constant 0 : i32
    %c0_i32_0 = arith.constant 0 : i32
    %c0_i32_1 = arith.constant 0 : i32
    return %c0_i32, %c0_i32_0 : i32, i32
  }
  func.func @transform_8(%arg0: i32) -> (i32, i32) {
    %c0_i32 = arith.constant 0 : i32
    %c0_i32_0 = arith.constant 0 : i32
    %c0_i32_1 = arith.constant 0 : i32
    return %c0_i32, %c0_i32_0 : i32, i32
  }
  func.func @transform_9(%arg0: i32) -> (i32, i32) {
    %c0_i32 = arith.constant 0 : i32
    %c0_i32_0 = arith.constant 0 : i32
    %c0_i32_1 = arith.constant 0 : i32
    return %c0_i32, %c0_i32_0 : i32, i32
  }
  func.func @transform_10(%arg0: i32) -> (i32, i32) {
    %c0_i32 = arith.constant 0 : i32
    %c0_i32_0 = arith.constant 0 : i32
    %c0_i32_1 = arith.constant 0 : i32
    return %c0_i32, %c0_i32_0 : i32, i32
  }
  func.func @transform_11(%arg0: i32) -> (i32, i32) {
    %c0_i32 = arith.constant 0 : i32
    %c0_i32_0 = arith.constant 0 : i32
    %c0_i32_1 = arith.constant 0 : i32
    return %c0_i32, %c0_i32_0 : i32, i32
  }
  func.func @transform_12(%arg0: i32) -> (i32, i32, i32) {
    %c0_i32 = arith.constant 0 : i32
    %c0_i32_0 = arith.constant 0 : i32
    %c0_i32_1 = arith.constant 0 : i32
    return %arg0, %c0_i32, %c0_i32_0 : i32, i32, i32
  }
}

</mosaic_0001>

<bundles_post_ra>
// kernel: dense_block_forward.1
= control target key start
LH: loop header
LB: loop body
LE: loop exit
PB: predicated region body
PF: predicated region fallthrough
CT: control target
= control target key end

     0   :  { %s2995_s21 = smov 0   ;;  %s4324_s0 = inlined_call_operand.vmem [shape: f32[2,16,256], index: 0, kind: input, shape index: {}]   ;;  %s4325_s1 = inlined_call_operand.vmem [shape: f32[9,256], index: 1, kind: input, shape index: {}]   ;;  %s4326_s2 = inlined_call_operand.vmem [shape: bf16[16,144], index: 2, kind: input, shape index: {}]   ;;  %s4327_s3 = inlined_call_operand.vmem [shape: f32[16,1], index: 3, kind: input, shape index: {}]   ;;  %s4328_s4 = inlined_call_operand.vmem [shape: bf16[16,288], index: 4, kind: input, shape index: {}]   ;;  %s4329_s5 = inlined_call_operand.vmem [shape: f32[16,1], index: 5, kind: input, shape index: {}]   ;;  %s4330_s6 = inlined_call_operand.vmem [shape: bf16[16,432], index: 6, kind: input, shape index: {}]   ;;  %s4331_s7 = inlined_call_operand.vmem [shape: f32[16,1], index: 7, kind: input, shape index: {}]   ;;  %s4332_s8 = inlined_call_operand.vmem [shape: bf16[16,576], index: 8, kind: input, shape index: {}]   ;;  %s4333_s9 = inlined_call_operand.vmem [shape: f32[16,1], index: 9, kind: input, shape index: {}]   ;;  %s4334_s10 = inlined_call_operand.vmem [shape: bf16[8,720], index: 10, kind: input, shape index: {}]   ;;  %s4335_s11 = inlined_call_operand.vmem [shape: f32[8,1], index: 11, kind: input, shape index: {}]   ;;  %s4336_s12 = inlined_call_operand.vmem [shape: f32[2,8,256], index: 12, kind: output, shape index: {}]  }
   0x1 LB: > { %s2759_s22 = sadd.s32 4294967295, %s2919_s21   ;;  %p2763_p0 = scmp.ge.s32.totalorder %s2919_s21, 1  ;;  %s2919_s21 = sphi %s2995_s21, %s22_s21  }
   0x2   : > { %p362_p1 = scmp.lt.s32.totalorder %s2919_s21, 3 }
   0x4   : > { %p363_p2 = pnand %p2763_p0, %p362_p1 }
   0x6   : > { %366 = sbr.rel (%p363_p2) target bundleno = 2031 (0x7ef), region = 68 }
   0xd   : > { %p404_p3 = scmp.lt.s32.totalorder %s2759_s22, 1  ;;  %s2921_s27 = smov 17   ;;  %v2889_v6 = vld [vmem:[%s4326_s2 + $0x4] ss:$8 sps:$4 sm:$0xff]   ;;  %vm737_vm0 = vcmask 130048   ;;  %v4337_v9 = vmov 0   ;;  %v427_v10 = vlaneseq }
   0xe   : > { %s2922_s28 = smov 16   ;;  %s2923_s29 = smov 15   ;;  %2777 = vmatprep.mubr.msk.bf16.mxu0 %vm737_vm0, %v2889_v6  ;;  %v716_v7 = vld [vmem:[%s4327_s3] sm:$0xff]  ;;  %v717_v8 = vld [vmem:[%s4327_s3 + $0x8] sm:$0xff]  ;;  %2885 = vset.pattern.permute.xlu0 %v4337_v9  ;;  %vm1123_vm13 = vcmask 261120  }
   0xf   : > { %s4370_s22 = smov (!%p404_p3, %s2759_s22), 1  ;;  %s2924_s30 = smov 1   ;;  %2886 = vset.pattern.permute.xlu1 %v4337_v9  ;;  %v437_v11 = vshrl.u32 %v427_v10, 7  ;;  %v3056_v12 = vand.u32 127, %v427_v10 }
  0x10   : > { %s2830_s23 = sshll.u32 %s4370_s22, 5  ;;  %s2925_s13 = smov 127   ;;  %v434_v15 = vld [vmem:[%s4325_s1] ss:$8 sm:$0x3] }
  0x11   : > { %s408_s26 = scalar_lea.vmem %s4324_s0, %s2830_s23  ;;  %s2926_s14 = smov 113   ;;  %v3058_v13 = vsub.s32 0, %v437_v11  ;;  %v3060_v14 = vsub.s32 1, %v437_v11  ;;  %vm429_vm1 = vcmp.lt.s32.totalorder %v3056_v12, 17  ;;  %vm462_vm2 = vcmp.lt.s32.totalorder %v3056_v12, 16 }
  0x12   : > { %v416_v0 = vld [vmem:[%s408_s26 + $0x8] sm:$0xff]  ;;  %v415_v1 = vld [vmem:[%s408_s26] sm:$0xff]  ;;  %v418_v2 = vld [vmem:[%s408_s26 + $0x18] sm:$0xff]  ;;  %s2927_s15 = smov 112   ;;  %s2928_s18 = smov 111   ;;  %vm496_vm3 = vcmp.lt.s32.totalorder %v3056_v12, 15 }
  0x13   : > { %423 = vrot.lane.b32.xlu1 %v416_v0, %s2921_s27  ;;  %419 = vrot.lane.b32.xlu0 %v415_v1, %s2921_s27  ;;  %v417_v3 = vld [vmem:[%s408_s26 + $0x10] sm:$0xff]  ;;  %v3021_v4 = vpack.c.bf16 %v418_v2, %v416_v0  ;;  %v439_v18 = vrot.slane %v434_v15, %v3058_v13  ;;  %v443_v19 = vrot.slane %v434_v15, %v3060_v14  ;;  %v2768_v30 = vld [vmem:[%s4325_s1 + $0x1] ss:$8 sm:$0x3]  ;;  %vm530_vm4 = vcmp.lt.s32.totalorder %v3056_v12, 1 }
  0x14   : > { %v3023_v5 = vpack.c.bf16 %v417_v3, %v415_v1  ;;  %v473_v35 = vrot.slane %v2768_v30, %v3058_v13  ;;  %v477_v36 = vrot.slane %v2768_v30, %v3060_v14  ;;  %v2769_v47 = vld [vmem:[%s4325_s1 + $0x2] ss:$8 sm:$0x3]  ;;  %vm568_vm5 = vcmp.lt.s32.totalorder %v3056_v12, 127 }
  0x15   : > { %v507_v52 = vrot.slane %v2769_v47, %v3058_v13  ;;  %v511_v53 = vrot.slane %v2769_v47, %v3060_v14  ;;  %vm602_vm6 = vcmp.lt.s32.totalorder %v3056_v12, 113  ;;  %vm636_vm7 = vcmp.lt.s32.totalorder %v3056_v12, 112 }
  0x16   : > { %vm670_vm8 = vcmp.lt.s32.totalorder %v3056_v12, 111 }
  0x17   : > { %425 = vrot.lane.b32.xlu1 %v418_v2, %s2921_s27  ;;  %421 = vrot.lane.b32.xlu0 %v417_v3, %s2921_s27 }
  0x1b   : > { %456 = vrot.lane.b32.xlu1 %v417_v3, %s2922_s28  ;;  %454 = vrot.lane.b32.xlu0 %v415_v1, %s2922_s28 }
  0x1f   : > { %460 = vrot.lane.b32.xlu1 %v418_v2, %s2922_s28  ;;  %458 = vrot.lane.b32.xlu0 %v416_v0, %s2922_s28 }
  0x23   : > { %490 = vrot.lane.b32.xlu1 %v417_v3, %s2923_s29  ;;  %488 = vrot.lane.b32.xlu0 %v415_v1, %s2923_s29 }
  0x27   : > { %494 = vrot.lane.b32.xlu1 %v418_v2, %s2923_s29  ;;  %492 = vrot.lane.b32.xlu0 %v416_v0, %s2923_s29 }
  0x2b   : > { %524 = vrot.lane.b32.xlu1 %v417_v3, %s2924_s30  ;;  %522 = vrot.lane.b32.xlu0 %v415_v1, %s2924_s30 }
  0x2f   : > { %528 = vrot.lane.b32.xlu1 %v418_v2, %s2924_s30  ;;  %526 = vrot.lane.b32.xlu0 %v416_v0, %s2924_s30 }
  0x33   : > { %562 = vrot.lane.b32.xlu1 %v417_v3, %s2925_s13  ;;  %560 = vrot.lane.b32.xlu0 %v415_v1, %s2925_s13 }
  0x37   : > { %566 = vrot.lane.b32.xlu1 %v418_v2, %s2925_s13  ;;  %564 = vrot.lane.b32.xlu0 %v416_v0, %s2925_s13 }
  0x3b   : > { %596 = vrot.lane.b32.xlu1 %v417_v3, %s2926_s14  ;;  %594 = vrot.lane.b32.xlu0 %v415_v1, %s2926_s14 }
  0x3f   : > { %600 = vrot.lane.b32.xlu1 %v418_v2, %s2926_s14  ;;  %598 = vrot.lane.b32.xlu0 %v416_v0, %s2926_s14 }
  0x43   : > { %630 = vrot.lane.b32.xlu1 %v417_v3, %s2927_s15  ;;  %628 = vrot.lane.b32.xlu0 %v415_v1, %s2927_s15 }
  0x47   : > { %634 = vrot.lane.b32.xlu1 %v418_v2, %s2927_s15  ;;  %632 = vrot.lane.b32.xlu0 %v416_v0, %s2927_s15 }
  0x4b   : > { %664 = vrot.lane.b32.xlu1 %v417_v3, %s2928_s18  ;;  %662 = vrot.lane.b32.xlu0 %v415_v1, %s2928_s18 }
  0x4f   : > { %668 = vrot.lane.b32.xlu1 %v418_v2, %s2928_s18  ;;  %666 = vrot.lane.b32.xlu0 %v416_v0, %s2928_s18  ;;  %v2770_v0 = vld [vmem:[%s4325_s1 + $0x3] ss:$8 sm:$0x3] }
  0x53   : > { %720 = vperm.xlu0 %2885, %v716_v7   ;;  %725 = vperm.xlu1 %2886, %v717_v8   ;;  %v541_v7 = vrot.slane %v2770_v0, %v3058_v13  ;;  %v545_v8 = vrot.slane %v2770_v0, %v3060_v14 }
  0x85   : > { %v424_v16 = vpop.permute.xlu1 %423  ;;  %v420_v17 = vpop.permute.xlu0 %419 }
  0x86   : > { %v430_v20 = vsel %vm429_vm1, %v420_v17, %v424_v16  ;;  %v432_v21 = vsel %vm429_vm1, %v424_v16, %v420_v17 }
  0x87   : > { %v446_v26 = vmul.f32 %v439_v18, %v432_v21  ;;  %v447_v27 = vmul.f32 %v443_v19, %v430_v20 }
  0x89   : > { %v426_v22 = vpop.permute.xlu1 %425  ;;  %v422_v23 = vpop.permute.xlu0 %421 }
  0x8a   : > { %v431_v24 = vsel %vm429_vm1, %v422_v23, %v426_v22  ;;  %v433_v25 = vsel %vm429_vm1, %v426_v22, %v422_v23  ;;  %v2771_v23 = vld [vmem:[%s4325_s1 + $0x5] ss:$8 sm:$0x3] }
  0x8b   : > { %v448_v28 = vmul.f32 %v439_v18, %v433_v25  ;;  %v449_v29 = vmul.f32 %v443_v19, %v431_v24 }
  0x8d   : > { %v3079_v31 = vpack.c.bf16 %v448_v28, %v446_v26  ;;  %v3081_v32 = vpack.c.bf16 %v449_v29, %v447_v27  ;;  %v457_v33 = vpop.permute.xlu1 %456  ;;  %v455_v34 = vpop.permute.xlu0 %454  ;;  %v579_v28 = vrot.slane %v2771_v23, %v3058_v13  ;;  %v583_v29 = vrot.slane %v2771_v23, %v3060_v14 }
  0x8f   : > { %741 = vmatprep.subr.bf16.mxu0 %v3081_v32  ;;  %1127 = vmatprep.subr.bf16.mxu1 %v3081_v32 }
  0x90   : > { %742 = vmatpush1.bf16.msra.mxu0 %v3079_v31  ;;  %1128 = vmatpush1.bf16.msra.mxu1 %v3079_v31 }
  0x91   : > { %v461_v37 = vpop.permute.xlu1 %460  ;;  %v459_v38 = vpop.permute.xlu0 %458 }
  0x92   : > { %v464_v39 = vsel %vm462_vm2, %v457_v33, %v461_v37  ;;  %v466_v40 = vsel %vm462_vm2, %v461_v37, %v457_v33  ;;  %v463_v41 = vsel %vm462_vm2, %v455_v34, %v459_v38  ;;  %v465_v42 = vsel %vm462_vm2, %v459_v38, %v455_v34 }
  0x93   : > { %v482_v43 = vmul.f32 %v473_v35, %v466_v40  ;;  %v483_v44 = vmul.f32 %v477_v36, %v464_v39  ;;  %v480_v45 = vmul.f32 %v473_v35, %v465_v42  ;;  %v481_v46 = vmul.f32 %v477_v36, %v463_v41  ;;  %v2772_v42 = vld [vmem:[%s4325_s1 + $0x6] ss:$8 sm:$0x3] }
  0x94   : > { %v613_v47 = vrot.slane %v2772_v42, %v3058_v13 }
  0x95   : > { %v3101_v48 = vpack.c.bf16 %v482_v43, %v480_v45  ;;  %v3103_v49 = vpack.c.bf16 %v483_v44, %v481_v46  ;;  %v491_v50 = vpop.permute.xlu1 %490  ;;  %v489_v51 = vpop.permute.xlu0 %488 }
  0x97   : > { %743 = vmatprep.subr.bf16.mxu0 %v3103_v49  ;;  %1129 = vmatprep.subr.bf16.mxu1 %v3103_v49 }
  0x98   : > { %744 = vmatpush1.bf16.msra.mxu0 %v3101_v48  ;;  %1130 = vmatpush1.bf16.msra.mxu1 %v3101_v48 }
  0x99   : > { %v495_v54 = vpop.permute.xlu1 %494  ;;  %v493_v55 = vpop.permute.xlu0 %492 }
  0x9a   : > { %v498_v56 = vsel %vm496_vm3, %v491_v50, %v495_v54  ;;  %v500_v57 = vsel %vm496_vm3, %v495_v54, %v491_v50  ;;  %v497_v58 = vsel %vm496_vm3, %v489_v51, %v493_v55  ;;  %v499_v59 = vsel %vm496_vm3, %v493_v55, %v489_v51 }
  0x9b   : > { %v516_v60 = vmul.f32 %v507_v52, %v500_v57  ;;  %v517_v61 = vmul.f32 %v511_v53, %v498_v56  ;;  %v514_v62 = vmul.f32 %v507_v52, %v499_v59  ;;  %v515_v63 = vmul.f32 %v511_v53, %v497_v58 }
  0x9c   : > { %v617_v50 = vrot.slane %v2772_v42, %v3060_v14 }
  0x9d   : > { %v3123_v1 = vpack.c.bf16 %v516_v60, %v514_v62  ;;  %v3125_v2 = vpack.c.bf16 %v517_v61, %v515_v63  ;;  %v525_v3 = vpop.permute.xlu1 %524  ;;  %v523_v6 = vpop.permute.xlu0 %522  ;;  %v2773_v61 = vld [vmem:[%s4325_s1 + $0x7] ss:$8 sm:$0x3] }
  0x9f   : > { %745 = vmatprep.subr.bf16.mxu0 %v3125_v2  ;;  %1131 = vmatprep.subr.bf16.mxu1 %v3125_v2 }
  0xa0   : > { %746 = vmatpush1.bf16.msra.mxu0 %v3123_v1  ;;  %1132 = vmatpush1.bf16.msra.mxu1 %v3123_v1 }
  0xa1   : > { %v529_v10 = vpop.permute.xlu1 %528  ;;  %v527_v11 = vpop.permute.xlu0 %526 }
  0xa2   : > { %v532_v15 = vsel %vm530_vm4, %v525_v3, %v529_v10  ;;  %v534_v16 = vsel %vm530_vm4, %v529_v10, %v525_v3  ;;  %v531_v17 = vsel %vm530_vm4, %v523_v6, %v527_v11  ;;  %v533_v18 = vsel %vm530_vm4, %v527_v11, %v523_v6 }
  0xa3   : > { %v550_v19 = vmul.f32 %v541_v7, %v534_v16  ;;  %v551_v20 = vmul.f32 %v545_v8, %v532_v15  ;;  %v548_v21 = vmul.f32 %v541_v7, %v533_v18  ;;  %v549_v22 = vmul.f32 %v545_v8, %v531_v17 }
  0xa4   : > { %v647_v6 = vrot.slane %v2773_v61, %v3058_v13  ;;  %v651_v7 = vrot.slane %v2773_v61, %v3060_v14 }
  0xa5   : > { %v3145_v24 = vpack.c.bf16 %v550_v19, %v548_v21  ;;  %v3147_v25 = vpack.c.bf16 %v551_v20, %v549_v22  ;;  %v563_v26 = vpop.permute.xlu1 %562  ;;  %v561_v27 = vpop.permute.xlu0 %560  ;;  %v2774_v22 = vld [vmem:[%s4325_s1 + $0x10] ss:$8 sm:$0x3] }
  0xa7   : > { %747 = vmatprep.subr.bf16.mxu0 %v3147_v25  ;;  %1133 = vmatprep.subr.bf16.mxu1 %v3147_v25 }
  0xa8   : > { %748 = vmatpush1.bf16.msra.mxu0 %v3145_v24  ;;  %1134 = vmatpush1.bf16.msra.mxu1 %v3145_v24 }
  0xa9   : > { %v567_v30 = vpop.permute.xlu1 %566  ;;  %v565_v33 = vpop.permute.xlu0 %564  ;;  %749 = vmatprep.subr.bf16.mxu0 %v3021_v4  ;;  %1135 = vmatprep.subr.bf16.mxu1 %v3021_v4 }
  0xaa   : > { %v570_v34 = vsel %vm568_vm5, %v563_v26, %v567_v30  ;;  %v572_v35 = vsel %vm568_vm5, %v567_v30, %v563_v26  ;;  %v569_v36 = vsel %vm568_vm5, %v561_v27, %v565_v33  ;;  %v571_v37 = vsel %vm568_vm5, %v565_v33, %v561_v27 }
  0xab   : > { %v588_v38 = vmul.f32 %v579_v28, %v570_v34  ;;  %v589_v39 = vmul.f32 %v583_v29, %v572_v35  ;;  %v586_v40 = vmul.f32 %v579_v28, %v569_v36  ;;  %v587_v41 = vmul.f32 %v583_v29, %v571_v37 }
  0xac   : > { %750 = vmatpush1.bf16.msra.mxu0 %v3023_v5  ;;  %1136 = vmatpush1.bf16.msra.mxu1 %v3023_v5  ;;  %v681_v29 = vrot.slane %v2774_v22, %v3058_v13  ;;  %v685_v30 = vrot.slane %v2774_v22, %v3060_v14 }
  0xad   : > { %v3171_v43 = vpack.c.bf16 %v588_v38, %v586_v40  ;;  %v3173_v44 = vpack.c.bf16 %v589_v39, %v587_v41  ;;  %v597_v45 = vpop.permute.xlu1 %596  ;;  %v595_v46 = vpop.permute.xlu0 %594 }
  0xaf   : > { %751 = vmatprep.subr.bf16.mxu0 %v3173_v44  ;;  %1137 = vmatprep.subr.bf16.mxu1 %v3173_v44 }
  0xb0   : > { %752 = vmatpush1.bf16.msra.mxu0 %v3171_v43  ;;  %1138 = vmatpush1.bf16.msra.mxu1 %v3171_v43 }
  0xb1   : > { %v601_v51 = vpop.permute.xlu1 %600  ;;  %v599_v52 = vpop.permute.xlu0 %598 }
  0xb2   : > { %v604_v53 = vsel %vm602_vm6, %v597_v45, %v601_v51  ;;  %v606_v54 = vsel %vm602_vm6, %v601_v51, %v597_v45  ;;  %v603_v55 = vsel %vm602_vm6, %v595_v46, %v599_v52  ;;  %v605_v56 = vsel %vm602_vm6, %v599_v52, %v595_v46 }
  0xb3   : > { %v622_v57 = vmul.f32 %v613_v47, %v604_v53  ;;  %v623_v58 = vmul.f32 %v617_v50, %v606_v54  ;;  %v620_v59 = vmul.f32 %v613_v47, %v603_v55  ;;  %v621_v60 = vmul.f32 %v617_v50, %v605_v56  ;;  %v2887_v47 = vld [vmem:[%s4326_s2] ss:$8 sps:$4 sm:$0xff]  }
  0xb5   : > { %v3193_v62 = vpack.c.bf16 %v622_v57, %v620_v59  ;;  %v3195_v63 = vpack.c.bf16 %v623_v58, %v621_v60  ;;  %v631_v0 = vpop.permute.xlu1 %630  ;;  %v629_v3 = vpop.permute.xlu0 %628 }
  0xb7   : > { %753 = vmatprep.subr.bf16.mxu0 %v3195_v63  ;;  %1139 = vmatprep.subr.bf16.mxu1 %v3195_v63 }
  0xb8   : > { %754 = vmatpush1.bf16.msra.mxu0 %v3193_v62  ;;  %1140 = vmatpush1.bf16.msra.mxu1 %v3193_v62 }
  0xb9   : > { %v635_v8 = vpop.permute.xlu1 %634  ;;  %v633_v10 = vpop.permute.xlu0 %632 }
  0xba   : > { %v638_v11 = vsel %vm636_vm7, %v631_v0, %v635_v8  ;;  %v640_v15 = vsel %vm636_vm7, %v635_v8, %v631_v0  ;;  %v637_v16 = vsel %vm636_vm7, %v629_v3, %v633_v10  ;;  %v639_v17 = vsel %vm636_vm7, %v633_v10, %v629_v3 }
  0xbb   : > { %v656_v18 = vmul.f32 %v647_v6, %v638_v11  ;;  %v657_v19 = vmul.f32 %v651_v7, %v640_v15  ;;  %v654_v20 = vmul.f32 %v647_v6, %v637_v16  ;;  %v655_v21 = vmul.f32 %v651_v7, %v639_v17  ;;  %v2892_v16 = vld [vmem:[%s4328_s4 + $0x4] ss:$12 sps:$4 sm:$0xff]  }
  0xbc   : > { %1159 = vmatprep.mubr.bf16.mxu1 %v2892_v16  ;;  %v2895_v17 = vld [vmem:[%s4330_s6 + $0x4] ss:$16 sps:$4 sm:$0xff]  }
  0xbd   : > { %v3215_v23 = vpack.c.bf16 %v656_v18, %v654_v20  ;;  %v3217_v26 = vpack.c.bf16 %v657_v19, %v655_v21  ;;  %v665_v27 = vpop.permute.xlu1 %664  ;;  %v663_v28 = vpop.permute.xlu0 %662  ;;  %v1096_v18 = vld [vmem:[%s4329_s5] sm:$0xff]  ;;  %v1097_v19 = vld [vmem:[%s4329_s5 + $0x8] sm:$0xff] }
  0xbf   : > { %755 = vmatprep.subr.bf16.mxu0 %v3217_v26  ;;  %1141 = vmatprep.subr.bf16.mxu1 %v3217_v26 }
  0xc0   : > { %756 = vmatpush1.bf16.msra.mxu0 %v3215_v23  ;;  %1142 = vmatpush1.bf16.msra.mxu1 %v3215_v23 }
  0xc1   : > { %v669_v33 = vpop.permute.xlu1 %668  ;;  %v667_v34 = vpop.permute.xlu0 %666 }
  0xc2   : > { %v672_v35 = vsel %vm670_vm8, %v665_v27, %v669_v33  ;;  %v674_v36 = vsel %vm670_vm8, %v669_v33, %v665_v27  ;;  %v671_v37 = vsel %vm670_vm8, %v663_v28, %v667_v34  ;;  %v673_v38 = vsel %vm670_vm8, %v667_v34, %v663_v28 }
  0xc3   : > { %v690_v39 = vmul.f32 %v681_v29, %v672_v35  ;;  %v691_v40 = vmul.f32 %v685_v30, %v674_v36  ;;  %v688_v41 = vmul.f32 %v681_v29, %v671_v37  ;;  %v689_v42 = vmul.f32 %v685_v30, %v673_v38  ;;  %v808_v37 = vld [vmem:[%s4325_s1] ss:$8 sm:$0x3] }
  0xc5   : > { %v3234_v45 = vpack.c.bf16 %v690_v39, %v688_v41  ;;  %v3236_v46 = vpack.c.bf16 %v691_v40, %v689_v42  ;;  %v813_v39 = vrot.slane %v808_v37, %v3058_v13  ;;  %v817_v40 = vrot.slane %v808_v37, %v3060_v14  ;;  %v2778_v42 = vld [vmem:[%s4325_s1 + $0x1] ss:$8 sm:$0x3] }
  0xc7   : > { %757 = vmatprep.subr.bf16.mxu0 %v3236_v46  ;;  %1143 = vmatprep.subr.bf16.mxu1 %v3236_v46 }
  0xc8   : > { %758 = vmatpush1.bf16.msra.mxu0 %v3234_v45  ;;  %1144 = vmatpush1.bf16.msra.mxu1 %v3234_v45 }
  0xc9   : > { %1578 = vmatprep.subr.bf16.mxu0 %v3081_v32 }
  0xcb   : > { %774 = vmatmul.mubr.bf16.vlgmr.msra.gmra.mrb[0].mxu0 %v2887_v47 }
  0xcc   : > { %1579 = vmatpush1.bf16.msra.mxu0 %v3079_v31  ;;  %1610 = vmatprep.mubr.bf16.mxu0 %v2895_v17 }
  0xcd   : > { %1580 = vmatprep.subr.bf16.mxu0 %v3103_v49 }
  0xd0   : > { %1581 = vmatpush1.bf16.msra.mxu0 %v3101_v48 }
  0xd1   : > { %1582 = vmatprep.subr.bf16.mxu0 %v3125_v2 }
  0xd2   : > { %v721_v50 = vpop.permute.xlu0 %720  ;;  %v726_v52 = vpop.permute.xlu1 %725 }
  0xd4   : > { %1583 = vmatpush1.bf16.msra.mxu0 %v3123_v1 }
  0xd5   : > { %1584 = vmatprep.subr.bf16.mxu0 %v3147_v25 }
  0xd8   : > { %1585 = vmatpush1.bf16.msra.mxu0 %v3145_v24 }
  0xd9   : > { %1586 = vmatprep.subr.bf16.mxu0 %v3021_v4 }
  0xdc   : > { %1587 = vmatpush1.bf16.msra.mxu0 %v3023_v5 }
  0xdd   : > { %1588 = vmatprep.subr.bf16.mxu0 %v3173_v44 }
  0xe0   : > { %1589 = vmatpush1.bf16.msra.mxu0 %v3171_v43 }
  0xe1   : > { %1590 = vmatprep.subr.bf16.mxu0 %v3195_v63 }
  0xe4   : > { %1591 = vmatpush1.bf16.msra.mxu0 %v3193_v62 }
  0xe5   : > { %1592 = vmatprep.subr.bf16.mxu0 %v3217_v26 }
  0xe8   : > { %1593 = vmatpush1.bf16.msra.mxu0 %v3215_v23 }
  0xe9   : > { %1594 = vmatprep.subr.bf16.mxu0 %v3236_v46 }
  0xec   : > { %1595 = vmatpush1.bf16.msra.mxu0 %v3234_v45 }
 0x19e   : > { %v775_v51 = vpop.f32.mrb[0].mxu0 }
 0x19f   : > { %v776_v53 = vadd.f32 %v775_v51, %v721_v50  ;;  %v777_v54 = vpop.f32.mrb[1].mxu0 }
 0x1a0   : > { %v778_v55 = vadd.f32 %v777_v54, %v721_v50  ;;  %v779_v56 = vpop.f32.mrb[2].mxu0  ;;  %v845_v54 = vrot.slane %v2778_v42, %v3058_v13 }
 0x1a1   : > { %vm784_vm9 = vcmp.gt.f32.partialorder %v776_v53, 0.0  ;;  %v788_v57 = vmul.f32 0.2, %v776_v53  ;;  %v780_v58 = vadd.f32 %v779_v56, %v726_v52  ;;  %v781_v59 = vpop.f32.mrb[3].mxu0 }
 0x1a2   : > { %v789_v60 = vmul.f32 0.2, %v778_v55  ;;  %v782_v61 = vadd.f32 %v781_v59, %v726_v52  ;;  %vm785_vm10 = vcmp.gt.f32.partialorder %v778_v55, 0.0  ;;  %v2779_v56 = vld [vmem:[%s4325_s1 + $0x2] ss:$8 sm:$0x3] }
 0x1a3   : > { %v792_v0 = vsel %vm784_vm9, %v776_v53, %v788_v57  ;;  %vm786_vm11 = vcmp.gt.f32.partialorder %v780_v58, 0.0  ;;  %v790_v3 = vmul.f32 0.2, %v780_v58 }
 0x1a4   : > { %vm787_vm12 = vcmp.gt.f32.partialorder %v782_v61, 0.0  ;;  %v791_v6 = vmul.f32 0.2, %v782_v61  ;;  %796 = vrot.lane.b32.xlu1 %v792_v0, %s2921_s27  ;;  %v793_v8 = vsel %vm785_vm10, %v778_v55, %v789_v60  ;;  %v849_v55 = vrot.slane %v2778_v42, %v3060_v14 }
 0x1a5   : > { %v794_v7 = vsel %vm786_vm11, %v780_v58, %v790_v3  ;;  %vm1574_vm10 = vcmask 392192  }
 0x1a6   : > { %v795_v10 = vsel %vm787_vm12, %v782_v61, %v791_v6  ;;  %798 = vrot.lane.b32.xlu0 %v794_v7, %s2921_s27  ;;  %v3265_v11 = vpack.c.bf16 %v794_v7, %v792_v0 }
 0x1a7   : > { %v3267_v15 = vpack.c.bf16 %v795_v10, %v793_v8 }
 0x1a8   : > { %4348 = vst [vmem:[#allocation3_spill] sm:$0xff] %v3265_v11  ;;  %828 = vrot.lane.b32.xlu1 %v792_v0, %s2922_s28 }
 0x1a9   : > { %4349 = vst [vmem:[#allocation4_spill] sm:$0xff] %v3267_v15 }
 0x1aa   : > { %830 = vrot.lane.b32.xlu0 %v794_v7, %s2922_s28 }
 0x1ac   : > { %860 = vrot.lane.b32.xlu1 %v792_v0, %s2923_s29 }
 0x1ae   : > { %862 = vrot.lane.b32.xlu0 %v794_v7, %s2923_s29 }
 0x1b0   : > { %892 = vrot.lane.b32.xlu1 %v792_v0, %s2924_s30 }
 0x1b2   : > { %894 = vrot.lane.b32.xlu0 %v794_v7, %s2924_s30 }
 0x1b4   : > { %928 = vrot.lane.b32.xlu1 %v792_v0, %s2925_s13 }
 0x1b6   : > { %930 = vrot.lane.b32.xlu0 %v794_v7, %s2925_s13 }
 0x1b8   : > { %960 = vrot.lane.b32.xlu1 %v792_v0, %s2926_s14 }
 0x1ba   : > { %962 = vrot.lane.b32.xlu0 %v794_v7, %s2926_s14 }
 0x1bc   : > { %800 = vrot.lane.b32.xlu1 %v793_v8, %s2921_s27 }
 0x1be   : > { %802 = vrot.lane.b32.xlu0 %v795_v10, %s2921_s27 }
 0x1c0   : > { %832 = vrot.lane.b32.xlu1 %v793_v8, %s2922_s28 }
 0x1c2   : > { %834 = vrot.lane.b32.xlu0 %v795_v10, %s2922_s28 }
 0x1c4   : > { %864 = vrot.lane.b32.xlu1 %v793_v8, %s2923_s29 }
 0x1c6   : > { %866 = vrot.lane.b32.xlu0 %v795_v10, %s2923_s29 }
 0x1c8   : > { %896 = vrot.lane.b32.xlu1 %v793_v8, %s2924_s30 }
 0x1ca   : > { %898 = vrot.lane.b32.xlu0 %v795_v10, %s2924_s30 }
 0x1cc   : > { %992 = vrot.lane.b32.xlu1 %v792_v0, %s2927_s15 }
 0x1ce   : > { %994 = vrot.lane.b32.xlu0 %v794_v7, %s2927_s15 }
 0x1d0   : > { %932 = vrot.lane.b32.xlu1 %v793_v8, %s2925_s13 }
 0x1d2   : > { %934 = vrot.lane.b32.xlu0 %v795_v10, %s2925_s13 }
 0x1d4   : > { %964 = vrot.lane.b32.xlu1 %v793_v8, %s2926_s14 }
 0x1d6   : > { %966 = vrot.lane.b32.xlu0 %v795_v10, %s2926_s14 }
 0x1d8   : > { %996 = vrot.lane.b32.xlu1 %v793_v8, %s2927_s15 }
 0x1da   : > { %1026 = vrot.lane.b32.xlu0 %v794_v7, %s2928_s18 }
 0x1dc   : > { %1024 = vrot.lane.b32.xlu1 %v792_v0, %s2928_s18 }
 0x1de   : > { %998 = vrot.lane.b32.xlu0 %v795_v10, %s2927_s15 }
 0x1e0   : > { %1028 = vrot.lane.b32.xlu1 %v793_v8, %s2928_s18 }
 0x1e2   : > { %1030 = vrot.lane.b32.xlu0 %v795_v10, %s2928_s18  ;;  %v877_v10 = vrot.slane %v2779_v56, %v3058_v13 }
 0x1e4   : > { %1100 = vperm.xlu1 %2886, %v1096_v18  }
 0x1e6   : > { %1105 = vperm.xlu0 %2885, %v1097_v19   ;;  %v881_v19 = vrot.slane %v2779_v56, %v3060_v14 }
 0x216   : > { %v797_v20 = vpop.permute.xlu1 %796 }
 0x218   : > { %v799_v21 = vpop.permute.xlu0 %798 }
 0x21a   : > { %v829_v22 = vpop.permute.xlu1 %828 }
 0x21c   : > { %v831_v27 = vpop.permute.xlu0 %830 }
 0x21e   : > { %v861_v28 = vpop.permute.xlu1 %860 }
 0x220   : > { %v863_v29 = vpop.permute.xlu0 %862 }
 0x222   : > { %v893_v30 = vpop.permute.xlu1 %892 }
 0x224   : > { %v3311_v33 = vpop.permute.xlu0 %894 }
 0x226   : > { %v3313_v34 = vpop.permute.xlu1 %928 }
 0x228   : > { %v3315_v35 = vpop.permute.xlu0 %930 }
 0x22a   : > { %v3317_v36 = vpop.permute.xlu1 %960 }
 0x22c   : > { %v3322_v38 = vpop.permute.xlu0 %962 }
 0x22e   : > { %v801_v41 = vpop.permute.xlu1 %800 }
 0x22f   : > { %v804_v47 = vsel %vm429_vm1, %v797_v20, %v801_v41  ;;  %v806_v50 = vsel %vm429_vm1, %v801_v41, %v797_v20  ;;  %v2780_v20 = vld [vmem:[%s4325_s1 + $0x3] ss:$8 sm:$0x3] }
 0x230   : > { %v803_v51 = vpop.permute.xlu0 %802  ;;  %v820_v57 = vmul.f32 %v813_v39, %v806_v50  ;;  %v821_v58 = vmul.f32 %v817_v40, %v804_v47  ;;  %v909_v50 = vrot.slane %v2780_v20, %v3058_v13 }
 0x231   : > { %v805_v52 = vsel %vm429_vm1, %v799_v21, %v803_v51  ;;  %v807_v53 = vsel %vm429_vm1, %v803_v51, %v799_v21 }
 0x232   : > { %v822_v59 = vmul.f32 %v813_v39, %v807_v53  ;;  %v823_v60 = vmul.f32 %v817_v40, %v805_v52  ;;  %v833_v61 = vpop.permute.xlu1 %832 }
 0x233   : > { %v836_v0 = vsel %vm462_vm2, %v829_v22, %v833_v61  ;;  %v838_v3 = vsel %vm462_vm2, %v833_v61, %v829_v22 }
 0x234   : > { %v3346_v6 = vpack.c.bf16 %v822_v59, %v820_v57  ;;  %v3348_v7 = vpack.c.bf16 %v823_v60, %v821_v58  ;;  %v835_v8 = vpop.permute.xlu0 %834  ;;  %v852_v16 = vmul.f32 %v845_v54, %v838_v3  ;;  %v853_v21 = vmul.f32 %v849_v55, %v836_v0 }
 0x235   : > { %v837_v17 = vsel %vm462_vm2, %v831_v27, %v835_v8  ;;  %v839_v18 = vsel %vm462_vm2, %v835_v8, %v831_v27 }
 0x236   : > { %v854_v22 = vmul.f32 %v845_v54, %v839_v18  ;;  %v855_v37 = vmul.f32 %v849_v55, %v837_v17  ;;  %1145 = vmatprep.subr.bf16.mxu1 %v3348_v7  ;;  %1596 = vmatprep.subr.bf16.mxu0 %v3348_v7  ;;  %v865_v39 = vpop.permute.xlu1 %864  ;;  %v2781_v18 = vld [vmem:[%s4325_s1 + $0x5] ss:$8 sm:$0x3] }
 0x237   : > { %v868_v40 = vsel %vm496_vm3, %v861_v28, %v865_v39  ;;  %v870_v27 = vsel %vm496_vm3, %v865_v39, %v861_v28  ;;  %1146 = vmatpush1.bf16.msra.mxu1 %v3346_v6  ;;  %1597 = vmatpush1.bf16.msra.mxu0 %v3346_v6  ;;  %v913_v28 = vrot.slane %v2780_v20, %v3060_v14  ;;  %v2782_v39 = vld [vmem:[%s4325_s1 + $0x6] ss:$8 sm:$0x3] }
 0x238   : > { %v3367_v41 = vpack.c.bf16 %v854_v22, %v852_v16  ;;  %v3369_v42 = vpack.c.bf16 %v855_v37, %v853_v21  ;;  %v867_v47 = vpop.permute.xlu0 %866  ;;  %v884_v51 = vmul.f32 %v877_v10, %v870_v27  ;;  %v885_v54 = vmul.f32 %v881_v19, %v868_v40 }
 0x239   : > { %v869_v52 = vsel %vm496_vm3, %v863_v29, %v867_v47  ;;  %v871_v53 = vsel %vm496_vm3, %v867_v47, %v863_v29  ;;  %v945_v21 = vrot.slane %v2781_v18, %v3058_v13  ;;  %v949_v22 = vrot.slane %v2781_v18, %v3060_v14 }
 0x23a   : > { %v886_v55 = vmul.f32 %v877_v10, %v871_v53  ;;  %v887_v56 = vmul.f32 %v881_v19, %v869_v52  ;;  %1147 = vmatprep.subr.bf16.mxu1 %v3369_v42  ;;  %1598 = vmatprep.subr.bf16.mxu0 %v3369_v42  ;;  %v897_v57 = vpop.permute.xlu1 %896  ;;  %v977_v52 = vrot.slane %v2782_v39, %v3058_v13 }
 0x23b   : > { %v900_v58 = vsel %vm530_vm4, %v893_v30, %v897_v57  ;;  %v902_v59 = vsel %vm530_vm4, %v897_v57, %v893_v30  ;;  %1148 = vmatpush1.bf16.msra.mxu1 %v3367_v41  ;;  %1599 = vmatpush1.bf16.msra.mxu0 %v3367_v41 }
 0x23c   : > { %v3385_v29 = vpack.c.bf16 %v886_v55, %v884_v51  ;;  %v3387_v60 = vpack.c.bf16 %v887_v56, %v885_v54  ;;  %v899_v61 = vpop.permute.xlu0 %898  ;;  %v916_v0 = vmul.f32 %v909_v50, %v902_v59  ;;  %v917_v10 = vmul.f32 %v913_v28, %v900_v58 }
 0x23d   : > { %v901_v3 = vsel %vm530_vm4, %v3311_v33, %v899_v61  ;;  %v903_v8 = vsel %vm530_vm4, %v899_v61, %v3311_v33 }
 0x23e   : > { %v918_v30 = vmul.f32 %v909_v50, %v903_v8  ;;  %v919_v16 = vmul.f32 %v913_v28, %v901_v3  ;;  %1149 = vmatprep.subr.bf16.mxu1 %v3387_v60  ;;  %1600 = vmatprep.subr.bf16.mxu0 %v3387_v60  ;;  %v993_v17 = vpop.permute.xlu1 %992 }
 0x23f   : > { %1150 = vmatpush1.bf16.msra.mxu1 %v3385_v29  ;;  %1601 = vmatpush1.bf16.msra.mxu0 %v3385_v29 }
 0x240   : > { %v3402_v19 = vpack.c.bf16 %v918_v30, %v916_v0  ;;  %v3404_v20 = vpack.c.bf16 %v919_v16, %v917_v10  ;;  %v995_v33 = vpop.permute.xlu0 %994  ;;  %v2783_v16 = vld [vmem:[%s4325_s1 + $0x7] ss:$8 sm:$0x3] }
 0x242   : > { %1151 = vmatprep.subr.bf16.mxu1 %v3404_v20  ;;  %1602 = vmatprep.subr.bf16.mxu0 %v3404_v20  ;;  %v933_v37 = vpop.permute.xlu1 %932 }
 0x243   : > { %v936_v40 = vsel %vm568_vm5, %v3313_v34, %v933_v37  ;;  %v938_v27 = vsel %vm568_vm5, %v933_v37, %v3313_v34  ;;  %1152 = vmatpush1.bf16.msra.mxu1 %v3402_v19  ;;  %1603 = vmatpush1.bf16.msra.mxu0 %v3402_v19  ;;  %v981_v34 = vrot.slane %v2782_v39, %v3060_v14  ;;  %v2784_v39 = vld [vmem:[%s4325_s1 + $0x10] ss:$8 sm:$0x3] }
 0x244   : > { %v935_v47 = vpop.permute.xlu0 %934  ;;  %1153 = vmatprep.subr.bf16.mxu1 %v3267_v15  ;;  %1604 = vmatprep.subr.bf16.mxu0 %v3267_v15  ;;  %v952_v53 = vmul.f32 %v945_v21, %v936_v40  ;;  %v953_v28 = vmul.f32 %v949_v22, %v938_v27  ;;  %v1009_v37 = vrot.slane %v2783_v16, %v3058_v13 }
 0x245   : > { %v937_v50 = vsel %vm568_vm5, %v3315_v35, %v935_v47  ;;  %v939_v51 = vsel %vm568_vm5, %v935_v47, %v3315_v35  ;;  %v1013_v40 = vrot.slane %v2783_v16, %v3060_v14 }
 0x246   : > { %v954_v54 = vmul.f32 %v945_v21, %v937_v50  ;;  %v955_v55 = vmul.f32 %v949_v22, %v939_v51  ;;  %v965_v56 = vpop.permute.xlu1 %964  ;;  %v2890_v50 = vld [vmem:[%s4328_s4] ss:$12 sps:$4 sm:$0xff]  }
 0x247   : > { %v968_v57 = vsel %vm602_vm6, %v3317_v36, %v965_v56  ;;  %v970_v58 = vsel %vm602_vm6, %v965_v56, %v3317_v36  ;;  %1154 = vmatpush1.bf16.msra.mxu1 %v3265_v11  ;;  %1605 = vmatpush1.bf16.msra.mxu0 %v3265_v11  ;;  %v2893_v51 = vld [vmem:[%s4330_s6] ss:$16 sps:$4 sm:$0xff]   ;;  %v1045_v56 = vrot.slane %v2784_v39, %v3060_v14 }
 0x248   : > { %v3439_v35 = vpack.c.bf16 %v954_v54, %v952_v53  ;;  %v3441_v59 = vpack.c.bf16 %v955_v55, %v953_v28  ;;  %v967_v61 = vpop.permute.xlu0 %966  ;;  %v984_v0 = vmul.f32 %v977_v52, %v968_v57  ;;  %v985_v10 = vmul.f32 %v981_v34, %v970_v58 }
 0x249   : > { %v969_v3 = vsel %vm602_vm6, %v3322_v38, %v967_v61  ;;  %v971_v8 = vsel %vm602_vm6, %v967_v61, %v3322_v38  ;;  %v1041_v53 = vrot.slane %v2784_v39, %v3058_v13 }
 0x24a   : > { %4350 = vst [vmem:[#allocation5_spill] sm:$0xff] %v3439_v35  ;;  %4351 = vst [vmem:[#allocation6_spill] sm:$0xff] %v3441_v59  ;;  %v986_v36 = vmul.f32 %v977_v52, %v969_v3  ;;  %v987_v30 = vmul.f32 %v981_v34, %v971_v8  ;;  %v997_v18 = vpop.permute.xlu1 %996  ;;  %1155 = vmatprep.subr.bf16.mxu1 %v3441_v59  ;;  %1606 = vmatprep.subr.bf16.mxu0 %v3441_v59 }
 0x24b   : > { %1156 = vmatpush1.bf16.msra.mxu1 %v3439_v35  ;;  %1607 = vmatpush1.bf16.msra.mxu0 %v3439_v35  ;;  %v1000_v27 = vsel %vm636_vm7, %v993_v17, %v997_v18  ;;  %v1002_v52 = vsel %vm636_vm7, %v997_v18, %v993_v17 }
 0x24c   : > { %v3456_v21 = vpack.c.bf16 %v986_v36, %v984_v0  ;;  %v3458_v22 = vpack.c.bf16 %v987_v30, %v985_v10  ;;  %v1027_v38 = vpop.permute.xlu0 %1026  ;;  %v1016_v28 = vmul.f32 %v1009_v37, %v1000_v27  ;;  %v1017_v57 = vmul.f32 %v1013_v40, %v1002_v52 }
 0x24e   : > { %4352 = vst [vmem:[#allocation7_spill] sm:$0xff] %v3456_v21  ;;  %4353 = vst [vmem:[#allocation8_spill] sm:$0xff] %v3458_v22  ;;  %v1025_v47 = vpop.permute.xlu1 %1024  ;;  %1157 = vmatprep.subr.bf16.mxu1 %v3458_v22  ;;  %1608 = vmatprep.subr.bf16.mxu0 %v3458_v22 }
 0x24f   : > { %1158 = vmatpush1.bf16.msra.mxu1 %v3456_v21  ;;  %1609 = vmatpush1.bf16.msra.mxu0 %v3456_v21 }
 0x250   : > { %v999_v34 = vpop.permute.xlu0 %998 }
 0x251   : > { %v1001_v54 = vsel %vm636_vm7, %v995_v33, %v999_v34  ;;  %v1003_v55 = vsel %vm636_vm7, %v999_v34, %v995_v33 }
 0x252   : > { %v1018_v58 = vmul.f32 %v1009_v37, %v1001_v54  ;;  %v1019_v61 = vmul.f32 %v1013_v40, %v1003_v55  ;;  %v1029_v17 = vpop.permute.xlu1 %1028  ;;  %1160 = vmatmul.mubr.bf16.vlgmr.msra.gmra.mrb[0].mxu1 %v2890_v50  ;;  %1611 = vmatmul.mubr.bf16.vlgmr.msra.gmra.mrb[4].mxu0 %v2893_v51  ;;  %v2897_v50 = vld [vmem:[%s4332_s8] ss:$20 sps:$4 sm:$0xff]  }
 0x253   : > { %v1032_v0 = vsel %vm670_vm8, %v1025_v47, %v1029_v17  ;;  %v1034_v3 = vsel %vm670_vm8, %v1029_v17, %v1025_v47  ;;  %1202 = vmatprep.mubr.bf16.mxu1 %v4337_v9  ;;  %v2899_v47 = vld [vmem:[%s4332_s8 + $0x4] ss:$20 sps:$4 sm:$0xff]  }
 0x254   : > { %v3490_v8 = vpack.c.bf16 %v1018_v58, %v1016_v28  ;;  %v3492_v10 = vpack.c.bf16 %v1019_v61, %v1017_v57  ;;  %v1031_v33 = vpop.permute.xlu0 %1030  ;;  %v1048_v36 = vmul.f32 %v1041_v53, %v1032_v0  ;;  %v1049_v18 = vmul.f32 %v1045_v56, %v1034_v3 }
 0x255   : > { %v1033_v30 = vsel %vm670_vm8, %v1027_v38, %v1031_v33  ;;  %v1035_v16 = vsel %vm670_vm8, %v1031_v33, %v1027_v38  ;;  %v2896_v38 = vld [vmem:[%s4328_s4 + $0x8] ss:$12 sps:$4 sm:$0xff]  }
 0x256   : > { %4354 = vst [vmem:[#allocation9_spill] sm:$0xff] %v3490_v8  ;;  %4355 = vst [vmem:[#allocation10_spill] sm:$0xff] %v3492_v10  ;;  %v1050_v37 = vmul.f32 %v1041_v53, %v1033_v30  ;;  %v1051_v39 = vmul.f32 %v1045_v56, %v1035_v16  ;;  %1170 = vmatprep.subr.bf16.mxu1 %v3492_v10  ;;  %1621 = vmatprep.subr.bf16.mxu0 %v3492_v10 }
 0x257   : > { %1171 = vmatpush1.bf16.msra.mxu1 %v3490_v8  ;;  %1622 = vmatpush1.bf16.msra.mxu0 %v3490_v8 }
 0x258   : > { %v3502_v40 = vpack.c.bf16 %v1050_v37, %v1048_v36  ;;  %v3504_v27 = vpack.c.bf16 %v1051_v39, %v1049_v18  ;;  %v2900_v39 = vld [vmem:[%s4330_s6 + $0xc] ss:$16 sps:$4 sm:$0xff]  }
 0x259   : > { %2800 = vmatprep.mubr.msk.bf16.mxu0 %vm1574_vm10, %v2900_v39 }
 0x25a   : > { %4356 = vst [vmem:[#allocation11_spill] sm:$0xff] %v3502_v40  ;;  %4357 = vst [vmem:[#allocation12_spill] sm:$0xff] %v3504_v27  ;;  %1172 = vmatprep.subr.bf16.mxu1 %v3504_v27  ;;  %1623 = vmatprep.subr.bf16.mxu0 %v3504_v27 }
 0x25b   : > { %1173 = vmatpush1.bf16.msra.mxu1 %v3502_v40  ;;  %1624 = vmatpush1.bf16.msra.mxu0 %v3502_v40 }
 0x25c   : > { %2055 = vmatprep.subr.bf16.mxu1 %v3081_v32 }
 0x25e   : > { %2788 = vmatmul.mubr.msk.bf16.vlgmr.msra.gmra.mrb[0].mxu1 %vm1123_vm13, %v2896_v38  ;;  %v1543_v38 = vld [vmem:[%s4331_s7] sm:$0xff] }
 0x25f   : > { %2056 = vmatpush1.bf16.msra.mxu1 %v3079_v31  ;;  %2087 = vmatprep.mubr.bf16.mxu1 %v2899_v47  ;;  %v1544_v47 = vld [vmem:[%s4331_s7 + $0x8] sm:$0xff] }
 0x260   : > { %2057 = vmatprep.subr.bf16.mxu1 %v3103_v49 }
 0x263   : > { %2058 = vmatpush1.bf16.msra.mxu1 %v3101_v48  ;;  %v1101_v51 = vpop.permute.xlu1 %1100 }
 0x264   : > { %2059 = vmatprep.subr.bf16.mxu1 %v3125_v2 }
 0x265   : > { %v1106_v28 = vpop.permute.xlu0 %1105 }
 0x267   : > { %2060 = vmatpush1.bf16.msra.mxu1 %v3123_v1 }
 0x268   : > { %2061 = vmatprep.subr.bf16.mxu1 %v3147_v25 }
 0x26b   : > { %2062 = vmatpush1.bf16.msra.mxu1 %v3145_v24 }
 0x26c   : > { %2063 = vmatprep.subr.bf16.mxu1 %v3021_v4 }
 0x26f   : > { %2064 = vmatpush1.bf16.msra.mxu1 %v3023_v5 }
 0x270   : > { %2065 = vmatprep.subr.bf16.mxu1 %v3173_v44 }
 0x273   : > { %2066 = vmatpush1.bf16.msra.mxu1 %v3171_v43 }
 0x274   : > { %2067 = vmatprep.subr.bf16.mxu1 %v3195_v63 }
 0x277   : > { %2068 = vmatpush1.bf16.msra.mxu1 %v3193_v62 }
 0x278   : > { %2069 = vmatprep.subr.bf16.mxu1 %v3217_v26 }
 0x27b   : > { %2070 = vmatpush1.bf16.msra.mxu1 %v3215_v23 }
 0x27c   : > { %2071 = vmatprep.subr.bf16.mxu1 %v3236_v46 }
 0x27f   : > { %2072 = vmatpush1.bf16.msra.mxu1 %v3234_v45 }
 0x280   : > { %2073 = vmatprep.subr.bf16.mxu1 %v3348_v7 }
 0x283   : > { %2074 = vmatpush1.bf16.msra.mxu1 %v3346_v6 }
 0x284   : > { %2075 = vmatprep.subr.bf16.mxu1 %v3369_v42 }
 0x287   : > { %2076 = vmatpush1.bf16.msra.mxu1 %v3367_v41 }
 0x288   : > { %2077 = vmatprep.subr.bf16.mxu1 %v3387_v60 }
 0x28b   : > { %2078 = vmatpush1.bf16.msra.mxu1 %v3385_v29 }
 0x28c   : > { %2079 = vmatprep.subr.bf16.mxu1 %v3404_v20 }
 0x28f   : > { %2080 = vmatpush1.bf16.msra.mxu1 %v3402_v19 }
 0x290   : > { %2081 = vmatprep.subr.bf16.mxu1 %v3267_v15 }
 0x293   : > { %2082 = vmatpush1.bf16.msra.mxu1 %v3265_v11 }
 0x294   : > { %2083 = vmatprep.subr.bf16.mxu1 %v3441_v59 }
 0x297   : > { %2084 = vmatpush1.bf16.msra.mxu1 %v3439_v35 }
 0x298   : > { %2085 = vmatprep.subr.bf16.mxu1 %v3458_v22 }
 0x29b   : > { %2086 = vmatpush1.bf16.msra.mxu1 %v3456_v21 }
 0x29c   : > { %2098 = vmatprep.subr.bf16.mxu1 %v3492_v10 }
 0x29e   : > { %2088 = vmatmul.mubr.bf16.vlgmr.msra.gmra.mrb[4].mxu1 %v2897_v50 }
 0x29f   : > { %2099 = vmatpush1.bf16.msra.mxu1 %v3490_v8  ;;  %v2790_v8 = vld [vmem:[%s4325_s1 + $0x2] ss:$8 sm:$0x3] }
 0x2a0   : > { %2100 = vmatprep.subr.bf16.mxu1 %v3504_v27 }
 0x2a3   : > { %2101 = vmatpush1.bf16.msra.mxu1 %v3502_v40 }
 0x331   : > { %v1204_v52 = vpop.f32.mrb[0].mxu1 }
 0x332   : > { %v2832_v34 = vadd.f32 %v1204_v52, %v1101_v51  ;;  %v1206_v53 = vpop.f32.mrb[1].mxu1 }
 0x333   : > { %v2833_v54 = vadd.f32 %v1206_v53, %v1101_v51  ;;  %v1208_v55 = vpop.f32.mrb[2].mxu1 }
 0x334   : > { %vm1213_vm14 = vcmp.gt.f32.partialorder %v2832_v34, 0.0  ;;  %v1217_v56 = vmul.f32 0.2, %v2832_v34  ;;  %v2834_v57 = vadd.f32 %v1208_v55, %v1106_v28  ;;  %v1210_v58 = vpop.f32.mrb[3].mxu1 }
 0x335   : > { %v1218_v61 = vmul.f32 0.2, %v2833_v54  ;;  %v2835_v17 = vadd.f32 %v1210_v58, %v1106_v28  ;;  %vm1214_vm15 = vcmp.gt.f32.partialorder %v2833_v54, 0.0 }
 0x336   : > { %v1221_v0 = vsel %vm1213_vm14, %v2832_v34, %v1217_v56  ;;  %vm1215_vm0 = vcmp.gt.f32.partialorder %v2834_v57, 0.0  ;;  %v1219_v3 = vmul.f32 0.2, %v2834_v57 }
 0x337   : > { %vm1216_vm9 = vcmp.gt.f32.partialorder %v2835_v17, 0.0  ;;  %v1220_v33 = vmul.f32 0.2, %v2835_v17  ;;  %1225 = vrot.lane.b32.xlu1 %v1221_v0, %s2921_s27  ;;  %v1222_v30 = vsel %vm1214_vm15, %v2833_v54, %v1218_v61  ;;  %vm2051_vm15 = vcmask 523264  }
 0x338   : > { %v1223_v36 = vsel %vm1215_vm0, %v2834_v57, %v1219_v3 }
 0x339   : > { %v1224_v16 = vsel %vm1216_vm9, %v2835_v17, %v1220_v33  ;;  %1227 = vrot.lane.b32.xlu0 %v1223_v36, %s2921_s27  ;;  %v3557_v18 = vpack.c.bf16 %v1223_v36, %v1221_v0 }
 0x33a   : > { %v3559_v37 = vpack.c.bf16 %v1224_v16, %v1222_v30 }
 0x33b   : > { %1257 = vrot.lane.b32.xlu1 %v1221_v0, %s2922_s28 }
 0x33d   : > { %1259 = vrot.lane.b32.xlu0 %v1223_v36, %s2922_s28 }
 0x33f   : > { %1289 = vrot.lane.b32.xlu1 %v1221_v0, %s2923_s29 }
 0x341   : > { %1291 = vrot.lane.b32.xlu0 %v1223_v36, %s2923_s29 }
 0x343   : > { %1321 = vrot.lane.b32.xlu1 %v1221_v0, %s2924_s30 }
 0x345   : > { %1323 = vrot.lane.b32.xlu0 %v1223_v36, %s2924_s30 }
 0x347   : > { %1357 = vrot.lane.b32.xlu1 %v1221_v0, %s2925_s13 }
 0x349   : > { %1359 = vrot.lane.b32.xlu0 %v1223_v36, %s2925_s13 }
 0x34b   : > { %1389 = vrot.lane.b32.xlu1 %v1221_v0, %s2926_s14 }
 0x34d   : > { %1391 = vrot.lane.b32.xlu0 %v1223_v36, %s2926_s14 }
 0x34f   : > { %1421 = vrot.lane.b32.xlu1 %v1221_v0, %s2927_s15 }
 0x351   : > { %1423 = vrot.lane.b32.xlu0 %v1223_v36, %s2927_s15 }
 0x353   : > { %1229 = vrot.lane.b32.xlu1 %v1222_v30, %s2921_s27 }
 0x355   : > { %1231 = vrot.lane.b32.xlu0 %v1224_v16, %s2921_s27 }
 0x357   : > { %1261 = vrot.lane.b32.xlu1 %v1222_v30, %s2922_s28 }
 0x359   : > { %1263 = vrot.lane.b32.xlu0 %v1224_v16, %s2922_s28 }
 0x35b   : > { %1293 = vrot.lane.b32.xlu1 %v1222_v30, %s2923_s29 }
 0x35d   : > { %1295 = vrot.lane.b32.xlu0 %v1224_v16, %s2923_s29 }
 0x35f   : > { %1325 = vrot.lane.b32.xlu1 %v1222_v30, %s2924_s30 }
 0x361   : > { %1327 = vrot.lane.b32.xlu0 %v1224_v16, %s2924_s30 }
 0x363   : > { %1453 = vrot.lane.b32.xlu1 %v1221_v0, %s2928_s18  ;;  %v1237_v0 = vld [vmem:[%s4325_s1] ss:$8 sm:$0x3] }
 0x364   : > { %v1242_v33 = vrot.slane %v1237_v0, %v3058_v13 }
 0x365   : > { %1455 = vrot.lane.b32.xlu0 %v1223_v36, %s2928_s18  ;;  %v1246_v36 = vrot.slane %v1237_v0, %v3060_v14 }
 0x367   : > { %1361 = vrot.lane.b32.xlu1 %v1222_v30, %s2925_s13 }
 0x369   : > { %1363 = vrot.lane.b32.xlu0 %v1224_v16, %s2925_s13 }
 0x36b   : > { %1393 = vrot.lane.b32.xlu1 %v1222_v30, %s2926_s14 }
 0x36d   : > { %1395 = vrot.lane.b32.xlu0 %v1224_v16, %s2926_s14 }
 0x36f   : > { %1425 = vrot.lane.b32.xlu1 %v1222_v30, %s2927_s15 }
 0x371   : > { %1427 = vrot.lane.b32.xlu0 %v1224_v16, %s2927_s15 }
 0x373   : > { %1457 = vrot.lane.b32.xlu1 %v1222_v30, %s2928_s18 }
 0x375   : > { %1459 = vrot.lane.b32.xlu0 %v1224_v16, %s2928_s18  ;;  %v2789_v16 = vld [vmem:[%s4325_s1 + $0x1] ss:$8 sm:$0x3] }
 0x376   : > { %v1274_v0 = vrot.slane %v2789_v16, %v3058_v13  ;;  %v1278_v27 = vrot.slane %v2789_v16, %v3060_v14  ;;  %v1306_v16 = vrot.slane %v2790_v8, %v3058_v13 }
 0x377   : > { %1547 = vperm.xlu1 %2886, %v1543_v38  }
 0x379   : > { %1552 = vperm.xlu0 %2885, %v1544_v47  }
 0x3a9   : > { %v1226_v50 = vpop.permute.xlu1 %1225 }
 0x3ab   : > { %v1228_v51 = vpop.permute.xlu0 %1227 }
 0x3ad   : > { %v1258_v52 = vpop.permute.xlu1 %1257 }
 0x3af   : > { %v1260_v34 = vpop.permute.xlu0 %1259 }
 0x3b1   : > { %v1290_v53 = vpop.permute.xlu1 %1289 }
 0x3b3   : > { %v1292_v28 = vpop.permute.xlu0 %1291 }
 0x3b5   : > { %v3600_v54 = vpop.permute.xlu1 %1321 }
 0x3b7   : > { %v3602_v55 = vpop.permute.xlu0 %1323 }
 0x3b9   : > { %v3604_v56 = vpop.permute.xlu1 %1357 }
 0x3bb   : > { %v3606_v57 = vpop.permute.xlu0 %1359 }
 0x3bd   : > { %v3608_v58 = vpop.permute.xlu1 %1389 }
 0x3bf   : > { %v3610_v61 = vpop.permute.xlu0 %1391 }
 0x3c1   : > { %v3612_v17 = vpop.permute.xlu1 %1421 }
 0x3c3   : > { %v3617_v3 = vpop.permute.xlu0 %1423 }
 0x3c5   : > { %v1230_v30 = vpop.permute.xlu1 %1229 }
 0x3c6   : > { %v1233_v39 = vsel %vm429_vm1, %v1226_v50, %v1230_v30  ;;  %v1235_v38 = vsel %vm429_vm1, %v1230_v30, %v1226_v50 }
 0x3c7   : > { %v1232_v47 = vpop.permute.xlu0 %1231  ;;  %v1249_v10 = vmul.f32 %v1242_v33, %v1235_v38  ;;  %v1250_v21 = vmul.f32 %v1246_v36, %v1233_v39 }
 0x3c8   : > { %v1234_v9 = vsel %vm429_vm1, %v1228_v51, %v1232_v47  ;;  %v1236_v40 = vsel %vm429_vm1, %v1232_v47, %v1228_v51 }
 0x3c9   : > { %v1251_v22 = vmul.f32 %v1242_v33, %v1236_v40  ;;  %v1252_v35 = vmul.f32 %v1246_v36, %v1234_v9  ;;  %v1262_v50 = vpop.permute.xlu1 %1261  ;;  %v1310_v40 = vrot.slane %v2790_v8, %v3060_v14 }
 0x3ca   : > { %v1265_v30 = vsel %vm462_vm2, %v1258_v52, %v1262_v50  ;;  %v1267_v59 = vsel %vm462_vm2, %v1262_v50, %v1258_v52  ;;  %v2791_v52 = vld [vmem:[%s4325_s1 + $0x3] ss:$8 sm:$0x3] }
 0x3cb   : > { %v3641_v51 = vpack.c.bf16 %v1251_v22, %v1249_v10  ;;  %v1264_v47 = vpop.permute.xlu0 %1263  ;;  %v3643_v11 = vpack.c.bf16 %v1252_v35, %v1250_v21  ;;  %v1281_v15 = vmul.f32 %v1274_v0, %v1267_v59  ;;  %v1282_v22 = vmul.f32 %v1278_v27, %v1265_v30 }
 0x3cc   : > { %v1266_v39 = vsel %vm462_vm2, %v1260_v34, %v1264_v47  ;;  %v1268_v9 = vsel %vm462_vm2, %v1264_v47, %v1260_v34 }
 0x3cd   : > { %v1283_v10 = vmul.f32 %v1274_v0, %v1268_v9  ;;  %v1284_v33 = vmul.f32 %v1278_v27, %v1266_v39  ;;  %1625 = vmatprep.subr.bf16.mxu0 %v3643_v11  ;;  %2102 = vmatprep.subr.bf16.mxu1 %v3643_v11  ;;  %v1294_v35 = vpop.permute.xlu1 %1293  ;;  %v1338_v27 = vrot.slane %v2791_v52, %v3058_v13 }
 0x3ce   : > { %v1297_v59 = vsel %vm496_vm3, %v1290_v53, %v1294_v35  ;;  %v1299_v21 = vsel %vm496_vm3, %v1294_v35, %v1290_v53  ;;  %1626 = vmatpush1.bf16.msra.mxu0 %v3641_v51  ;;  %2103 = vmatpush1.bf16.msra.mxu1 %v3641_v51  ;;  %v1342_v53 = vrot.slane %v2791_v52, %v3060_v14 }
 0x3cf   : > { %v3662_v8 = vpack.c.bf16 %v1283_v10, %v1281_v15  ;;  %v1296_v34 = vpop.permute.xlu0 %1295  ;;  %v3664_v36 = vpack.c.bf16 %v1284_v33, %v1282_v22  ;;  %v1313_v38 = vmul.f32 %v1306_v16, %v1299_v21  ;;  %v1314_v30 = vmul.f32 %v1310_v40, %v1297_v59 }
 0x3d0   : > { %v1298_v0 = vsel %vm496_vm3, %v1292_v28, %v1296_v34  ;;  %v1300_v50 = vsel %vm496_vm3, %v1296_v34, %v1292_v28  ;;  %v2792_v34 = vld [vmem:[%s4325_s1 + $0x5] ss:$8 sm:$0x3] }
 0x3d1   : > { %v1315_v47 = vmul.f32 %v1306_v16, %v1300_v50  ;;  %v1316_v39 = vmul.f32 %v1310_v40, %v1298_v0  ;;  %1627 = vmatprep.subr.bf16.mxu0 %v3664_v36  ;;  %2104 = vmatprep.subr.bf16.mxu1 %v3664_v36  ;;  %v1326_v15 = vpop.permute.xlu1 %1325  ;;  %v1374_v0 = vrot.slane %v2792_v34, %v3058_v13 }
 0x3d2   : > { %v1329_v9 = vsel %vm530_vm4, %v3600_v54, %v1326_v15  ;;  %v1331_v22 = vsel %vm530_vm4, %v1326_v15, %v3600_v54  ;;  %1628 = vmatpush1.bf16.msra.mxu0 %v3662_v8  ;;  %2105 = vmatpush1.bf16.msra.mxu1 %v3662_v8  ;;  %v1378_v50 = vrot.slane %v2792_v34, %v3060_v14 }
 0x3d3   : > { %v3682_v28 = vpack.c.bf16 %v1315_v47, %v1313_v38  ;;  %v1328_v16 = vpop.permute.xlu0 %1327  ;;  %v3684_v40 = vpack.c.bf16 %v1316_v39, %v1314_v30  ;;  %v1345_v52 = vmul.f32 %v1338_v27, %v1331_v22  ;;  %v1346_v35 = vmul.f32 %v1342_v53, %v1329_v9  ;;  %v2793_v30 = vld [vmem:[%s4325_s1 + $0x6] ss:$8 sm:$0x3] }
 0x3d4   : > { %v1330_v10 = vsel %vm530_vm4, %v3602_v55, %v1328_v16  ;;  %v1332_v33 = vsel %vm530_vm4, %v1328_v16, %v3602_v55  ;;  %v1406_v16 = vrot.slane %v2793_v30, %v3058_v13 }
 0x3d5   : > { %v1347_v54 = vmul.f32 %v1338_v27, %v1332_v33  ;;  %v1348_v59 = vmul.f32 %v1342_v53, %v1330_v10  ;;  %1629 = vmatprep.subr.bf16.mxu0 %v3684_v40  ;;  %2106 = vmatprep.subr.bf16.mxu1 %v3684_v40  ;;  %v3694_v21 = vpop.permute.xlu1 %1453 }
 0x3d6   : > { %1630 = vmatpush1.bf16.msra.mxu0 %v3682_v28  ;;  %2107 = vmatpush1.bf16.msra.mxu1 %v3682_v28 }
 0x3d7   : > { %v3701_v38 = vpack.c.bf16 %v1347_v54, %v1345_v52  ;;  %v3703_v55 = vpop.permute.xlu0 %1455  ;;  %v3705_v27 = vpack.c.bf16 %v1348_v59, %v1346_v35  ;;  %v2794_v52 = vld [vmem:[%s4325_s1 + $0x7] ss:$8 sm:$0x3] }
 0x3d9   : > { %1631 = vmatprep.subr.bf16.mxu0 %v3705_v27  ;;  %2108 = vmatprep.subr.bf16.mxu1 %v3705_v27  ;;  %v1362_v53 = vpop.permute.xlu1 %1361 }
 0x3da   : > { %v1365_v47 = vsel %vm568_vm5, %v3604_v56, %v1362_v53  ;;  %v1367_v39 = vsel %vm568_vm5, %v1362_v53, %v3604_v56  ;;  %1632 = vmatpush1.bf16.msra.mxu0 %v3701_v38  ;;  %2109 = vmatpush1.bf16.msra.mxu1 %v3701_v38  ;;  %v1410_v56 = vrot.slane %v2793_v30, %v3060_v14 }
 0x3db   : > { %v1364_v15 = vpop.permute.xlu0 %1363  ;;  %1633 = vmatprep.subr.bf16.mxu0 %v3559_v37  ;;  %2110 = vmatprep.subr.bf16.mxu1 %v3559_v37  ;;  %v1381_v10 = vmul.f32 %v1374_v0, %v1365_v47  ;;  %v1382_v33 = vmul.f32 %v1378_v50, %v1367_v39  ;;  %v1438_v47 = vrot.slane %v2794_v52, %v3058_v13 }
 0x3dc   : > { %v1366_v9 = vsel %vm568_vm5, %v3606_v57, %v1364_v15  ;;  %v1368_v22 = vsel %vm568_vm5, %v1364_v15, %v3606_v57  ;;  %v1442_v15 = vrot.slane %v2794_v52, %v3060_v14 }
 0x3dd   : > { %v1383_v35 = vmul.f32 %v1374_v0, %v1366_v9  ;;  %v1384_v54 = vmul.f32 %v1378_v50, %v1368_v22  ;;  %v1394_v59 = vpop.permute.xlu1 %1393  ;;  %v2795_v9 = vld [vmem:[%s4325_s1 + $0x10] ss:$8 sm:$0x3] }
 0x3de   : > { %v1397_v34 = vsel %vm602_vm6, %v3608_v58, %v1394_v59  ;;  %v1399_v57 = vsel %vm602_vm6, %v1394_v59, %v3608_v58  ;;  %1634 = vmatpush1.bf16.msra.mxu0 %v3557_v18  ;;  %2111 = vmatpush1.bf16.msra.mxu1 %v3557_v18 }
 0x3df   : > { %v3743_v53 = vpack.c.bf16 %v1383_v35, %v1381_v10  ;;  %v1396_v30 = vpop.permute.xlu0 %1395  ;;  %v3746_v0 = vpack.c.bf16 %v1384_v54, %v1382_v33  ;;  %v1413_v50 = vmul.f32 %v1406_v16, %v1397_v34  ;;  %v1414_v22 = vmul.f32 %v1410_v56, %v1399_v57 }
 0x3e0   : > { %v1398_v39 = vsel %vm602_vm6, %v3610_v61, %v1396_v30  ;;  %v1400_v58 = vsel %vm602_vm6, %v1396_v30, %v3610_v61  ;;  %v1474_v30 = vrot.slane %v2795_v9, %v3060_v14 }
 0x3e1   : > { %v1415_v10 = vmul.f32 %v1406_v16, %v1398_v39  ;;  %v1416_v35 = vmul.f32 %v1410_v56, %v1400_v58  ;;  %v1426_v33 = vpop.permute.xlu1 %1425  ;;  %1635 = vmatprep.subr.bf16.mxu0 %v3746_v0  ;;  %2112 = vmatprep.subr.bf16.mxu1 %v3746_v0  ;;  %v1470_v56 = vrot.slane %v2795_v9, %v3058_v13 }
 0x3e2   : > { %v1429_v54 = vsel %vm636_vm7, %v3612_v17, %v1426_v33  ;;  %v1431_v61 = vsel %vm636_vm7, %v1426_v33, %v3612_v17  ;;  %1636 = vmatpush1.bf16.msra.mxu0 %v3743_v53  ;;  %2113 = vmatpush1.bf16.msra.mxu1 %v3743_v53 }
 0x3e3   : > { %v3768_v52 = vpack.c.bf16 %v1415_v10, %v1413_v50  ;;  %v1428_v16 = vpop.permute.xlu0 %1427  ;;  %v3771_v59 = vpack.c.bf16 %v1416_v35, %v1414_v22  ;;  %v1445_v34 = vmul.f32 %v1438_v47, %v1429_v54  ;;  %v1446_v39 = vmul.f32 %v1442_v15, %v1431_v61 }
 0x3e4   : > { %v1430_v57 = vsel %vm636_vm7, %v3617_v3, %v1428_v16  ;;  %v1432_v17 = vsel %vm636_vm7, %v1428_v16, %v3617_v3 }
 0x3e5   : > { %v1447_v58 = vmul.f32 %v1438_v47, %v1430_v57  ;;  %v1448_v50 = vmul.f32 %v1442_v15, %v1432_v17  ;;  %v1458_v10 = vpop.permute.xlu1 %1457  ;;  %1637 = vmatprep.subr.bf16.mxu0 %v3771_v59  ;;  %2114 = vmatprep.subr.bf16.mxu1 %v3771_v59  ;;  %v2456_v17 = vld [vmem:[%s4334_s10] sm:$0xff] }
 0x3e6   : > { %v1461_v22 = vsel %vm670_vm8, %v3694_v21, %v1458_v10  ;;  %v1463_v35 = vsel %vm670_vm8, %v1458_v10, %v3694_v21  ;;  %1638 = vmatpush1.bf16.msra.mxu0 %v3768_v52  ;;  %2115 = vmatpush1.bf16.msra.mxu1 %v3768_v52 }
 0x3e7   : > { %v3790_v3 = vpack.c.bf16 %v1447_v58, %v1445_v34  ;;  %v1460_v47 = vpop.permute.xlu0 %1459  ;;  %v3792_v15 = vpack.c.bf16 %v1448_v50, %v1446_v39  ;;  %v1477_v9 = vmul.f32 %v1470_v56, %v1461_v22  ;;  %v1478_v61 = vmul.f32 %v1474_v30, %v1463_v35 }
 0x3e8   : > { %v1462_v33 = vsel %vm670_vm8, %v3703_v55, %v1460_v47  ;;  %v1464_v54 = vsel %vm670_vm8, %v1460_v47, %v3703_v55  ;;  %v2902_v55 = vld [vmem:[%s4330_s6 + $0x8] ss:$16 sps:$4 sm:$0xff]  }
 0x3e9   : > { %v1479_v21 = vmul.f32 %v1470_v56, %v1462_v33  ;;  %v1480_v16 = vmul.f32 %v1474_v30, %v1464_v54  ;;  %1639 = vmatprep.subr.bf16.mxu0 %v3792_v15  ;;  %2116 = vmatprep.subr.bf16.mxu1 %v3792_v15  ;;  %v2822_v56 = vcombine.high %v2456_v17, %v2456_v17 }
 0x3ea   : > { %1640 = vmatpush1.bf16.msra.mxu0 %v3790_v3  ;;  %2117 = vmatpush1.bf16.msra.mxu1 %v3790_v3 }
 0x3eb   : > { %v3804_v34 = vpack.c.bf16 %v1479_v21, %v1477_v9  ;;  %v3806_v57 = vpack.c.bf16 %v1480_v16, %v1478_v61  ;;  %v2801_v21 = vld [vmem:[%s4325_s1 + $0x1] ss:$8 sm:$0x3] }
 0x3ed   : > { %1641 = vmatprep.subr.bf16.mxu0 %v3806_v57  ;;  %2118 = vmatprep.subr.bf16.mxu1 %v3806_v57 }
 0x3ee   : > { %1642 = vmatpush1.bf16.msra.mxu0 %v3804_v34  ;;  %2119 = vmatpush1.bf16.msra.mxu1 %v3804_v34 }
 0x3ef   : > { %2579 = vmatprep.subr.bf16.mxu0 %v3081_v32  ;;  %v4361_v32 = vld [vmem:[#allocation5_spill] sm:$0xff] }
 0x3f1   : > { %1654 = vmatmul.mubr.bf16.vlgmr.msra.gmra.mrb[4].mxu0 %v2902_v55 }
 0x3f2   : > { %2580 = vmatpush1.bf16.msra.mxu0 %v3079_v31  ;;  %2611 = vmatprep.mubr.bf16.mxu0 %v2822_v56  ;;  %v4360_v31 = vld [vmem:[#allocation6_spill] sm:$0xff]  ;;  %v1725_v56 = vrot.slane %v2801_v21, %v3058_v13 }
 0x3f3   : > { %2581 = vmatprep.subr.bf16.mxu0 %v3103_v49  ;;  %v2821_v49 = vcombine.low %v2456_v17, %v2456_v17 }
 0x3f6   : > { %2582 = vmatpush1.bf16.msra.mxu0 %v3101_v48  ;;  %v4362_v48 = vld [vmem:[#allocation8_spill] sm:$0xff] }
 0x3f7   : > { %2583 = vmatprep.subr.bf16.mxu0 %v3125_v2  ;;  %v4364_v2 = vld [vmem:[#allocation10_spill] sm:$0xff] }
 0x3fa   : > { %2584 = vmatpush1.bf16.msra.mxu0 %v3123_v1  ;;  %v4363_v1 = vld [vmem:[#allocation7_spill] sm:$0xff] }
 0x3fb   : > { %2585 = vmatprep.subr.bf16.mxu0 %v3147_v25  ;;  %v4366_v25 = vld [vmem:[#allocation12_spill] sm:$0xff] }
 0x3fe   : > { %2586 = vmatpush1.bf16.msra.mxu0 %v3145_v24  ;;  %v4365_v24 = vld [vmem:[#allocation9_spill] sm:$0xff] }
 0x3ff   : > { %2587 = vmatprep.subr.bf16.mxu0 %v3021_v4  ;;  %v4358_v4 = vld [vmem:[#allocation4_spill] sm:$0xff] }
 0x402   : > { %2588 = vmatpush1.bf16.msra.mxu0 %v3023_v5  ;;  %v4359_v5 = vld [vmem:[#allocation3_spill] sm:$0xff] }
 0x403   : > { %2589 = vmatprep.subr.bf16.mxu0 %v3173_v44  ;;  %v1548_v44 = vpop.permute.xlu1 %1547 }
 0x406   : > { %2590 = vmatpush1.bf16.msra.mxu0 %v3171_v43  ;;  %v4367_v43 = vld [vmem:[#allocation11_spill] sm:$0xff] }
 0x407   : > { %2591 = vmatprep.subr.bf16.mxu0 %v3195_v63 }
 0x40a   : > { %2592 = vmatpush1.bf16.msra.mxu0 %v3193_v62 }
 0x40b   : > { %2593 = vmatprep.subr.bf16.mxu0 %v3217_v26  ;;  %v1553_v26 = vpop.permute.xlu0 %1552 }
 0x40e   : > { %2594 = vmatpush1.bf16.msra.mxu0 %v3215_v23 }
 0x40f   : > { %2595 = vmatprep.subr.bf16.mxu0 %v3236_v46 }
 0x412   : > { %2596 = vmatpush1.bf16.msra.mxu0 %v3234_v45 }
 0x413   : > { %2597 = vmatprep.subr.bf16.mxu0 %v3348_v7 }
 0x416   : > { %2598 = vmatpush1.bf16.msra.mxu0 %v3346_v6 }
 0x417   : > { %2599 = vmatprep.subr.bf16.mxu0 %v3369_v42 }
 0x41a   : > { %2600 = vmatpush1.bf16.msra.mxu0 %v3367_v41 }
 0x41b   : > { %2601 = vmatprep.subr.bf16.mxu0 %v3387_v60 }
 0x41e   : > { %2602 = vmatpush1.bf16.msra.mxu0 %v3385_v29 }
 0x41f   : > { %2603 = vmatprep.subr.bf16.mxu0 %v3404_v20 }
 0x422   : > { %2604 = vmatpush1.bf16.msra.mxu0 %v3402_v19 }
 0x423   : > { %2605 = vmatprep.subr.bf16.mxu0 %v4358_v4  ;;  %v1729_v4 = vrot.slane %v2801_v21, %v3060_v14 }
 0x426   : > { %2606 = vmatpush1.bf16.msra.mxu0 %v4359_v5  ;;  %v2802_v5 = vld [vmem:[%s4325_s1 + $0x2] ss:$8 sm:$0x3] }
 0x427   : > { %2607 = vmatprep.subr.bf16.mxu0 %v4360_v31 }
 0x42a   : > { %2608 = vmatpush1.bf16.msra.mxu0 %v4361_v32 }
 0x42b   : > { %2609 = vmatprep.subr.bf16.mxu0 %v4362_v48 }
 0x42e   : > { %2610 = vmatpush1.bf16.msra.mxu0 %v4363_v1 }
 0x42f   : > { %2620 = vmatprep.subr.bf16.mxu0 %v4364_v2 }
 0x431   : > { %2612 = vmatmul.mubr.bf16.vlgmr.msra.gmra.mrb[8].mxu0 %v2821_v49 }
 0x432   : > { %2621 = vmatpush1.bf16.msra.mxu0 %v4365_v24 }
 0x433   : > { %2622 = vmatprep.subr.bf16.mxu0 %v4366_v25 }
 0x436   : > { %2623 = vmatpush1.bf16.msra.mxu0 %v4367_v43 }
 0x437   : > { %2624 = vmatprep.subr.bf16.mxu0 %v3643_v11 }
 0x43a   : > { %2625 = vmatpush1.bf16.msra.mxu0 %v3641_v51 }
 0x43b   : > { %2626 = vmatprep.subr.bf16.mxu0 %v3664_v36  ;;  %v2907_v36 = vld [vmem:[%s4332_s8 + $0xc] ss:$20 sps:$4 sm:$0xff]  }
 0x43c   : > { %2130 = vmatprep.mubr.bf16.mxu1 %v2907_v36 }
 0x43e   : > { %2627 = vmatpush1.bf16.msra.mxu0 %v3662_v8 }
 0x43f   : > { %2628 = vmatprep.subr.bf16.mxu0 %v3684_v40  ;;  %v2015_v40 = vld [vmem:[%s4333_s9 + $0x8] sm:$0xff] }
 0x442   : > { %2629 = vmatpush1.bf16.msra.mxu0 %v3682_v28  ;;  %v2014_v28 = vld [vmem:[%s4333_s9] sm:$0xff] }
 0x443   : > { %2630 = vmatprep.subr.bf16.mxu0 %v3705_v27 }
 0x446   : > { %2631 = vmatpush1.bf16.msra.mxu0 %v3701_v38  ;;  %v3920_v38 = vld [vmem:[%s4334_s10 + $0x8] sm:$0xff] }
 0x447   : > { %2632 = vmatprep.subr.bf16.mxu0 %v3559_v37  ;;  %v2824_v27 = vcombine.high %v3920_v38, %v3920_v38 }
 0x449   : > { %2652 = vmatprep.mubr.bf16.mxu0 %v2824_v27 }
 0x44a   : > { %2633 = vmatpush1.bf16.msra.mxu0 %v3557_v18 }
 0x44b   : > { %2634 = vmatprep.subr.bf16.mxu0 %v3746_v0 }
 0x44e   : > { %2635 = vmatpush1.bf16.msra.mxu0 %v3743_v53 }
 0x44f   : > { %2636 = vmatprep.subr.bf16.mxu0 %v3771_v59 }
 0x452   : > { %2637 = vmatpush1.bf16.msra.mxu0 %v3768_v52 }
 0x453   : > { %2638 = vmatprep.subr.bf16.mxu0 %v3792_v15  ;;  %v1688_v15 = vld [vmem:[%s4325_s1] ss:$8 sm:$0x3] }
 0x454   : > { %v1693_v33 = vrot.slane %v1688_v15, %v3058_v13  ;;  %v1697_v54 = vrot.slane %v1688_v15, %v3060_v14 }
 0x456   : > { %2639 = vmatpush1.bf16.msra.mxu0 %v3790_v3 }
 0x457   : > { %2640 = vmatprep.subr.bf16.mxu0 %v3806_v57 }
 0x45a   : > { %2641 = vmatpush1.bf16.msra.mxu0 %v3804_v34 }
 0x4c4   : > { %v1655_v62 = vpop.f32.mrb[4].mxu0 }
 0x4c5   : > { %v2836_v63 = vadd.f32 %v1655_v62, %v1548_v44  ;;  %v1657_v23 = vpop.f32.mrb[5].mxu0  ;;  %v1757_v62 = vrot.slane %v2802_v5, %v3058_v13 }
 0x4c6   : > { %v2837_v45 = vadd.f32 %v1657_v23, %v1548_v44  ;;  %v1659_v46 = vpop.f32.mrb[6].mxu0 }
 0x4c7   : > { %vm1664_vm11 = vcmp.gt.f32.partialorder %v2836_v63, 0.0  ;;  %v1668_v11 = vmul.f32 0.2, %v2836_v63  ;;  %v2838_v6 = vadd.f32 %v1659_v46, %v1553_v26  ;;  %v1661_v7 = vpop.f32.mrb[7].mxu0 }
 0x4c8   : > { %v1669_v41 = vmul.f32 0.2, %v2837_v45  ;;  %v2839_v42 = vadd.f32 %v1661_v7, %v1553_v26  ;;  %vm1665_vm12 = vcmp.gt.f32.partialorder %v2837_v45, 0.0  ;;  %v2803_v46 = vld [vmem:[%s4325_s1 + $0x3] ss:$8 sm:$0x3] }
 0x4c9   : > { %v1672_v29 = vsel %vm1664_vm11, %v2836_v63, %v1668_v11  ;;  %vm1666_vm13 = vcmp.gt.f32.partialorder %v2838_v6, 0.0  ;;  %v1670_v60 = vmul.f32 0.2, %v2838_v6 }
 0x4ca   : > { %vm1667_vm14 = vcmp.gt.f32.partialorder %v2839_v42, 0.0  ;;  %v1671_v19 = vmul.f32 0.2, %v2839_v42  ;;  %1676 = vrot.lane.b32.xlu1 %v1672_v29, %s2921_s27  ;;  %v1673_v18 = vsel %vm1665_vm12, %v2837_v45, %v1669_v41  ;;  %v1761_v45 = vrot.slane %v2802_v5, %v3060_v14 }
 0x4cb   : > { %v1674_v20 = vsel %vm1666_vm13, %v2838_v6, %v1670_v60  ;;  %vm2575_vm12 = vcmask 654336  }
 0x4cc   : > { %v1675_v37 = vsel %vm1667_vm14, %v2839_v42, %v1671_v19  ;;  %1678 = vrot.lane.b32.xlu0 %v1674_v20, %s2921_s27  ;;  %v3874_v51 = vpack.c.bf16 %v1674_v20, %v1672_v29 }
 0x4cd   : > { %v3876_v8 = vpack.c.bf16 %v1675_v37, %v1673_v18 }
 0x4ce   : > { %1708 = vrot.lane.b32.xlu1 %v1672_v29, %s2922_s28 }
 0x4d0   : > { %1710 = vrot.lane.b32.xlu0 %v1674_v20, %s2922_s28 }
 0x4d2   : > { %1740 = vrot.lane.b32.xlu1 %v1672_v29, %s2923_s29 }
 0x4d4   : > { %1742 = vrot.lane.b32.xlu0 %v1674_v20, %s2923_s29 }
 0x4d6   : > { %1772 = vrot.lane.b32.xlu1 %v1672_v29, %s2924_s30 }
 0x4d8   : > { %1774 = vrot.lane.b32.xlu0 %v1674_v20, %s2924_s30 }
 0x4da   : > { %1808 = vrot.lane.b32.xlu1 %v1672_v29, %s2925_s13 }
 0x4dc   : > { %1810 = vrot.lane.b32.xlu0 %v1674_v20, %s2925_s13 }
 0x4de   : > { %1840 = vrot.lane.b32.xlu1 %v1672_v29, %s2926_s14 }
 0x4e0   : > { %1842 = vrot.lane.b32.xlu0 %v1674_v20, %s2926_s14 }
 0x4e2   : > { %1872 = vrot.lane.b32.xlu1 %v1672_v29, %s2927_s15 }
 0x4e4   : > { %1874 = vrot.lane.b32.xlu0 %v1674_v20, %s2927_s15 }
 0x4e6   : > { %1680 = vrot.lane.b32.xlu1 %v1673_v18, %s2921_s27 }
 0x4e8   : > { %1682 = vrot.lane.b32.xlu0 %v1675_v37, %s2921_s27 }
 0x4ea   : > { %1712 = vrot.lane.b32.xlu1 %v1673_v18, %s2922_s28 }
 0x4ec   : > { %1714 = vrot.lane.b32.xlu0 %v1675_v37, %s2922_s28 }
 0x4ee   : > { %1744 = vrot.lane.b32.xlu1 %v1673_v18, %s2923_s29 }
 0x4f0   : > { %1746 = vrot.lane.b32.xlu0 %v1675_v37, %s2923_s29 }
 0x4f2   : > { %1776 = vrot.lane.b32.xlu1 %v1673_v18, %s2924_s30 }
 0x4f4   : > { %1778 = vrot.lane.b32.xlu0 %v1675_v37, %s2924_s30 }
 0x4f6   : > { %1904 = vrot.lane.b32.xlu1 %v1672_v29, %s2928_s18 }
 0x4f8   : > { %1906 = vrot.lane.b32.xlu0 %v1674_v20, %s2928_s18 }
 0x4fa   : > { %1812 = vrot.lane.b32.xlu1 %v1673_v18, %s2925_s13 }
 0x4fc   : > { %1814 = vrot.lane.b32.xlu0 %v1675_v37, %s2925_s13 }
 0x4fe   : > { %1844 = vrot.lane.b32.xlu1 %v1673_v18, %s2926_s14 }
 0x500   : > { %1846 = vrot.lane.b32.xlu0 %v1675_v37, %s2926_s14 }
 0x502   : > { %1876 = vrot.lane.b32.xlu1 %v1673_v18, %s2927_s15 }
 0x504   : > { %1878 = vrot.lane.b32.xlu0 %v1675_v37, %s2927_s15 }
 0x506   : > { %1908 = vrot.lane.b32.xlu1 %v1673_v18, %s2928_s18  ;;  %v1789_v18 = vrot.slane %v2803_v46, %v3058_v13 }
 0x508   : > { %1910 = vrot.lane.b32.xlu0 %v1675_v37, %s2928_s18 }
 0x50a   : > { %2018 = vperm.xlu1 %2886, %v2014_v28  }
 0x50c   : > { %2023 = vperm.xlu0 %2885, %v2015_v40   ;;  %v1793_v40 = vrot.slane %v2803_v46, %v3060_v14 }
 0x53c   : > { %v1677_v53 = vpop.permute.xlu1 %1676 }
 0x53e   : > { %v1679_v0 = vpop.permute.xlu0 %1678 }
 0x540   : > { %v1709_v52 = vpop.permute.xlu1 %1708 }
 0x542   : > { %v1711_v59 = vpop.permute.xlu0 %1710 }
 0x544   : > { %v1741_v30 = vpop.permute.xlu1 %1740 }
 0x546   : > { %v1743_v39 = vpop.permute.xlu0 %1742 }
 0x548   : > { %v3924_v58 = vpop.permute.xlu1 %1772 }
 0x54a   : > { %v3926_v50 = vpop.permute.xlu0 %1774 }
 0x54c   : > { %v3928_v10 = vpop.permute.xlu1 %1808 }
 0x54e   : > { %v3930_v22 = vpop.permute.xlu0 %1810 }
 0x550   : > { %v3932_v35 = vpop.permute.xlu1 %1840 }
 0x552   : > { %v3934_v3 = vpop.permute.xlu0 %1842 }
 0x554   : > { %v3936_v47 = vpop.permute.xlu1 %1872 }
 0x556   : > { %v3941_v9 = vpop.permute.xlu0 %1874 }
 0x558   : > { %v1681_v61 = vpop.permute.xlu1 %1680 }
 0x559   : > { %v1684_v16 = vsel %vm429_vm1, %v1677_v53, %v1681_v61  ;;  %v1686_v34 = vsel %vm429_vm1, %v1681_v61, %v1677_v53 }
 0x55a   : > { %v1683_v57 = vpop.permute.xlu0 %1682  ;;  %v1700_v31 = vmul.f32 %v1693_v33, %v1686_v34  ;;  %v1701_v32 = vmul.f32 %v1697_v54, %v1684_v16 }
 0x55b   : > { %v1685_v17 = vsel %vm429_vm1, %v1679_v0, %v1683_v57  ;;  %v1687_v55 = vsel %vm429_vm1, %v1683_v57, %v1679_v0 }
 0x55c   : > { %v1702_v48 = vmul.f32 %v1693_v33, %v1687_v55  ;;  %v1703_v49 = vmul.f32 %v1697_v54, %v1685_v17  ;;  %v1713_v1 = vpop.permute.xlu1 %1712  ;;  %v2804_v17 = vld [vmem:[%s4325_s1 + $0x5] ss:$8 sm:$0x3] }
 0x55d   : > { %v1716_v2 = vsel %vm462_vm2, %v1709_v52, %v1713_v1  ;;  %v1718_v24 = vsel %vm462_vm2, %v1713_v1, %v1709_v52  ;;  %v1829_v5 = vrot.slane %v2804_v17, %v3060_v14 }
 0x55e   : > { %v1704_v25 = vpack.c.bf16 %v1702_v48, %v1700_v31  ;;  %v1715_v43 = vpop.permute.xlu0 %1714  ;;  %v1705_v44 = vpack.c.bf16 %v1703_v49, %v1701_v32  ;;  %v1732_v63 = vmul.f32 %v1725_v56, %v1718_v24  ;;  %v1733_v11 = vmul.f32 %v1729_v4, %v1716_v2  ;;  %v2805_v32 = vld [vmem:[%s4325_s1 + $0x6] ss:$8 sm:$0x3] }
 0x55f   : > { %v1717_v23 = vsel %vm462_vm2, %v1711_v59, %v1715_v43  ;;  %v1719_v26 = vsel %vm462_vm2, %v1715_v43, %v1711_v59  ;;  %v1861_v43 = vrot.slane %v2805_v32, %v3060_v14 }
 0x560   : > { %v1734_v6 = vmul.f32 %v1725_v56, %v1719_v26  ;;  %v1735_v7 = vmul.f32 %v1729_v4, %v1717_v23  ;;  %2120 = vmatprep.subr.bf16.mxu1 %v1705_v44  ;;  %2642 = vmatprep.subr.bf16.mxu0 %v1705_v44  ;;  %v1745_v41 = vpop.permute.xlu1 %1744  ;;  %v2905_v26 = vld [vmem:[%s4332_s8 + $0x8] ss:$20 sps:$4 sm:$0xff]  }
 0x561   : > { %v1748_v42 = vsel %vm496_vm3, %v1741_v30, %v1745_v41  ;;  %v1750_v29 = vsel %vm496_vm3, %v1745_v41, %v1741_v30  ;;  %2121 = vmatpush1.bf16.msra.mxu1 %v1704_v25  ;;  %2643 = vmatpush1.bf16.msra.mxu0 %v1704_v25  ;;  %v1857_v25 = vrot.slane %v2805_v32, %v3058_v13 }
 0x562   : > { %v1736_v60 = vpack.c.bf16 %v1734_v6, %v1732_v63  ;;  %v1747_v19 = vpop.permute.xlu0 %1746  ;;  %v1737_v20 = vpack.c.bf16 %v1735_v7, %v1733_v11  ;;  %v1764_v37 = vmul.f32 %v1757_v62, %v1750_v29  ;;  %v1765_v27 = vmul.f32 %v1761_v45, %v1748_v42 }
 0x563   : > { %v1749_v36 = vsel %vm496_vm3, %v1743_v39, %v1747_v19  ;;  %v1751_v28 = vsel %vm496_vm3, %v1747_v19, %v1743_v39  ;;  %v2823_v41 = vcombine.low %v3920_v38, %v3920_v38  ;;  %v2807_v38 = vld [vmem:[%s4325_s1 + $0x10] ss:$8 sm:$0x3] }
 0x564   : > { %v1766_v53 = vmul.f32 %v1757_v62, %v1751_v28  ;;  %v1767_v0 = vmul.f32 %v1761_v45, %v1749_v36  ;;  %2122 = vmatprep.subr.bf16.mxu1 %v1737_v20  ;;  %2644 = vmatprep.subr.bf16.mxu0 %v1737_v20  ;;  %v1777_v52 = vpop.permute.xlu1 %1776  ;;  %v4368_v36 = vmov 0  }
 0x565   : > { %v1780_v59 = vsel %vm530_vm4, %v3924_v58, %v1777_v52  ;;  %v1782_v30 = vsel %vm530_vm4, %v1777_v52, %v3924_v58  ;;  %2123 = vmatpush1.bf16.msra.mxu1 %v1736_v60  ;;  %2645 = vmatpush1.bf16.msra.mxu0 %v1736_v60  ;;  %v1921_v52 = vrot.slane %v2807_v38, %v3058_v13 }
 0x566   : > { %v1768_v15 = vpack.c.bf16 %v1766_v53, %v1764_v37  ;;  %v1779_v39 = vpop.permute.xlu0 %1778  ;;  %v1769_v33 = vpack.c.bf16 %v1767_v0, %v1765_v27  ;;  %v1796_v54 = vmul.f32 %v1789_v18, %v1782_v30  ;;  %v1797_v16 = vmul.f32 %v1793_v40, %v1780_v59 }
 0x567   : > { %v1781_v61 = vsel %vm530_vm4, %v3926_v50, %v1779_v39  ;;  %v1783_v21 = vsel %vm530_vm4, %v1779_v39, %v3926_v50  ;;  %v1825_v50 = vrot.slane %v2804_v17, %v3058_v13  ;;  %v1925_v59 = vrot.slane %v2807_v38, %v3060_v14 }
 0x568   : > { %v1798_v34 = vmul.f32 %v1789_v18, %v1783_v21  ;;  %v1799_v57 = vmul.f32 %v1793_v40, %v1781_v61  ;;  %2124 = vmatprep.subr.bf16.mxu1 %v1769_v33  ;;  %2646 = vmatprep.subr.bf16.mxu0 %v1769_v33  ;;  %v3996_v58 = vpop.permute.xlu1 %1904 }
 0x569   : > { %2125 = vmatpush1.bf16.msra.mxu1 %v1768_v15  ;;  %2647 = vmatpush1.bf16.msra.mxu0 %v1768_v15 }
 0x56a   : > { %v1800_v55 = vpack.c.bf16 %v1798_v34, %v1796_v54  ;;  %v4001_v56 = vpop.permute.xlu0 %1906  ;;  %v1801_v4 = vpack.c.bf16 %v1799_v57, %v1797_v16 }
 0x56c   : > { %2126 = vmatprep.subr.bf16.mxu1 %v1801_v4  ;;  %2648 = vmatprep.subr.bf16.mxu0 %v1801_v4  ;;  %v1813_v31 = vpop.permute.xlu1 %1812 }
 0x56d   : > { %v1816_v48 = vsel %vm568_vm5, %v3928_v10, %v1813_v31  ;;  %v1818_v49 = vsel %vm568_vm5, %v1813_v31, %v3928_v10  ;;  %2127 = vmatpush1.bf16.msra.mxu1 %v1800_v55  ;;  %2649 = vmatpush1.bf16.msra.mxu0 %v1800_v55  ;;  %v2806_v10 = vld [vmem:[%s4325_s1 + $0x7] ss:$8 sm:$0x3] }
 0x56e   : > { %v1815_v1 = vpop.permute.xlu0 %1814  ;;  %2128 = vmatprep.subr.bf16.mxu1 %v3876_v8  ;;  %2650 = vmatprep.subr.bf16.mxu0 %v3876_v8  ;;  %v1832_v44 = vmul.f32 %v1825_v50, %v1816_v48  ;;  %v1833_v62 = vmul.f32 %v1829_v5, %v1818_v49  ;;  %v1889_v6 = vrot.slane %v2806_v10, %v3058_v13  ;;  %v2908_v31 = vld [vmem:[%s4332_s8 + $0x10] ss:$20 sps:$4 sm:$0xff]  }
 0x56f   : > { %v1817_v2 = vsel %vm568_vm5, %v3930_v22, %v1815_v1  ;;  %v1819_v24 = vsel %vm568_vm5, %v1815_v1, %v3930_v22  ;;  %v1893_v60 = vrot.slane %v2806_v10, %v3060_v14 }
 0x570   : > { %v1834_v63 = vmul.f32 %v1825_v50, %v1817_v2  ;;  %v1835_v8 = vmul.f32 %v1829_v5, %v1819_v24  ;;  %v1845_v23 = vpop.permute.xlu1 %1844 }
 0x571   : > { %v1848_v22 = vsel %vm602_vm6, %v3932_v35, %v1845_v23  ;;  %v1850_v45 = vsel %vm602_vm6, %v1845_v23, %v3932_v35  ;;  %2129 = vmatpush1.bf16.msra.mxu1 %v3874_v51  ;;  %2651 = vmatpush1.bf16.msra.mxu0 %v3874_v51 }
 0x572   : > { %v1836_v46 = vpack.c.bf16 %v1834_v63, %v1832_v44  ;;  %v1847_v11 = vpop.permute.xlu0 %1846  ;;  %v1837_v7 = vpack.c.bf16 %v1835_v8, %v1833_v62  ;;  %v1864_v42 = vmul.f32 %v1857_v25, %v1848_v22  ;;  %v1865_v51 = vmul.f32 %v1861_v43, %v1850_v45 }
 0x573   : > { %v1849_v29 = vsel %vm602_vm6, %v3934_v3, %v1847_v11  ;;  %v1851_v35 = vsel %vm602_vm6, %v1847_v11, %v3934_v3 }
 0x574   : > { %v1866_v19 = vmul.f32 %v1857_v25, %v1849_v29  ;;  %v1867_v20 = vmul.f32 %v1861_v43, %v1851_v35  ;;  %v1877_v18 = vpop.permute.xlu1 %1876  ;;  %2141 = vmatprep.subr.bf16.mxu1 %v1837_v7  ;;  %2131 = vmatmul.mubr.bf16.vlgmr.msra.gmra.mrb[4].mxu1 %v2905_v26  ;;  %v2549_v35 = vld [vmem:[%s4335_s11] sm:$0xff] }
 0x575   : > { %v1880_v37 = vsel %vm636_vm7, %v3936_v47, %v1877_v18  ;;  %v1882_v3 = vsel %vm636_vm7, %v1877_v18, %v3936_v47  ;;  %2142 = vmatpush1.bf16.msra.mxu1 %v1836_v46  ;;  %2173 = vmatprep.mubr.bf16.mxu1 %v4368_v36 }
 0x576   : > { %v1868_v28 = vpack.c.bf16 %v1866_v19, %v1864_v42  ;;  %v1879_v40 = vpop.permute.xlu0 %1878  ;;  %v1869_v27 = vpack.c.bf16 %v1867_v20, %v1865_v51  ;;  %2653 = vmatmul.mubr.bf16.vlgmr.msra.gmra.mrb[8].mxu0 %v2823_v41  ;;  %v1896_v47 = vmul.f32 %v1889_v6, %v1880_v37  ;;  %v1897_v30 = vmul.f32 %v1893_v60, %v1882_v3 }
 0x577   : > { %v1881_v53 = vsel %vm636_vm7, %v3941_v9, %v1879_v40  ;;  %v1883_v0 = vsel %vm636_vm7, %v1879_v40, %v3941_v9 }
 0x578   : > { %v1898_v15 = vmul.f32 %v1889_v6, %v1881_v53  ;;  %v1899_v39 = vmul.f32 %v1893_v60, %v1883_v0  ;;  %v1909_v33 = vpop.permute.xlu1 %1908  ;;  %2143 = vmatprep.subr.bf16.mxu1 %v1869_v27  ;;  %v4152_v6 = vld [vmem:[%s4334_s10 + $0x10] sm:$0xff] }
 0x579   : > { %v1912_v54 = vsel %vm670_vm8, %v3996_v58, %v1909_v33  ;;  %v1914_v61 = vsel %vm670_vm8, %v1909_v33, %v3996_v58  ;;  %2144 = vmatpush1.bf16.msra.mxu1 %v1868_v28 }
 0x57a   : > { %v1900_v9 = vpack.c.bf16 %v1898_v15, %v1896_v47  ;;  %v1911_v21 = vpop.permute.xlu0 %1910  ;;  %v1901_v16 = vpack.c.bf16 %v1899_v39, %v1897_v30  ;;  %v1928_v17 = vmul.f32 %v1921_v52, %v1912_v54  ;;  %v1929_v55 = vmul.f32 %v1925_v59, %v1914_v61  ;;  %v2814_v39 = vld [vmem:[%s4325_s1 + $0x1] ss:$8 sm:$0x3] }
 0x57b   : > { %v1913_v34 = vsel %vm670_vm8, %v4001_v56, %v1911_v21  ;;  %v1915_v57 = vsel %vm670_vm8, %v1911_v21, %v4001_v56 }
 0x57c   : > { %v1930_v4 = vmul.f32 %v1921_v52, %v1913_v34  ;;  %v1931_v50 = vmul.f32 %v1925_v59, %v1915_v57  ;;  %2145 = vmatprep.subr.bf16.mxu1 %v1901_v16  ;;  %v2208_v52 = vld [vmem:[%s4325_s1] ss:$8 sm:$0x3]  ;;  %v2249_v34 = vrot.slane %v2814_v39, %v3060_v14 }
 0x57d   : > { %2146 = vmatpush1.bf16.msra.mxu1 %v1900_v9  ;;  %v2213_v47 = vrot.slane %v2208_v52, %v3058_v13  ;;  %v2217_v30 = vrot.slane %v2208_v52, %v3060_v14 }
 0x57e   : > { %v1932_v5 = vpack.c.bf16 %v1930_v4, %v1928_v17  ;;  %v1933_v58 = vpack.c.bf16 %v1931_v50, %v1929_v55 }
 0x580   : > { %2147 = vmatprep.subr.bf16.mxu1 %v1933_v58 }
 0x581   : > { %2148 = vmatpush1.bf16.msra.mxu1 %v1932_v5 }
 0x582   : > { %2661 = vmatprep.subr.bf16.mxu1 %v1837_v7  ;;  %v2826_v7 = vcombine.high %v4152_v6, %v4152_v6 }
 0x584   : > { %2813 = vmatmul.mubr.msk.bf16.vlgmr.msra.gmra.mrb[4].mxu1 %vm2051_vm15, %v2908_v31 }
 0x585   : > { %2662 = vmatpush1.bf16.msra.mxu1 %v1836_v46  ;;  %2827 = vmatprep.mubr.msk.bf16.mxu1 %vm2575_vm12, %v2826_v7 }
 0x586   : > { %2663 = vmatprep.subr.bf16.mxu1 %v1869_v27 }
 0x589   : > { %2664 = vmatpush1.bf16.msra.mxu1 %v1868_v28  ;;  %v2019_v56 = vpop.permute.xlu1 %2018 }
 0x58a   : > { %2665 = vmatprep.subr.bf16.mxu1 %v1901_v16  ;;  %v2245_v16 = vrot.slane %v2814_v39, %v3058_v13 }
 0x58b   : > { %v2024_v1 = vpop.permute.xlu0 %2023 }
 0x58d   : > { %2666 = vmatpush1.bf16.msra.mxu1 %v1900_v9 }
 0x58e   : > { %2667 = vmatprep.subr.bf16.mxu1 %v1933_v58 }
 0x591   : > { %2668 = vmatpush1.bf16.msra.mxu1 %v1932_v5  ;;  %v2815_v5 = vld [vmem:[%s4325_s1 + $0x2] ss:$8 sm:$0x3] }
 0x649   : > { %v4160_v41 = vpop.f32.mrb[8].mxu0 }
 0x64a   : > { %v4162_v42 = vpop.f32.mrb[9].mxu0 }
 0x64b   : > { %v2658_v29 = vpop.f32.mrb[10].mxu0 }
 0x64c   : > { %v2659_v60 = vpop.f32.mrb[11].mxu0 }
 0x657   : > { %v2175_v32 = vpop.f32.mrb[4].mxu1 }
 0x658   : > { %v2840_v48 = vadd.f32 %v2175_v32, %v2019_v56  ;;  %v2177_v49 = vpop.f32.mrb[5].mxu1 }
 0x659   : > { %v2841_v2 = vadd.f32 %v2177_v49, %v2019_v56  ;;  %v2179_v24 = vpop.f32.mrb[6].mxu1 }
 0x65a   : > { %vm2184_vm0 = vcmp.gt.f32.partialorder %v2840_v48, 0.0  ;;  %v2188_v25 = vmul.f32 0.2, %v2840_v48  ;;  %v2842_v43 = vadd.f32 %v2179_v24, %v2024_v1  ;;  %v2181_v10 = vpop.f32.mrb[7].mxu1  ;;  %v2281_v24 = vrot.slane %v2815_v5, %v3060_v14 }
 0x65b   : > { %v2189_v44 = vmul.f32 0.2, %v2841_v2  ;;  %v2843_v62 = vadd.f32 %v2181_v10, %v2024_v1  ;;  %vm2185_vm9 = vcmp.gt.f32.partialorder %v2841_v2, 0.0 }
 0x65c   : > { %v4081_v63 = vsel %vm2184_vm0, %v2840_v48, %v2188_v25  ;;  %vm2186_vm10 = vcmp.gt.f32.partialorder %v2842_v43, 0.0  ;;  %v2190_v8 = vmul.f32 0.2, %v2842_v43 }
 0x65d   : > { %vm2187_vm11 = vcmp.gt.f32.partialorder %v2843_v62, 0.0  ;;  %v2191_v23 = vmul.f32 0.2, %v2843_v62  ;;  %2196 = vrot.lane.b32.xlu1 %v4081_v63, %s2921_s27  ;;  %v4087_v22 = vsel %vm2185_vm9, %v2841_v2, %v2189_v44  ;;  %v2277_v2 = vrot.slane %v2815_v5, %v3058_v13 }
 0x65e   : > { %v4085_v26 = vsel %vm2186_vm10, %v2842_v43, %v2190_v8  ;;  %v2816_v8 = vld [vmem:[%s4325_s1 + $0x3] ss:$8 sm:$0x3] }
 0x65f   : > { %v4089_v45 = vsel %vm2187_vm11, %v2843_v62, %v2191_v23  ;;  %2198 = vrot.lane.b32.xlu0 %v4085_v26, %s2921_s27  ;;  %v2324_v46 = vpack.c.bf16 %v4085_v26, %v4081_v63 }
 0x660   : > { %v2325_v11 = vpack.c.bf16 %v4089_v45, %v4087_v22 }
 0x661   : > { %2228 = vrot.lane.b32.xlu1 %v4081_v63, %s2922_s28 }
 0x663   : > { %2230 = vrot.lane.b32.xlu0 %v4085_v26, %s2922_s28 }
 0x665   : > { %2260 = vrot.lane.b32.xlu1 %v4081_v63, %s2923_s29 }
 0x667   : > { %2262 = vrot.lane.b32.xlu0 %v4085_v26, %s2923_s29 }
 0x669   : > { %2292 = vrot.lane.b32.xlu1 %v4081_v63, %s2924_s30 }
 0x66b   : > { %2294 = vrot.lane.b32.xlu0 %v4085_v26, %s2924_s30 }
 0x66d   : > { %2328 = vrot.lane.b32.xlu1 %v4081_v63, %s2925_s13 }
 0x66f   : > { %2330 = vrot.lane.b32.xlu0 %v4085_v26, %s2925_s13 }
 0x671   : > { %2360 = vrot.lane.b32.xlu1 %v4081_v63, %s2926_s14 }
 0x673   : > { %2362 = vrot.lane.b32.xlu0 %v4085_v26, %s2926_s14 }
 0x675   : > { %2392 = vrot.lane.b32.xlu1 %v4081_v63, %s2927_s15 }
 0x677   : > { %2394 = vrot.lane.b32.xlu0 %v4085_v26, %s2927_s15 }
 0x679   : > { %2200 = vrot.lane.b32.xlu1 %v4087_v22, %s2921_s27 }
 0x67b   : > { %2202 = vrot.lane.b32.xlu0 %v4089_v45, %s2921_s27 }
 0x67d   : > { %2232 = vrot.lane.b32.xlu1 %v4087_v22, %s2922_s28 }
 0x67f   : > { %2234 = vrot.lane.b32.xlu0 %v4089_v45, %s2922_s28 }
 0x681   : > { %2264 = vrot.lane.b32.xlu1 %v4087_v22, %s2923_s29 }
 0x683   : > { %2266 = vrot.lane.b32.xlu0 %v4089_v45, %s2923_s29 }
 0x685   : > { %2296 = vrot.lane.b32.xlu1 %v4087_v22, %s2924_s30 }
 0x687   : > { %2298 = vrot.lane.b32.xlu0 %v4089_v45, %s2924_s30 }
 0x689   : > { %2424 = vrot.lane.b32.xlu1 %v4081_v63, %s2928_s18 }
 0x68b   : > { %2426 = vrot.lane.b32.xlu0 %v4085_v26, %s2928_s18 }
 0x68d   : > { %2332 = vrot.lane.b32.xlu1 %v4087_v22, %s2925_s13 }
 0x68f   : > { %2334 = vrot.lane.b32.xlu0 %v4089_v45, %s2925_s13  ;;  %s2831_s13 = sshll.u32 %s4370_s22, 4 }
 0x691   : > { %2364 = vrot.lane.b32.xlu1 %v4087_v22, %s2926_s14 }
 0x693   : > { %2366 = vrot.lane.b32.xlu0 %v4089_v45, %s2926_s14 }
 0x695   : > { %2396 = vrot.lane.b32.xlu1 %v4087_v22, %s2927_s15 }
 0x697   : > { %2398 = vrot.lane.b32.xlu0 %v4089_v45, %s2927_s15 }
 0x699   : > { %2428 = vrot.lane.b32.xlu1 %v4087_v22, %s2928_s18  ;;  %v2819_v22 = vld [vmem:[%s4325_s1 + $0x7] ss:$8 sm:$0x3] }
 0x69b   : > { %2430 = vrot.lane.b32.xlu0 %v4089_v45, %s2928_s18  ;;  %s413_s18 = scalar_lea.vmem %s4336_s12, %s2831_s13 }
 0x69d   : > { %2552 = vperm.xlu1 %2886, %v2549_v35  }
 0x6cf   : > { %v2197_v51 = vpop.permute.xlu1 %2196 }
 0x6d1   : > { %v2199_v19 = vpop.permute.xlu0 %2198 }
 0x6d3   : > { %v2229_v20 = vpop.permute.xlu1 %2228 }
 0x6d5   : > { %v2231_v18 = vpop.permute.xlu0 %2230 }
 0x6d7   : > { %v2261_v38 = vpop.permute.xlu1 %2260 }
 0x6d9   : > { %v2263_v37 = vpop.permute.xlu0 %2262 }
 0x6db   : > { %v2293_v3 = vpop.permute.xlu1 %2292 }
 0x6dd   : > { %v4171_v36 = vpop.permute.xlu0 %2294 }
 0x6df   : > { %v4173_v28 = vpop.permute.xlu1 %2328 }
 0x6e1   : > { %v4175_v40 = vpop.permute.xlu0 %2330 }
 0x6e3   : > { %v4177_v27 = vpop.permute.xlu1 %2360 }
 0x6e5   : > { %v4179_v53 = vpop.permute.xlu0 %2362 }
 0x6e7   : > { %v4181_v0 = vpop.permute.xlu1 %2392 }
 0x6e9   : > { %v4186_v59 = vpop.permute.xlu0 %2394 }
 0x6eb   : > { %v2201_v15 = vpop.permute.xlu1 %2200 }
 0x6ec   : > { %v2204_v33 = vsel %vm429_vm1, %v2197_v51, %v2201_v15  ;;  %v2206_v54 = vsel %vm429_vm1, %v2201_v15, %v2197_v51 }
 0x6ed   : > { %v2203_v61 = vpop.permute.xlu0 %2202  ;;  %v2220_v57 = vmul.f32 %v2213_v47, %v2206_v54  ;;  %v2221_v17 = vmul.f32 %v2217_v30, %v2204_v33 }
 0x6ee   : > { %v2205_v9 = vsel %vm429_vm1, %v2199_v19, %v2203_v61  ;;  %v2207_v21 = vsel %vm429_vm1, %v2203_v61, %v2199_v19 }
 0x6ef   : > { %v2222_v55 = vmul.f32 %v2213_v47, %v2207_v21  ;;  %v2223_v4 = vmul.f32 %v2217_v30, %v2205_v9  ;;  %v2233_v50 = vpop.permute.xlu1 %2232 }
 0x6f0   : > { %v2236_v58 = vsel %vm462_vm2, %v2229_v20, %v2233_v50  ;;  %v2238_v31 = vsel %vm462_vm2, %v2233_v50, %v2229_v20  ;;  %v2309_v20 = vrot.slane %v2816_v8, %v3058_v13 }
 0x6f1   : > { %v2224_v56 = vpack.c.bf16 %v2222_v55, %v2220_v57  ;;  %v2235_v32 = vpop.permute.xlu0 %2234  ;;  %v2225_v48 = vpack.c.bf16 %v2223_v4, %v2221_v17  ;;  %v2252_v25 = vmul.f32 %v2245_v16, %v2238_v31  ;;  %v2253_v43 = vmul.f32 %v2249_v34, %v2236_v58 }
 0x6f2   : > { %v2237_v49 = vsel %vm462_vm2, %v2231_v18, %v2235_v32  ;;  %v2239_v1 = vsel %vm462_vm2, %v2235_v32, %v2231_v18  ;;  %v2313_v18 = vrot.slane %v2816_v8, %v3060_v14 }
 0x6f3   : > { %v2254_v10 = vmul.f32 %v2245_v16, %v2239_v1  ;;  %v2255_v44 = vmul.f32 %v2249_v34, %v2237_v49  ;;  %2669 = vmatprep.subr.bf16.mxu1 %v2225_v48  ;;  %v2265_v62 = vpop.permute.xlu1 %2264 }
 0x6f4   : > { %v2268_v23 = vsel %vm496_vm3, %v2261_v38, %v2265_v62  ;;  %v2270_v7 = vsel %vm496_vm3, %v2265_v62, %v2261_v38  ;;  %2670 = vmatpush1.bf16.msra.mxu1 %v2224_v56  ;;  %v2818_v56 = vld [vmem:[%s4325_s1 + $0x6] ss:$8 sm:$0x3] }
 0x6f5   : > { %v2256_v29 = vpack.c.bf16 %v2254_v10, %v2252_v25  ;;  %v2267_v35 = vpop.permute.xlu0 %2266  ;;  %v2257_v60 = vpack.c.bf16 %v2255_v44, %v2253_v43  ;;  %v2284_v52 = vmul.f32 %v2277_v2, %v2270_v7  ;;  %v2285_v47 = vmul.f32 %v2281_v24, %v2268_v23 }
 0x6f6   : > { %v2269_v51 = vsel %vm496_vm3, %v2263_v37, %v2267_v35  ;;  %v2271_v19 = vsel %vm496_vm3, %v2267_v35, %v2263_v37  ;;  %v2381_v25 = vrot.slane %v2818_v56, %v3060_v14  ;;  %v2409_v35 = vrot.slane %v2819_v22, %v3058_v13 }
 0x6f7   : > { %v2286_v30 = vmul.f32 %v2277_v2, %v2271_v19  ;;  %v2287_v15 = vmul.f32 %v2281_v24, %v2269_v51  ;;  %2671 = vmatprep.subr.bf16.mxu1 %v2257_v60  ;;  %v2297_v38 = vpop.permute.xlu1 %2296  ;;  %v2377_v24 = vrot.slane %v2818_v56, %v3058_v13  ;;  %v2413_v60 = vrot.slane %v2819_v22, %v3060_v14 }
 0x6f8   : > { %v2300_v39 = vsel %vm530_vm4, %v2293_v3, %v2297_v38  ;;  %v2302_v33 = vsel %vm530_vm4, %v2297_v38, %v2293_v3  ;;  %2672 = vmatpush1.bf16.msra.mxu1 %v2256_v29  ;;  %v2817_v3 = vld [vmem:[%s4325_s1 + $0x5] ss:$8 sm:$0x3] }
 0x6f9   : > { %v2288_v54 = vpack.c.bf16 %v2286_v30, %v2284_v52  ;;  %v2299_v61 = vpop.permute.xlu0 %2298  ;;  %v2289_v37 = vpack.c.bf16 %v2287_v15, %v2285_v47  ;;  %v2316_v16 = vmul.f32 %v2309_v20, %v2302_v33  ;;  %v2317_v34 = vmul.f32 %v2313_v18, %v2300_v39 }
 0x6fa   : > { %v2301_v9 = vsel %vm530_vm4, %v4171_v36, %v2299_v61  ;;  %v2303_v21 = vsel %vm530_vm4, %v2299_v61, %v4171_v36  ;;  %v2345_v58 = vrot.slane %v2817_v3, %v3058_v13  ;;  %v2349_v36 = vrot.slane %v2817_v3, %v3060_v14 }
 0x6fb   : > { %v2318_v57 = vmul.f32 %v2309_v20, %v2303_v21  ;;  %v2319_v17 = vmul.f32 %v2313_v18, %v2301_v9  ;;  %2673 = vmatprep.subr.bf16.mxu1 %v2289_v37  ;;  %v2425_v55 = vpop.permute.xlu1 %2424 }
 0x6fc   : > { %2674 = vmatpush1.bf16.msra.mxu1 %v2288_v54 }
 0x6fd   : > { %v2320_v4 = vpack.c.bf16 %v2318_v57, %v2316_v16  ;;  %v4242_v50 = vpop.permute.xlu0 %2426  ;;  %v2321_v5 = vpack.c.bf16 %v2319_v17, %v2317_v34 }
 0x6ff   : > { %2675 = vmatprep.subr.bf16.mxu1 %v2321_v5  ;;  %v2333_v31 = vpop.permute.xlu1 %2332 }
 0x700   : > { %v2336_v32 = vsel %vm568_vm5, %v4173_v28, %v2333_v31  ;;  %v2338_v48 = vsel %vm568_vm5, %v2333_v31, %v4173_v28  ;;  %2676 = vmatpush1.bf16.msra.mxu1 %v2320_v4 }
 0x701   : > { %v2335_v49 = vpop.permute.xlu0 %2334  ;;  %2677 = vmatprep.subr.bf16.mxu1 %v2325_v11  ;;  %v2352_v43 = vmul.f32 %v2345_v58, %v2336_v32  ;;  %v2353_v28 = vmul.f32 %v2349_v36, %v2338_v48 }
 0x702   : > { %v2337_v1 = vsel %vm568_vm5, %v4175_v40, %v2335_v49  ;;  %v2339_v2 = vsel %vm568_vm5, %v2335_v49, %v4175_v40 }
 0x703   : > { %v2354_v10 = vmul.f32 %v2345_v58, %v2337_v1  ;;  %v2355_v44 = vmul.f32 %v2349_v36, %v2339_v2  ;;  %v2365_v62 = vpop.permute.xlu1 %2364  ;;  %v2825_v58 = vcombine.low %v4152_v6, %v4152_v6 }
 0x704   : > { %v2368_v45 = vsel %vm602_vm6, %v4177_v27, %v2365_v62  ;;  %v2370_v11 = vsel %vm602_vm6, %v2365_v62, %v4177_v27  ;;  %2678 = vmatpush1.bf16.msra.mxu1 %v2324_v46  ;;  %v2820_v46 = vld [vmem:[%s4325_s1 + $0x10] ss:$8 sm:$0x3] }
 0x705   : > { %v2356_v40 = vpack.c.bf16 %v2354_v10, %v2352_v43  ;;  %v2367_v8 = vpop.permute.xlu0 %2366  ;;  %v2357_v23 = vpack.c.bf16 %v2355_v44, %v2353_v28  ;;  %v2384_v27 = vmul.f32 %v2377_v24, %v2368_v45  ;;  %v2385_v51 = vmul.f32 %v2381_v25, %v2370_v11 }
 0x706   : > { %v2369_v7 = vsel %vm602_vm6, %v4179_v53, %v2367_v8  ;;  %v2371_v29 = vsel %vm602_vm6, %v2367_v8, %v4179_v53  ;;  %v2441_v38 = vrot.slane %v2820_v46, %v3058_v13  ;;  %v2445_v39 = vrot.slane %v2820_v46, %v3060_v14 }
 0x707   : > { %v2386_v19 = vmul.f32 %v2377_v24, %v2369_v7  ;;  %v2387_v63 = vmul.f32 %v2381_v25, %v2371_v29  ;;  %v2397_v26 = vpop.permute.xlu1 %2396  ;;  %2679 = vmatprep.subr.bf16.mxu1 %v2357_v23 }
 0x708   : > { %v2400_v20 = vsel %vm636_vm7, %v4181_v0, %v2397_v26  ;;  %v2402_v53 = vsel %vm636_vm7, %v2397_v26, %v4181_v0  ;;  %2680 = vmatpush1.bf16.msra.mxu1 %v2356_v40 }
 0x709   : > { %v2388_v18 = vpack.c.bf16 %v2386_v19, %v2384_v27  ;;  %v2399_v52 = vpop.permute.xlu0 %2398  ;;  %v2389_v47 = vpack.c.bf16 %v2387_v63, %v2385_v51  ;;  %v2416_v33 = vmul.f32 %v2409_v35, %v2400_v20  ;;  %v2417_v54 = vmul.f32 %v2413_v60, %v2402_v53 }
 0x70a   : > { %v2401_v30 = vsel %vm636_vm7, %v4186_v59, %v2399_v52  ;;  %v2403_v15 = vsel %vm636_vm7, %v2399_v52, %v4186_v59 }
 0x70b   : > { %v2418_v61 = vmul.f32 %v2409_v35, %v2401_v30  ;;  %v2419_v0 = vmul.f32 %v2413_v60, %v2403_v15  ;;  %v2429_v37 = vpop.permute.xlu1 %2428  ;;  %2681 = vmatprep.subr.bf16.mxu1 %v2389_v47 }
 0x70c   : > { %v2432_v9 = vsel %vm670_vm8, %v2425_v55, %v2429_v37  ;;  %v2434_v21 = vsel %vm670_vm8, %v2429_v37, %v2425_v55  ;;  %2682 = vmatpush1.bf16.msra.mxu1 %v2388_v18 }
 0x70d   : > { %v2420_v16 = vpack.c.bf16 %v2418_v61, %v2416_v33  ;;  %v2431_v34 = vpop.permute.xlu0 %2430  ;;  %v2421_v59 = vpack.c.bf16 %v2419_v0, %v2417_v54  ;;  %v2448_v57 = vmul.f32 %v2441_v38, %v2432_v9  ;;  %v2449_v17 = vmul.f32 %v2445_v39, %v2434_v21 }
 0x70e   : > { %v2433_v13 = vsel %vm670_vm8, %v4242_v50, %v2431_v34  ;;  %v2435_v14 = vsel %vm670_vm8, %v2431_v34, %v4242_v50 }
 0x70f   : > { %v2450_v3 = vmul.f32 %v2441_v38, %v2433_v13  ;;  %v2451_v4 = vmul.f32 %v2445_v39, %v2435_v14  ;;  %2683 = vmatprep.subr.bf16.mxu1 %v2421_v59 }
 0x710   : > { %2684 = vmatpush1.bf16.msra.mxu1 %v2420_v16 }
 0x711   : > { %v2452_v55 = vpack.c.bf16 %v2450_v3, %v2448_v57  ;;  %v2453_v5 = vpack.c.bf16 %v2451_v4, %v2449_v17 }
 0x713   : > { %2685 = vmatprep.subr.bf16.mxu1 %v2453_v5 }
 0x714   : > { %2686 = vmatpush1.bf16.msra.mxu1 %v2452_v55 }
 0x717   : > { %2694 = vmatmul.mubr.bf16.vlgmr.msra.gmra.mrb[8].mxu1 %v2825_v58 }
 0x71c   : > { %v2553_v36 = vpop.permute.xlu1 %2552 }
 0x71d   : > { %v2844_v31 = vadd.f32 %v4160_v41, %v2553_v36  ;;  %v2846_v12 = vadd.f32 %v4162_v42, %v2553_v36 }
 0x7ea   : > { %v2695_v50 = vpop.f32.mrb[8].mxu1 }
 0x7eb   : > { %v2845_v56 = vadd.f32 %v2844_v31, %v2695_v50  ;;  %v2697_v32 = vpop.f32.mrb[9].mxu1 }
 0x7ec   : > { %v2847_v48 = vadd.f32 %v2846_v12, %v2697_v32  ;;  %v2699_v49 = vpop.f32.mrb[10].mxu1 }
 0x7ed   : > { %2702 = vst [vmem:[%s413_s18] sm:$0xff] %v2845_v56  ;;  %v2700_v1 = vpop.f32.mrb[11].mxu1 }
 0x7ee   : > { %2703 = vst [vmem:[%s413_s18 + $0x8] sm:$0xff] %v2847_v48 }
 0x7ef PF: > { %s22_s21 = sadd.s32 1, %s2919_s21  }
 0x7f0   : > { %p19_p4 = scmp.ge.s32.totalorder %s22_s21, 4  }
 0x7f2   :  { %21 = sbr.rel (!%p19_p4) target bundleno = 1 (0x1), region = 105 }

</bundles_post_ra>
